<compile_context>
chip_gen: v7x
topology: tpu7x:2x2x1
jax: 0.10.0
libtpu: 0.0.40
codegen_flags: <defaults>
</compile_context>

<pallas_src>
import functools
import numpy as np

import jax
import jax.numpy as jnp
from jax.experimental import pallas as pl
from jax.experimental.pallas import tpu as pltpu


NEG_INF = -1e30                      # finite "minus infinity": no NaN on fully-masked rows
LN_EPS = 1e-5


def _vmem_limit_bytes(default=64 * 1024 * 1024):
    """Scoped-VMEM budget derived from the actual chip (64 MiB/TC on v7x,
    128 MiB on v5e/v6e), leaving ~25% headroom.  Safe fallback if the query
    is unavailable."""
    try:
        info = pltpu.get_tpu_info()
        cap = getattr(info, "vmem_capacity_bytes", None)
        if cap:
            return int(cap) * 3 // 4
    except Exception:
        pass
    return default


VMEM_LIMIT = _vmem_limit_bytes()


def _pick_tile(dim, target, align):
    """Largest tile <= target that divides dim and is a multiple of align.
    Falls back to the full dim (block == full array dim is always legal)."""
    if dim <= target:
        return dim
    t = (target // align) * align
    while t >= align:
        if dim % t == 0:
            return t
        t -= align
    return dim


def _row_tile(m, target=512):
    """Row tile: large (amortize ~0.35us/step overhead) but split so there are
    >=2 grid steps when possible (lets v7x's 2 TensorCores both get work)."""
    tm = _pick_tile(m, target, 16)
    if m // tm < 2:
        half = tm // 2
        if half >= 16 and half % 16 == 0 and m % half == 0:
            tm = half
    return tm


def _weight_spec(block_shape, index_map, deep_buffer=False):
    """Weight-stream BlockSpec; optionally 3-deep buffered when the kernel has a
    single M tile (no activation reuse to hide the weight DMA behind)."""
    if deep_buffer and hasattr(pl, "Buffered"):
        try:
            return pl.BlockSpec(block_shape, index_map, pipeline_mode=pl.Buffered(3))
        except TypeError:
            pass
    return pl.BlockSpec(block_shape, index_map)


# ----------------------------------------------------------------------------
# Shared in-kernel helpers
# ----------------------------------------------------------------------------

def _heads_from_lanes(mat, h, d, transpose=False):
    """(S, h*d) -> (h, S, d)  (or (h, d, S) if transpose) via static lane slices."""
    parts = []
    for i in range(h):
        blk = mat[:, i * d:(i + 1) * d]
        parts.append(blk.T if transpose else blk)
    return jnp.stack(parts, axis=0).astype(jnp.bfloat16)


def _attention_core(q_h, k_h, v_h, kbias, *, scale, causal):
    """q_h (h,S,dk), k_h (h,dk,Skv) pre-transposed, v_h (h,Skv,dv),
    kbias (1,1,Skv) additive.  Returns (S, h*dv) bf16, lane-dense."""
    h = q_h.shape[0]
    att = jnp.einsum("hqd,hdk->hqk", q_h, k_h,
                     preferred_element_type=jnp.float32) * scale          # (h,S,Skv)
    att = att + kbias
    if causal:
        nq, nk = att.shape[1], att.shape[2]
        qi = jax.lax.broadcasted_iota(jnp.int32, (nq, nk), 0)
        ki = jax.lax.broadcasted_iota(jnp.int32, (nq, nk), 1)
        att = jnp.where((ki > qi)[None], NEG_INF, att)
    m = jnp.max(att, axis=-1, keepdims=True)
    e = jnp.exp(att - m)
    s = jnp.sum(e, axis=-1, keepdims=True)
    p = (e * pl.reciprocal(s, approx=True)).astype(jnp.bfloat16)
    ctx = jnp.einsum("hqk,hkd->hqd", p, v_h,
                     preferred_element_type=jnp.float32)                  # (h,S,dv)
    return jnp.concatenate([ctx[i] for i in range(h)],
                           axis=-1).astype(jnp.bfloat16)                  # (S,h*dv)


def _res_ln_mask(y, x_res, g, b, rowmask, eps):
    """LayerNorm(x_res + y) * rowmask, all f32 math."""
    y = y + x_res
    mu = jnp.mean(y, axis=-1, keepdims=True)
    var = jnp.mean((y - mu) * (y - mu), axis=-1, keepdims=True)
    y = (y - mu) * jax.lax.rsqrt(var + eps)
    y = y * g.astype(jnp.float32) + b.astype(jnp.float32)
    return y * rowmask


# ----------------------------------------------------------------------------
# Fused sublayer kernels (one pallas_call per sublayer, grid over batch)
# ----------------------------------------------------------------------------

def _self_attn_layer_kernel(x_ref, wqkv_ref, bqkv_ref, wo_ref, bo_ref,
                            g_ref, beta_ref, kbias_ref, mask_ref, o_ref,
                            *, h, d_k, d_v, scale, eps):
    x = x_ref[0]                                                          # (S, D) bf16
    hdk = h * d_k
    # fused Q|K|V projection: one lane-dense MXU pass, f32 accumulate
    qkv = jnp.dot(x, wqkv_ref[...], preferred_element_type=jnp.float32)
    qkv = qkv + bqkv_ref[...].astype(jnp.float32)                         # (S, 2hdk+hdv)

    q_h = _heads_from_lanes(qkv[:, :hdk], h, d_k)                         # (h, S, dk)
    k_h = _heads_from_lanes(qkv[:, hdk:2 * hdk], h, d_k, transpose=True)  # (h, dk, S)
    v_h = _heads_from_lanes(qkv[:, 2 * hdk:], h, d_v)                     # (h, S, dv)

    ctx = _attention_core(q_h, k_h, v_h, kbias_ref[...],
                          scale=scale, causal=True)                       # (S, h*dv)

    # output projection + residual + LayerNorm + mask_queries
    y = jnp.dot(ctx, wo_ref[...], preferred_element_type=jnp.float32)
    y = y + bo_ref[...].astype(jnp.float32)
    y = _res_ln_mask(y, x.astype(jnp.float32), g_ref[...], beta_ref[...],
                     mask_ref[0], eps)
    o_ref[0] = y.astype(o_ref.dtype)


def _cross_attn_layer_kernel(x_ref, enc_ref, wq_ref, bq_ref, wkv_ref, bkv_ref,
                             wo_ref, bo_ref, g_ref, beta_ref, kbias_ref,
                             mask_ref, o_ref, *, h, d_k, d_v, scale, eps):
    x = x_ref[0]                                                          # (S, D)
    enc = enc_ref[0]                                                      # (S_enc, D)
    hdk = h * d_k

    q = jnp.dot(x, wq_ref[...], preferred_element_type=jnp.float32)
    q = q + bq_ref[...].astype(jnp.float32)                               # (S, hdk)
    kv = jnp.dot(enc, wkv_ref[...], preferred_element_type=jnp.float32)
    kv = kv + bkv_ref[...].astype(jnp.float32)                            # (S_enc, hdk+hdv)

    q_h = _heads_from_lanes(q, h, d_k)                                    # (h, S, dk)
    k_h = _heads_from_lanes(kv[:, :hdk], h, d_k, transpose=True)          # (h, dk, S_enc)
    v_h = _heads_from_lanes(kv[:, hdk:], h, d_v)                          # (h, S_enc, dv)

    ctx = _attention_core(q_h, k_h, v_h, kbias_ref[...],
                          scale=scale, causal=False)                      # (S, h*dv)

    y = jnp.dot(ctx, wo_ref[...], preferred_element_type=jnp.float32)
    y = y + bo_ref[...].astype(jnp.float32)
    y = _res_ln_mask(y, x.astype(jnp.float32), g_ref[...], beta_ref[...],
                     mask_ref[0], eps)
    o_ref[0] = y.astype(o_ref.dtype)


def _pwff_layer_kernel(x_ref, w1_ref, b1_ref, w2_ref, b2_ref, g_ref, beta_ref,
                       mask_ref, o_ref, *, eps):
    x = x_ref[0]                                                          # (S, D) bf16
    h1 = jnp.dot(x, w1_ref[...], preferred_element_type=jnp.float32)
    h1 = jnp.maximum(h1 + b1_ref[...].astype(jnp.float32), 0.0).astype(jnp.bfloat16)
    y = jnp.dot(h1, w2_ref[...], preferred_element_type=jnp.float32)
    y = y + b2_ref[...].astype(jnp.float32)
    y = _res_ln_mask(y, x.astype(jnp.float32), g_ref[...], beta_ref[...],
                     mask_ref[0], eps)
    o_ref[0] = y.astype(o_ref.dtype)


# ----------------------------------------------------------------------------
# Final vocab projection: tiled logits + online row stats, then normalize
# ----------------------------------------------------------------------------

def _logits_stats_kernel(x_ref, w_ref, logits_ref, m_ref, l_ref, acc_ref):
    j = pl.program_id(1)
    k = pl.program_id(2)

    @pl.when(jnp.logical_and(j == 0, k == 0))
    def _():
        m_ref[...] = jnp.full_like(m_ref, NEG_INF)
        l_ref[...] = jnp.zeros_like(l_ref)

    @pl.when(k == 0)
    def _():
        acc_ref[...] = jnp.zeros_like(acc_ref)

    acc_ref[...] += jnp.dot(x_ref[...], w_ref[...],
                            preferred_element_type=jnp.float32)

    @pl.when(k == pl.num_programs(2) - 1)
    def _():
        blk = acc_ref[...]
        logits_ref[...] = blk
        bmax = jnp.max(blk, axis=-1, keepdims=True)
        m_new = jnp.maximum(m_ref[...], bmax)
        l_ref[...] = (l_ref[...] * jnp.exp(m_ref[...] - m_new)
                      + jnp.sum(jnp.exp(blk - m_new), axis=-1, keepdims=True))
        m_ref[...] = m_new


def _log_softmax_apply_kernel(logits_ref, m_ref, l_ref, o_ref):
    o_ref[...] = (logits_ref[...] - m_ref[...]
                  - jnp.log(l_ref[...])).astype(o_ref.dtype)


def pallas_logits_log_softmax(x, w):
    """log_softmax(x @ w) with the vocab axis tiled (bounded VMEM at any vocab)."""
    M, K = x.shape
    K2, V = w.shape
    assert K == K2
    tm = _row_tile(M, 256)
    tk = _pick_tile(K, 1024, 128)
    tn = _pick_tile(V, 1024, 128)
    grid = (M // tm, V // tn, K // tk)
    w_spec = _weight_spec((tk, tn), lambda i, j, k: (k, j),
                          deep_buffer=(M // tm == 1))

    logits, mrow, lrow = pl.pallas_call(
        _logits_stats_kernel,
        out_shape=(jax.ShapeDtypeStruct((M, V), jnp.float32),
                   jax.ShapeDtypeStruct((M, 1), jnp.float32),
                   jax.ShapeDtypeStruct((M, 1), jnp.float32)),
        grid=grid,
        in_specs=[pl.BlockSpec((tm, tk), lambda i, j, k: (i, k)),
                  w_spec],
        out_specs=(pl.BlockSpec((tm, tn), lambda i, j, k: (i, j)),
                   pl.BlockSpec((tm, 1), lambda i, j, k: (i, 0)),
                   pl.BlockSpec((tm, 1), lambda i, j, k: (i, 0))),
        scratch_shapes=[pltpu.VMEM((tm, tn), jnp.float32)],
        compiler_params=pltpu.CompilerParams(
            dimension_semantics=("parallel", "arbitrary", "arbitrary"),
            vmem_limit_bytes=VMEM_LIMIT),
    )(x, w)

    return pl.pallas_call(
        _log_softmax_apply_kernel,
        out_shape=jax.ShapeDtypeStruct((M, V), jnp.float32),
        grid=(M // tm, V // tn),
        in_specs=[pl.BlockSpec((tm, tn), lambda i, j: (i, j)),
                  pl.BlockSpec((tm, 1), lambda i, j: (i, 0)),
                  pl.BlockSpec((tm, 1), lambda i, j: (i, 0))],
        out_specs=pl.BlockSpec((tm, tn), lambda i, j: (i, j)),
        compiler_params=pltpu.CompilerParams(
            dimension_semantics=("parallel", "parallel"),
            vmem_limit_bytes=VMEM_LIMIT),
    )(logits, mrow, lrow)


# ----------------------------------------------------------------------------
# Fused sublayer wrappers
# ----------------------------------------------------------------------------

def _const2(block_shape):
    return pl.BlockSpec(block_shape, lambda b: (0, 0))


def pallas_self_attn_layer(x3d, p, kbias, rowmask, h, d_k, d_v, eps=LN_EPS):
    B, S, D = x3d.shape
    qkv_n = p["w_qkv"].shape[1]
    hdv = h * d_v
    kernel = functools.partial(_self_attn_layer_kernel, h=h, d_k=d_k, d_v=d_v,
                               scale=1.0 / float(np.sqrt(d_k)), eps=eps)
    return pl.pallas_call(
        kernel,
        out_shape=jax.ShapeDtypeStruct((B, S, D), jnp.bfloat16),
        grid=(B,),
        in_specs=[
            pl.BlockSpec((1, S, D), lambda b: (b, 0, 0)),
            _const2((D, qkv_n)), _const2((1, qkv_n)),
            _const2((hdv, D)), _const2((1, D)),
            _const2((1, D)), _const2((1, D)),
            pl.BlockSpec((1, 1, S), lambda b: (b, 0, 0)),
            pl.BlockSpec((1, S, 1), lambda b: (b, 0, 0)),
        ],
        out_specs=pl.BlockSpec((1, S, D), lambda b: (b, 0, 0)),
        compiler_params=pltpu.CompilerParams(
            dimension_semantics=("parallel",),
            vmem_limit_bytes=VMEM_LIMIT),
    )(x3d, p["w_qkv"], p["b_qkv"], p["wo"], p["bo"], p["ln_g"], p["ln_b"],
      kbias, rowmask)


def pallas_cross_attn_layer(x3d, enc3d, p, kbias, rowmask, h, d_k, d_v, eps=LN_EPS):
    B, S, D = x3d.shape
    S_enc = enc3d.shape[1]
    hdk, hdv = h * d_k, h * d_v
    kernel = functools.partial(_cross_attn_layer_kernel, h=h, d_k=d_k, d_v=d_v,
                               scale=1.0 / float(np.sqrt(d_k)), eps=eps)
    return pl.pallas_call(
        kernel,
        out_shape=jax.ShapeDtypeStruct((B, S, D), jnp.bfloat16),
        grid=(B,),
        in_specs=[
            pl.BlockSpec((1, S, D), lambda b: (b, 0, 0)),
            pl.BlockSpec((1, S_enc, D), lambda b: (b, 0, 0)),
            _const2((D, hdk)), _const2((1, hdk)),
            _const2((D, hdk + hdv)), _const2((1, hdk + hdv)),
            _const2((hdv, D)), _const2((1, D)),
            _const2((1, D)), _const2((1, D)),
            pl.BlockSpec((1, 1, S_enc), lambda b: (b, 0, 0)),
            pl.BlockSpec((1, S, 1), lambda b: (b, 0, 0)),
        ],
        out_specs=pl.BlockSpec((1, S, D), lambda b: (b, 0, 0)),
        compiler_params=pltpu.CompilerParams(
            dimension_semantics=("parallel",),
            vmem_limit_bytes=VMEM_LIMIT),
    )(x3d, enc3d, p["wq"], p["bq"], p["w_kv"], p["b_kv"], p["wo"], p["bo"],
      p["ln_g"], p["ln_b"], kbias, rowmask)


def pallas_pwff_layer(x3d, p, rowmask, eps=LN_EPS):
    B, S, D = x3d.shape
    d_ff = p["w1"].shape[1]
    return pl.pallas_call(
        functools.partial(_pwff_layer_kernel, eps=eps),
        out_shape=jax.ShapeDtypeStruct((B, S, D), jnp.bfloat16),
        grid=(B,),
        in_specs=[
            pl.BlockSpec((1, S, D), lambda b: (b, 0, 0)),
            _const2((D, d_ff)), _const2((1, d_ff)),
            _const2((d_ff, D)), _const2((1, D)),
            _const2((1, D)), _const2((1, D)),
            pl.BlockSpec((1, S, 1), lambda b: (b, 0, 0)),
        ],
        out_specs=pl.BlockSpec((1, S, D), lambda b: (b, 0, 0)),
        compiler_params=pltpu.CompilerParams(
            dimension_semantics=("parallel",),
            vmem_limit_bytes=VMEM_LIMIT),
    )(x3d, p["w1"], p["b1"], p["w2"], p["b2"], p["ln_g"], p["ln_b"], rowmask)


# ----------------------------------------------------------------------------
# Parameter initialization (deterministic, synthetic)
# ----------------------------------------------------------------------------

def _init_linear(key, d_in, d_out, bias=True, scale=0.05):
    kw, kb = jax.random.split(key)
    w = (jax.random.normal(kw, (d_in, d_out), jnp.float32) * scale).astype(jnp.bfloat16)
    b = (jax.random.normal(kb, (1, d_out), jnp.float32) * scale
         if bias else jnp.zeros((1, d_out), jnp.float32))
    return w, b.astype(jnp.float32)


def _init_self_mha(key, d_model, d_k, d_v, h):
    ks = jax.random.split(key, 4)
    wq, bq = _init_linear(ks[0], d_model, h * d_k)
    wk, bk = _init_linear(ks[1], d_model, h * d_k)
    wv, bv = _init_linear(ks[2], d_model, h * d_v)
    wo, bo = _init_linear(ks[3], h * d_v, d_model)
    return dict(w_qkv=jnp.concatenate([wq, wk, wv], axis=1),
                b_qkv=jnp.concatenate([bq, bk, bv], axis=1),
                wo=wo, bo=bo,
                ln_g=jnp.ones((1, d_model), jnp.float32),
                ln_b=jnp.zeros((1, d_model), jnp.float32))


def _init_cross_mha(key, d_model, d_k, d_v, h):
    ks = jax.random.split(key, 4)
    wq, bq = _init_linear(ks[0], d_model, h * d_k)
    wk, bk = _init_linear(ks[1], d_model, h * d_k)
    wv, bv = _init_linear(ks[2], d_model, h * d_v)
    wo, bo = _init_linear(ks[3], h * d_v, d_model)
    return dict(wq=wq, bq=bq,
                w_kv=jnp.concatenate([wk, wv], axis=1),
                b_kv=jnp.concatenate([bk, bv], axis=1),
                wo=wo, bo=bo,
                ln_g=jnp.ones((1, d_model), jnp.float32),
                ln_b=jnp.zeros((1, d_model), jnp.float32))


def _init_pwff(key, d_model, d_ff):
    k1, k2 = jax.random.split(key)
    w1, b1 = _init_linear(k1, d_model, d_ff)
    w2, b2 = _init_linear(k2, d_ff, d_model)
    return dict(w1=w1, b1=b1, w2=w2, b2=b2,
                ln_g=jnp.ones((1, d_model), jnp.float32),
                ln_b=jnp.zeros((1, d_model), jnp.float32))


def sinusoid_encoding_table(n_pos, d_model, padding_idx=None):
    pos = np.arange(n_pos, dtype=np.float32)[:, None]
    i = np.arange(d_model // 2, dtype=np.float32)[None, :]
    angle = pos / np.power(10000.0, 2.0 * i / d_model)
    table = np.zeros((n_pos, d_model), dtype=np.float32)
    table[:, 0::2] = np.sin(angle)
    table[:, 1::2] = np.cos(angle)
    if padding_idx is not None:
        table[padding_idx] = 0.0
    return jnp.asarray(table, dtype=jnp.bfloat16)


def init_params(key, cfg):
    d_model, d_k, d_v, h, d_ff = (cfg["d_model"], cfg["d_k"], cfg["d_v"],
                                  cfg["h"], cfg["d_ff"])
    keys = jax.random.split(key, 2 + 3 * cfg["N_dec"])
    word_emb = (jax.random.normal(keys[0], (cfg["vocab_size"], d_model),
                                  jnp.float32) * 0.05).astype(jnp.bfloat16)
    word_emb = word_emb.at[cfg["padding_idx"]].set(0.0)       # nn.Embedding padding_idx
    pos_emb = sinusoid_encoding_table(cfg["max_len"] + 1, d_model, 0)
    fc_w, _ = _init_linear(keys[1], d_model, cfg["vocab_size"], bias=False)

    layers = []
    for n in range(cfg["N_dec"]):
        layers.append(dict(
            self_att=_init_self_mha(keys[2 + 3 * n + 0], d_model, d_k, d_v, h),
            enc_att=_init_cross_mha(keys[2 + 3 * n + 1], d_model, d_k, d_v, h),
            pwff=_init_pwff(keys[2 + 3 * n + 2], d_model, d_ff),
        ))
    return dict(word_emb=word_emb, pos_emb=pos_emb, fc_w=fc_w, layers=layers)


# ----------------------------------------------------------------------------
# Model forward (embedding gather + masks in plain JAX, everything else Pallas)
# ----------------------------------------------------------------------------

def transformer_decoder_forward(params, input_ids, encoder_output, mask_encoder, cfg):
    padding_idx = cfg["padding_idx"]
    B, S = input_ids.shape
    d_model, h, d_k, d_v = cfg["d_model"], cfg["h"], cfg["d_k"], cfg["d_v"]
    S_enc = encoder_output.shape[1]

    not_pad = input_ids != padding_idx
    # mask_queries (1 where token is not padding), applied in the fused LN epilogues
    rowmask = not_pad.astype(jnp.float32)[:, :, None]                       # (B, S, 1)
    # additive key-padding biases (0 = attend, NEG_INF = masked); the causal part
    # of the self-attention mask is generated in-kernel from iota.
    kbias_self = jnp.where(not_pad, 0.0, NEG_INF).astype(jnp.float32)[:, None, :]
    if mask_encoder is None:
        kbias_enc = jnp.zeros((B, 1, S_enc), jnp.float32)
    else:
        kbias_enc = jnp.where(mask_encoder.reshape(B, 1, S_enc),
                              NEG_INF, 0.0).astype(jnp.float32)

    # positions 1..S, zeroed at padded positions (row 0 of the pos table is zeros)
    seq = jnp.arange(1, S + 1, dtype=jnp.int32)[None, :] * not_pad.astype(jnp.int32)
    # TODO(synk): embedding gather stays in plain JAX (XLA handles it fine).
    out = (jnp.take(params["word_emb"], input_ids, axis=0)
           + jnp.take(params["pos_emb"], seq, axis=0)).astype(jnp.bfloat16)  # (B,S,D)
    enc = encoder_output.astype(jnp.bfloat16)                                # (B,S_enc,D)

    for lp in params["layers"]:
        out = pallas_self_attn_layer(out, lp["self_att"], kbias_self, rowmask,
                                     h, d_k, d_v)
        out = pallas_cross_attn_layer(out, enc, lp["enc_att"], kbias_enc, rowmask,
                                      h, d_k, d_v)
        out = pallas_pwff_layer(out, lp["pwff"], rowmask)

    out_dec = out
    log_probs = pallas_logits_log_softmax(out.reshape(B * S, d_model),
                                          params["fc_w"])
    return log_probs.reshape(B, S, cfg["vocab_size"]), out_dec


# ----------------------------------------------------------------------------
# Main
# ----------------------------------------------------------------------------

if __name__ == "__main__":
    # small but lane-dense config: h*d_k = 128, d_model / d_ff / vocab multiples of 128
    cfg = dict(vocab_size=256, max_len=20, N_dec=2, padding_idx=0,
               d_model=128, d_k=32, d_v=32, h=4, d_ff=256)

    root = jax.random.PRNGKey(0)
    k_params, k_in, k_enc = jax.random.split(root, 3)

    params = init_params(k_params, cfg)

    B, S, S_enc = 2, 16, 16
    input_ids = jax.random.randint(k_in, (B, S), 1, cfg["vocab_size"], dtype=jnp.int32)
    input_ids = input_ids.at[1, 12:].set(cfg["padding_idx"])    # some padding
    encoder_output = jax.random.normal(k_enc, (B, S_enc, cfg["d_model"]), jnp.float32)
    mask_encoder = jnp.zeros((B, 1, 1, S_enc), dtype=bool)      # 1 = disallowed

    fwd = jax.jit(functools.partial(transformer_decoder_forward, cfg=cfg))
    log_probs, out_dec = fwd(params, input_ids, encoder_output, mask_encoder)
    jax.block_until_ready((log_probs, out_dec))

    assert log_probs.shape == (B, S, cfg["vocab_size"])
    assert out_dec.shape == (B, S, cfg["d_model"])
    assert bool(jnp.all(jnp.isfinite(log_probs)))
    assert bool(jnp.all(jnp.isfinite(out_dec.astype(jnp.float32))))
    # log_softmax rows must sum to 1 in prob space
    assert bool(jnp.allclose(jnp.sum(jnp.exp(log_probs), axis=-1), 1.0, atol=1e-3))

    print("KERNEL_OK")
</pallas_src>

<mosaic_0001>
module attributes {stable_mosaic.version = 11 : i64} {
  func.func @_logits_stats_kernel(%arg0: i32, %arg1: i32, %arg2: i32, %arg3: memref<16x128xbf16, #tpu.memory_space<vmem>>, %arg4: memref<128x256xbf16, #tpu.memory_space<vmem>>, %arg5: memref<16x256xf32, #tpu.memory_space<vmem>>, %arg6: memref<16x1xf32, #tpu.memory_space<vmem>>, %arg7: memref<16x1xf32, #tpu.memory_space<vmem>>, %arg8: memref<16x256xf32, #tpu.memory_space<vmem>>) attributes {dimension_semantics = [#tpu.dimension_semantics<parallel>, #tpu.dimension_semantics<arbitrary>, #tpu.dimension_semantics<arbitrary>], iteration_bounds = array<i64: 2, 1, 1>, scalar_prefetch = 0 : i64, scratch_operands = 1 : i64, tpu.core_type = #tpu.core_type<tc>, window_params = [{transform_indices = @transform_0, window_bounds = array<i64: 16, 128>}, {transform_indices = @transform_1, window_bounds = array<i64: 128, 256>}, {transform_indices = @transform_2, window_bounds = array<i64: 16, 256>}, {transform_indices = @transform_3, window_bounds = array<i64: 16, 1>}, {transform_indices = @transform_4, window_bounds = array<i64: 16, 1>}]} {
    %c0_i32 = arith.constant 0 : i32
    %0 = arith.cmpi eq, %arg1, %c0_i32 : i32
    %c0_i32_0 = arith.constant 0 : i32
    %1 = arith.cmpi eq, %arg2, %c0_i32_0 : i32
    %2 = arith.andi %0, %1 : i1
    %3 = arith.extui %2 : i1 to i32
    %c0_i32_1 = arith.constant 0 : i32
    %4 = arith.cmpi ne, %3, %c0_i32_1 : i32
    scf.if %4 {
      %cst_13 = arith.constant -1.000000e+30 : f32
      %17 = vector.broadcast %cst_13 : f32 to vector<16x1xf32>
      %c0_14 = arith.constant 0 : index
      %c0_15 = arith.constant 0 : index
      %18 = vector.load %arg6[%c0_14, %c0_15] : memref<16x1xf32, #tpu.memory_space<vmem>>, vector<16x1xf32>
      tpu.vector_store %arg6[%c0_14, %c0_15], %17 {strides = array<i32>} : memref<16x1xf32, #tpu.memory_space<vmem>>, vector<16x1xf32>,
      %cst_16 = arith.constant 0.000000e+00 : f32
      %19 = vector.broadcast %cst_16 : f32 to vector<16x1xf32>
      %c0_17 = arith.constant 0 : index
      %c0_18 = arith.constant 0 : index
      %20 = vector.load %arg7[%c0_17, %c0_18] : memref<16x1xf32, #tpu.memory_space<vmem>>, vector<16x1xf32>
      tpu.vector_store %arg7[%c0_17, %c0_18], %19 {strides = array<i32>} : memref<16x1xf32, #tpu.memory_space<vmem>>, vector<16x1xf32>,
    } else {
    }
    %c0_i32_2 = arith.constant 0 : i32
    %5 = arith.cmpi eq, %arg2, %c0_i32_2 : i32
    %6 = arith.extui %5 : i1 to i32
    %c0_i32_3 = arith.constant 0 : i32
    %7 = arith.cmpi ne, %6, %c0_i32_3 : i32
    scf.if %7 {
      %cst_13 = arith.constant 0.000000e+00 : f32
      %17 = vector.broadcast %cst_13 : f32 to vector<16x256xf32>
      %c0_14 = arith.constant 0 : index
      %c0_15 = arith.constant 0 : index
      %18 = vector.load %arg8[%c0_14, %c0_15] : memref<16x256xf32, #tpu.memory_space<vmem>>, vector<16x256xf32>
      tpu.vector_store %arg8[%c0_14, %c0_15], %17 {strides = array<i32>} : memref<16x256xf32, #tpu.memory_space<vmem>>, vector<16x256xf32>,
    } else {
    }
    %c0 = arith.constant 0 : index
    %c0_4 = arith.constant 0 : index
    %8 = vector.load %arg8[%c0, %c0_4] : memref<16x256xf32, #tpu.memory_space<vmem>>, vector<16x256xf32>
    %c0_5 = arith.constant 0 : index
    %c0_6 = arith.constant 0 : index
    %9 = vector.load %arg3[%c0_5, %c0_6] : memref<16x128xbf16, #tpu.memory_space<vmem>>, vector<16x128xbf16>
    %c0_7 = arith.constant 0 : index
    %c0_8 = arith.constant 0 : index
    %10 = vector.load %arg4[%c0_7, %c0_8] : memref<128x256xbf16, #tpu.memory_space<vmem>>, vector<128x256xbf16>
    %cst = arith.constant dense<0.000000e+00> : vector<16x256xf32>
    %11 = tpu.matmul %9, %10, %cst {dimension_numbers = #tpu.dot_dimension_numbers<[1], [0], [0], [1], [0, 0, 1, 1], [], []>} : vector<16x128xbf16>, vector<128x256xbf16>, vector<16x256xf32> -> vector<16x256xf32>
    %12 = arith.addf %8, %11 : vector<16x256xf32>
    %c0_9 = arith.constant 0 : index
    %c0_10 = arith.constant 0 : index
    %13 = vector.load %arg8[%c0_9, %c0_10] : memref<16x256xf32, #tpu.memory_space<vmem>>, vector<16x256xf32>
    tpu.vector_store %arg8[%c0_9, %c0_10], %12 {strides = array<i32>} : memref<16x256xf32, #tpu.memory_space<vmem>>, vector<16x256xf32>,
    %c0_i32_11 = arith.constant 0 : i32
    %14 = arith.cmpi eq, %arg2, %c0_i32_11 : i32
    %15 = arith.extui %14 : i1 to i32
    %c0_i32_12 = arith.constant 0 : i32
    %16 = arith.cmpi ne, %15, %c0_i32_12 : i32
    scf.if %16 {
      %c0_13 = arith.constant 0 : index
      %c0_14 = arith.constant 0 : index
      %17 = vector.load %arg8[%c0_13, %c0_14] : memref<16x256xf32, #tpu.memory_space<vmem>>, vector<16x256xf32>
      %c0_15 = arith.constant 0 : index
      %c0_16 = arith.constant 0 : index
      %18 = vector.load %arg5[%c0_15, %c0_16] : memref<16x256xf32, #tpu.memory_space<vmem>>, vector<16x256xf32>
      tpu.vector_store %arg5[%c0_15, %c0_16], %17 {strides = array<i32>} : memref<16x256xf32, #tpu.memory_space<vmem>>, vector<16x256xf32>,
      %cst_17 = arith.constant dense<0xFF800000> : vector<16xf32>
      %19 = vector.multi_reduction <maximumf>, %17, %cst_17 [1] : vector<16x256xf32> to vector<16xf32>
      %20 = vector.shape_cast %19 : vector<16xf32> to vector<16x1xf32>
      %c0_18 = arith.constant 0 : index
      %c0_19 = arith.constant 0 : index
      %21 = vector.load %arg6[%c0_18, %c0_19] : memref<16x1xf32, #tpu.memory_space<vmem>>, vector<16x1xf32>
      %22 = arith.maximumf %21, %20 : vector<16x1xf32>
      %c0_20 = arith.constant 0 : index
      %c0_21 = arith.constant 0 : index
      %23 = vector.load %arg7[%c0_20, %c0_21] : memref<16x1xf32, #tpu.memory_space<vmem>>, vector<16x1xf32>
      %c0_22 = arith.constant 0 : index
      %c0_23 = arith.constant 0 : index
      %24 = vector.load %arg6[%c0_22, %c0_23] : memref<16x1xf32, #tpu.memory_space<vmem>>, vector<16x1xf32>
      %25 = arith.subf %24, %22 : vector<16x1xf32>
      %26 = math.exp %25 : vector<16x1xf32>
      %27 = arith.mulf %23, %26 : vector<16x1xf32>
      %28 = vector.broadcast %22 : vector<16x1xf32> to vector<16x256xf32>
      %29 = arith.subf %17, %28 : vector<16x256xf32>
      %30 = math.exp %29 : vector<16x256xf32>
      %cst_24 = arith.constant dense<0.000000e+00> : vector<16xf32>
      %31 = vector.multi_reduction <add>, %30, %cst_24 [1] : vector<16x256xf32> to vector<16xf32>
      %32 = vector.shape_cast %31 : vector<16xf32> to vector<16x1xf32>
      %33 = arith.addf %27, %32 : vector<16x1xf32>
      %c0_25 = arith.constant 0 : index
      %c0_26 = arith.constant 0 : index
      %34 = vector.load %arg7[%c0_25, %c0_26] : memref<16x1xf32, #tpu.memory_space<vmem>>, vector<16x1xf32>
      tpu.vector_store %arg7[%c0_25, %c0_26], %33 {strides = array<i32>} : memref<16x1xf32, #tpu.memory_space<vmem>>, vector<16x1xf32>,
      %c0_27 = arith.constant 0 : index
      %c0_28 = arith.constant 0 : index
      %35 = vector.load %arg6[%c0_27, %c0_28] : memref<16x1xf32, #tpu.memory_space<vmem>>, vector<16x1xf32>
      tpu.vector_store %arg6[%c0_27, %c0_28], %22 {strides = array<i32>} : memref<16x1xf32, #tpu.memory_space<vmem>>, vector<16x1xf32>,
    } else {
    }
    return
  }
  func.func @transform_0(%arg0: i32, %arg1: i32, %arg2: i32) -> (i32, i32) {
    %c0_i32 = arith.constant 0 : i32
    return %arg0, %arg2 : i32, i32
  }
  func.func @transform_1(%arg0: i32, %arg1: i32, %arg2: i32) -> (i32, i32) {
    %c0_i32 = arith.constant 0 : i32
    return %arg2, %arg1 : i32, i32
  }
  func.func @transform_2(%arg0: i32, %arg1: i32, %arg2: i32) -> (i32, i32) {
    %c0_i32 = arith.constant 0 : i32
    return %arg0, %arg1 : i32, i32
  }
  func.func @transform_3(%arg0: i32, %arg1: i32, %arg2: i32) -> (i32, i32) {
    %c0_i32 = arith.constant 0 : i32
    %c0_i32_0 = arith.constant 0 : i32
    return %arg0, %c0_i32 : i32, i32
  }
  func.func @transform_4(%arg0: i32, %arg1: i32, %arg2: i32) -> (i32, i32) {
    %c0_i32 = arith.constant 0 : i32
    %c0_i32_0 = arith.constant 0 : i32
    return %arg0, %c0_i32 : i32, i32
  }
}

module attributes {stable_mosaic.version = 11 : i64} {
  func.func @_pwff_layer_kernel(%arg0: i32, %arg1: memref<1x16x128xbf16, #tpu.memory_space<vmem>>, %arg2: memref<128x256xbf16, #tpu.memory_space<vmem>>, %arg3: memref<1x256xf32, #tpu.memory_space<vmem>>, %arg4: memref<256x128xbf16, #tpu.memory_space<vmem>>, %arg5: memref<1x128xf32, #tpu.memory_space<vmem>>, %arg6: memref<1x128xf32, #tpu.memory_space<vmem>>, %arg7: memref<1x128xf32, #tpu.memory_space<vmem>>, %arg8: memref<1x16x1xf32, #tpu.memory_space<vmem>>, %arg9: memref<1x16x128xbf16, #tpu.memory_space<vmem>>) attributes {dimension_semantics = [#tpu.dimension_semantics<parallel>], iteration_bounds = array<i64: 2>, scalar_prefetch = 0 : i64, scratch_operands = 0 : i64, tpu.core_type = #tpu.core_type<tc>, window_params = [{transform_indices = @transform_0, window_bounds = array<i64: 1, 16, 128>}, {pipeline_mode = #tpu.pipeline_mode<synchronous>, transform_indices = @transform_1, window_bounds = array<i64: 128, 256>}, {pipeline_mode = #tpu.pipeline_mode<synchronous>, transform_indices = @transform_2, window_bounds = array<i64: 1, 256>}, {pipeline_mode = #tpu.pipeline_mode<synchronous>, transform_indices = @transform_3, window_bounds = array<i64: 256, 128>}, {pipeline_mode = #tpu.pipeline_mode<synchronous>, transform_indices = @transform_4, window_bounds = array<i64: 1, 128>}, {pipeline_mode = #tpu.pipeline_mode<synchronous>, transform_indices = @transform_5, window_bounds = array<i64: 1, 128>}, {pipeline_mode = #tpu.pipeline_mode<synchronous>, transform_indices = @transform_6, window_bounds = array<i64: 1, 128>}, {transform_indices = @transform_7, window_bounds = array<i64: 1, 16, 1>}, {transform_indices = @transform_8, window_bounds = array<i64: 1, 16, 128>}]} {
    %c0 = arith.constant 0 : index
    %c0_0 = arith.constant 0 : index
    %c0_1 = arith.constant 0 : index
    %0 = vector.load %arg1[%c0, %c0_0, %c0_1] : memref<1x16x128xbf16, #tpu.memory_space<vmem>>, vector<1x16x128xbf16>
    %1 = vector.shape_cast %0 : vector<1x16x128xbf16> to vector<16x128xbf16>
    %c0_2 = arith.constant 0 : index
    %c0_3 = arith.constant 0 : index
    %2 = vector.load %arg2[%c0_2, %c0_3] : memref<128x256xbf16, #tpu.memory_space<vmem>>, vector<128x256xbf16>
    %cst = arith.constant dense<0.000000e+00> : vector<16x256xf32>
    %3 = tpu.matmul %1, %2, %cst {dimension_numbers = #tpu.dot_dimension_numbers<[1], [0], [0], [1], [0, 0, 1, 1], [], []>} : vector<16x128xbf16>, vector<128x256xbf16>, vector<16x256xf32> -> vector<16x256xf32>
    %c0_4 = arith.constant 0 : index
    %c0_5 = arith.constant 0 : index
    %4 = vector.load %arg3[%c0_4, %c0_5] : memref<1x256xf32, #tpu.memory_space<vmem>>, vector<1x256xf32>
    %5 = vector.broadcast %4 : vector<1x256xf32> to vector<16x256xf32>
    %6 = arith.addf %3, %5 : vector<16x256xf32>
    %cst_6 = arith.constant 0.000000e+00 : f32
    %7 = vector.broadcast %cst_6 : f32 to vector<16x256xf32>
    %8 = arith.maximumf %6, %7 : vector<16x256xf32>
    %9 = arith.truncf %8 : vector<16x256xf32> to vector<16x256xbf16>
    %c0_7 = arith.constant 0 : index
    %c0_8 = arith.constant 0 : index
    %10 = vector.load %arg4[%c0_7, %c0_8] : memref<256x128xbf16, #tpu.memory_space<vmem>>, vector<256x128xbf16>
    %cst_9 = arith.constant dense<0.000000e+00> : vector<16x128xf32>
    %11 = tpu.matmul %9, %10, %cst_9 {dimension_numbers = #tpu.dot_dimension_numbers<[1], [0], [0], [1], [0, 0, 1, 1], [], []>} : vector<16x256xbf16>, vector<256x128xbf16>, vector<16x128xf32> -> vector<16x128xf32>
    %c0_10 = arith.constant 0 : index
    %c0_11 = arith.constant 0 : index
    %12 = vector.load %arg5[%c0_10, %c0_11] : memref<1x128xf32, #tpu.memory_space<vmem>>, vector<1x128xf32>
    %13 = vector.broadcast %12 : vector<1x128xf32> to vector<16x128xf32>
    %14 = arith.addf %11, %13 : vector<16x128xf32>
    %15 = arith.extf %1 : vector<16x128xbf16> to vector<16x128xf32>
    %c0_12 = arith.constant 0 : index
    %c0_13 = arith.constant 0 : index
    %16 = vector.load %arg6[%c0_12, %c0_13] : memref<1x128xf32, #tpu.memory_space<vmem>>, vector<1x128xf32>
    %c0_14 = arith.constant 0 : index
    %c0_15 = arith.constant 0 : index
    %17 = vector.load %arg7[%c0_14, %c0_15] : memref<1x128xf32, #tpu.memory_space<vmem>>, vector<1x128xf32>
    %c0_16 = arith.constant 0 : index
    %c0_17 = arith.constant 0 : index
    %c0_18 = arith.constant 0 : index
    %18 = vector.load %arg8[%c0_16, %c0_17, %c0_18] : memref<1x16x1xf32, #tpu.memory_space<vmem>>, vector<1x16x1xf32>
    %19 = vector.shape_cast %18 : vector<1x16x1xf32> to vector<16x1xf32>
    %20 = arith.addf %14, %15 : vector<16x128xf32>
    %cst_19 = arith.constant dense<0.000000e+00> : vector<16xf32>
    %21 = vector.multi_reduction <add>, %20, %cst_19 [1] : vector<16x128xf32> to vector<16xf32>
    %22 = vector.shape_cast %21 : vector<16xf32> to vector<16x1xf32>
    %cst_20 = arith.constant 1.280000e+02 : f32
    %23 = vector.broadcast %cst_20 : f32 to vector<16x1xf32>
    %24 = arith.divf %22, %23 : vector<16x1xf32>
    %25 = vector.broadcast %24 : vector<16x1xf32> to vector<16x128xf32>
    %26 = arith.subf %20, %25 : vector<16x128xf32>
    %27 = vector.broadcast %24 : vector<16x1xf32> to vector<16x128xf32>
    %28 = arith.subf %20, %27 : vector<16x128xf32>
    %29 = arith.mulf %26, %28 : vector<16x128xf32>
    %cst_21 = arith.constant dense<0.000000e+00> : vector<16xf32>
    %30 = vector.multi_reduction <add>, %29, %cst_21 [1] : vector<16x128xf32> to vector<16xf32>
    %31 = vector.shape_cast %30 : vector<16xf32> to vector<16x1xf32>
    %cst_22 = arith.constant 1.280000e+02 : f32
    %32 = vector.broadcast %cst_22 : f32 to vector<16x1xf32>
    %33 = arith.divf %31, %32 : vector<16x1xf32>
    %34 = vector.broadcast %24 : vector<16x1xf32> to vector<16x128xf32>
    %35 = arith.subf %20, %34 : vector<16x128xf32>
    %cst_23 = arith.constant 9.99999974E-6 : f32
    %36 = vector.broadcast %cst_23 : f32 to vector<16x1xf32>
    %37 = arith.addf %33, %36 : vector<16x1xf32>
    %38 = math.rsqrt %37 : vector<16x1xf32>
    %39 = vector.broadcast %38 : vector<16x1xf32> to vector<16x128xf32>
    %40 = arith.mulf %35, %39 : vector<16x128xf32>
    %41 = vector.broadcast %16 : vector<1x128xf32> to vector<16x128xf32>
    %42 = arith.mulf %40, %41 : vector<16x128xf32>
    %43 = vector.broadcast %17 : vector<1x128xf32> to vector<16x128xf32>
    %44 = arith.addf %42, %43 : vector<16x128xf32>
    %45 = vector.broadcast %19 : vector<16x1xf32> to vector<16x128xf32>
    %46 = arith.mulf %44, %45 : vector<16x128xf32>
    %47 = arith.truncf %46 : vector<16x128xf32> to vector<16x128xbf16>
    %c0_24 = arith.constant 0 : index
    %c0_25 = arith.constant 0 : index
    %c0_26 = arith.constant 0 : index
    %48 = vector.load %arg9[%c0_24, %c0_25, %c0_26] : memref<1x16x128xbf16, #tpu.memory_space<vmem>>, vector<1x16x128xbf16>
    %49 = vector.shape_cast %48 : vector<1x16x128xbf16> to vector<16x128xbf16>
    %50 = vector.shape_cast %47 : vector<16x128xbf16> to vector<1x16x128xbf16>
    tpu.vector_store %arg9[%c0_24, %c0_25, %c0_26], %50 {strides = array<i32>} : memref<1x16x128xbf16, #tpu.memory_space<vmem>>, vector<1x16x128xbf16>,
    return
  }
  func.func @transform_0(%arg0: i32) -> (i32, i32, i32) {
    %c0_i32 = arith.constant 0 : i32
    %c0_i32_0 = arith.constant 0 : i32
    %c0_i32_1 = arith.constant 0 : i32
    return %arg0, %c0_i32, %c0_i32_0 : i32, i32, i32
  }
  func.func @transform_1(%arg0: i32) -> (i32, i32) {
    %c0_i32 = arith.constant 0 : i32
    %c0_i32_0 = arith.constant 0 : i32
    %c0_i32_1 = arith.constant 0 : i32
    return %c0_i32, %c0_i32_0 : i32, i32
  }
  func.func @transform_2(%arg0: i32) -> (i32, i32) {
    %c0_i32 = arith.constant 0 : i32
    %c0_i32_0 = arith.constant 0 : i32
    %c0_i32_1 = arith.constant 0 : i32
    return %c0_i32, %c0_i32_0 : i32, i32
  }
  func.func @transform_3(%arg0: i32) -> (i32, i32) {
    %c0_i32 = arith.constant 0 : i32
    %c0_i32_0 = arith.constant 0 : i32
    %c0_i32_1 = arith.constant 0 : i32
    return %c0_i32, %c0_i32_0 : i32, i32
  }
  func.func @transform_4(%arg0: i32) -> (i32, i32) {
    %c0_i32 = arith.constant 0 : i32
    %c0_i32_0 = arith.constant 0 : i32
    %c0_i32_1 = arith.constant 0 : i32
    return %c0_i32, %c0_i32_0 : i32, i32
  }
  func.func @transform_5(%arg0: i32) -> (i32, i32) {
    %c0_i32 = arith.constant 0 : i32
    %c0_i32_0 = arith.constant 0 : i32
    %c0_i32_1 = arith.constant 0 : i32
    return %c0_i32, %c0_i32_0 : i32, i32
  }
  func.func @transform_6(%arg0: i32) -> (i32, i32) {
    %c0_i32 = arith.constant 0 : i32
    %c0_i32_0 = arith.constant 0 : i32
    %c0_i32_1 = arith.constant 0 : i32
    return %c0_i32, %c0_i32_0 : i32, i32
  }
  func.func @transform_7(%arg0: i32) -> (i32, i32, i32) {
    %c0_i32 = arith.constant 0 : i32
    %c0_i32_0 = arith.constant 0 : i32
    %c0_i32_1 = arith.constant 0 : i32
    return %arg0, %c0_i32, %c0_i32_0 : i32, i32, i32
  }
  func.func @transform_8(%arg0: i32) -> (i32, i32, i32) {
    %c0_i32 = arith.constant 0 : i32
    %c0_i32_0 = arith.constant 0 : i32
    %c0_i32_1 = arith.constant 0 : i32
    return %arg0, %c0_i32, %c0_i32_0 : i32, i32, i32
  }
}

module attributes {stable_mosaic.version = 11 : i64} {
  func.func @_self_attn_layer_kernel(%arg0: i32, %arg1: memref<1x16x128xbf16, #tpu.memory_space<vmem>>, %arg2: memref<128x384xbf16, #tpu.memory_space<vmem>>, %arg3: memref<1x384xf32, #tpu.memory_space<vmem>>, %arg4: memref<128x128xbf16, #tpu.memory_space<vmem>>, %arg5: memref<1x128xf32, #tpu.memory_space<vmem>>, %arg6: memref<1x128xf32, #tpu.memory_space<vmem>>, %arg7: memref<1x128xf32, #tpu.memory_space<vmem>>, %arg8: memref<1x1x16xf32, #tpu.memory_space<vmem>>, %arg9: memref<1x16x1xf32, #tpu.memory_space<vmem>>, %arg10: memref<1x16x128xbf16, #tpu.memory_space<vmem>>) attributes {dimension_semantics = [#tpu.dimension_semantics<parallel>], iteration_bounds = array<i64: 2>, scalar_prefetch = 0 : i64, scratch_operands = 0 : i64, tpu.core_type = #tpu.core_type<tc>, window_params = [{transform_indices = @transform_0, window_bounds = array<i64: 1, 16, 128>}, {pipeline_mode = #tpu.pipeline_mode<synchronous>, transform_indices = @transform_1, window_bounds = array<i64: 128, 384>}, {pipeline_mode = #tpu.pipeline_mode<synchronous>, transform_indices = @transform_2, window_bounds = array<i64: 1, 384>}, {pipeline_mode = #tpu.pipeline_mode<synchronous>, transform_indices = @transform_3, window_bounds = array<i64: 128, 128>}, {pipeline_mode = #tpu.pipeline_mode<synchronous>, transform_indices = @transform_4, window_bounds = array<i64: 1, 128>}, {pipeline_mode = #tpu.pipeline_mode<synchronous>, transform_indices = @transform_5, window_bounds = array<i64: 1, 128>}, {pipeline_mode = #tpu.pipeline_mode<synchronous>, transform_indices = @transform_6, window_bounds = array<i64: 1, 128>}, {transform_indices = @transform_7, window_bounds = array<i64: 1, 1, 16>}, {transform_indices = @transform_8, window_bounds = array<i64: 1, 16, 1>}, {transform_indices = @transform_9, window_bounds = array<i64: 1, 16, 128>}]} {
    %c0 = arith.constant 0 : index
    %c0_0 = arith.constant 0 : index
    %c0_1 = arith.constant 0 : index
    %0 = vector.load %arg1[%c0, %c0_0, %c0_1] : memref<1x16x128xbf16, #tpu.memory_space<vmem>>, vector<1x16x128xbf16>
    %1 = vector.shape_cast %0 : vector<1x16x128xbf16> to vector<16x128xbf16>
    %c0_2 = arith.constant 0 : index
    %c0_3 = arith.constant 0 : index
    %2 = vector.load %arg2[%c0_2, %c0_3] : memref<128x384xbf16, #tpu.memory_space<vmem>>, vector<128x384xbf16>
    %cst = arith.constant dense<0.000000e+00> : vector<16x384xf32>
    %3 = tpu.matmul %1, %2, %cst {dimension_numbers = #tpu.dot_dimension_numbers<[1], [0], [0], [1], [0, 0, 1, 1], [], []>} : vector<16x128xbf16>, vector<128x384xbf16>, vector<16x384xf32> -> vector<16x384xf32>
    %c0_4 = arith.constant 0 : index
    %c0_5 = arith.constant 0 : index
    %4 = vector.load %arg3[%c0_4, %c0_5] : memref<1x384xf32, #tpu.memory_space<vmem>>, vector<1x384xf32>
    %5 = vector.broadcast %4 : vector<1x384xf32> to vector<16x384xf32>
    %6 = arith.addf %3, %5 : vector<16x384xf32>
    %7 = vector.extract_strided_slice %6 {offsets = [0, 0], sizes = [16, 128], strides = [1, 1]} : vector<16x384xf32> to vector<16x128xf32>
    %8 = vector.extract_strided_slice %7 {offsets = [0, 0], sizes = [16, 32], strides = [1, 1]} : vector<16x128xf32> to vector<16x32xf32>
    %9 = vector.extract_strided_slice %7 {offsets = [0, 32], sizes = [16, 32], strides = [1, 1]} : vector<16x128xf32> to vector<16x32xf32>
    %10 = vector.extract_strided_slice %7 {offsets = [0, 64], sizes = [16, 32], strides = [1, 1]} : vector<16x128xf32> to vector<16x32xf32>
    %11 = vector.extract_strided_slice %7 {offsets = [0, 96], sizes = [16, 32], strides = [1, 1]} : vector<16x128xf32> to vector<16x32xf32>
    %12 = vector.shape_cast %8 : vector<16x32xf32> to vector<1x16x32xf32>
    %13 = vector.shape_cast %9 : vector<16x32xf32> to vector<1x16x32xf32>
    %14 = vector.shape_cast %10 : vector<16x32xf32> to vector<1x16x32xf32>
    %15 = vector.shape_cast %11 : vector<16x32xf32> to vector<1x16x32xf32>
    %16 = tpu.concatenate %12, %13, %14, %15 in 0 : vector<1x16x32xf32>, vector<1x16x32xf32>, vector<1x16x32xf32>, vector<1x16x32xf32> -> vector<4x16x32xf32>
    %17 = arith.truncf %16 : vector<4x16x32xf32> to vector<4x16x32xbf16>
    %18 = vector.extract_strided_slice %6 {offsets = [0, 128], sizes = [16, 128], strides = [1, 1]} : vector<16x384xf32> to vector<16x128xf32>
    %19 = vector.extract_strided_slice %18 {offsets = [0, 0], sizes = [16, 32], strides = [1, 1]} : vector<16x128xf32> to vector<16x32xf32>
    %20 = tpu.transpose %19, [1, 0] : vector<16x32xf32> -> vector<32x16xf32>
    %21 = vector.extract_strided_slice %18 {offsets = [0, 32], sizes = [16, 32], strides = [1, 1]} : vector<16x128xf32> to vector<16x32xf32>
    %22 = tpu.transpose %21, [1, 0] : vector<16x32xf32> -> vector<32x16xf32>
    %23 = vector.extract_strided_slice %18 {offsets = [0, 64], sizes = [16, 32], strides = [1, 1]} : vector<16x128xf32> to vector<16x32xf32>
    %24 = tpu.transpose %23, [1, 0] : vector<16x32xf32> -> vector<32x16xf32>
    %25 = vector.extract_strided_slice %18 {offsets = [0, 96], sizes = [16, 32], strides = [1, 1]} : vector<16x128xf32> to vector<16x32xf32>
    %26 = tpu.transpose %25, [1, 0] : vector<16x32xf32> -> vector<32x16xf32>
    %27 = vector.shape_cast %20 : vector<32x16xf32> to vector<1x32x16xf32>
    %28 = vector.shape_cast %22 : vector<32x16xf32> to vector<1x32x16xf32>
    %29 = vector.shape_cast %24 : vector<32x16xf32> to vector<1x32x16xf32>
    %30 = vector.shape_cast %26 : vector<32x16xf32> to vector<1x32x16xf32>
    %31 = tpu.concatenate %27, %28, %29, %30 in 0 : vector<1x32x16xf32>, vector<1x32x16xf32>, vector<1x32x16xf32>, vector<1x32x16xf32> -> vector<4x32x16xf32>
    %32 = arith.truncf %31 : vector<4x32x16xf32> to vector<4x32x16xbf16>
    %33 = vector.extract_strided_slice %6 {offsets = [0, 256], sizes = [16, 128], strides = [1, 1]} : vector<16x384xf32> to vector<16x128xf32>
    %34 = vector.extract_strided_slice %33 {offsets = [0, 0], sizes = [16, 32], strides = [1, 1]} : vector<16x128xf32> to vector<16x32xf32>
    %35 = vector.extract_strided_slice %33 {offsets = [0, 32], sizes = [16, 32], strides = [1, 1]} : vector<16x128xf32> to vector<16x32xf32>
    %36 = vector.extract_strided_slice %33 {offsets = [0, 64], sizes = [16, 32], strides = [1, 1]} : vector<16x128xf32> to vector<16x32xf32>
    %37 = vector.extract_strided_slice %33 {offsets = [0, 96], sizes = [16, 32], strides = [1, 1]} : vector<16x128xf32> to vector<16x32xf32>
    %38 = vector.shape_cast %34 : vector<16x32xf32> to vector<1x16x32xf32>
    %39 = vector.shape_cast %35 : vector<16x32xf32> to vector<1x16x32xf32>
    %40 = vector.shape_cast %36 : vector<16x32xf32> to vector<1x16x32xf32>
    %41 = vector.shape_cast %37 : vector<16x32xf32> to vector<1x16x32xf32>
    %42 = tpu.concatenate %38, %39, %40, %41 in 0 : vector<1x16x32xf32>, vector<1x16x32xf32>, vector<1x16x32xf32>, vector<1x16x32xf32> -> vector<4x16x32xf32>
    %43 = arith.truncf %42 : vector<4x16x32xf32> to vector<4x16x32xbf16>
    %c0_6 = arith.constant 0 : index
    %c0_7 = arith.constant 0 : index
    %c0_8 = arith.constant 0 : index
    %44 = vector.load %arg8[%c0_6, %c0_7, %c0_8] : memref<1x1x16xf32, #tpu.memory_space<vmem>>, vector<1x1x16xf32>
    "tpu.trace_start"() <{level = 10 : i32, message = "hqd,hdk->hqk"}> : () -> ()
    %cst_9 = arith.constant dense<0.000000e+00> : vector<4x16x16xf32>
    %45 = tpu.matmul %17, %32, %cst_9 {dimension_numbers = #tpu.dot_dimension_numbers<[2], [1], [1], [2], [0, 0, 0, 1, 1, 2], [0], [0]>} : vector<4x16x32xbf16>, vector<4x32x16xbf16>, vector<4x16x16xf32> -> vector<4x16x16xf32>
    "tpu.trace_stop"() : () -> ()
    %cst_10 = arith.constant 0.176776692 : f32
    %46 = vector.broadcast %cst_10 : f32 to vector<4x16x16xf32>
    %47 = arith.mulf %45, %46 : vector<4x16x16xf32>
    %48 = vector.broadcast %44 : vector<1x1x16xf32> to vector<4x16x16xf32>
    %49 = arith.addf %47, %48 : vector<4x16x16xf32>
    %50 = tpu.iota {dimensions = array<i32: 0>} : vector<16x16xi32>
    %51 = tpu.iota {dimensions = array<i32: 1>} : vector<16x16xi32>
    %52 = arith.cmpi sgt, %51, %50 : vector<16x16xi32>
    %53 = vector.shape_cast %52 : vector<16x16xi1> to vector<1x16x16xi1>
    %cst_11 = arith.constant -1.000000e+30 : f32
    %54 = vector.shape_cast %53 : vector<1x16x16xi1> to vector<1x16x16xi1>
    %55 = vector.broadcast %54 : vector<1x16x16xi1> to vector<4x16x16xi1>
    %56 = vector.broadcast %cst_11 : f32 to vector<4x16x16xf32>
    %57 = arith.select %55, %56, %49 : vector<4x16x16xi1>, vector<4x16x16xf32>
    %cst_12 = arith.constant dense<0xFF800000> : vector<4x16xf32>
    %58 = vector.multi_reduction <maximumf>, %57, %cst_12 [2] : vector<4x16x16xf32> to vector<4x16xf32>
    %59 = vector.shape_cast %58 : vector<4x16xf32> to vector<4x16x1xf32>
    %60 = vector.broadcast %59 : vector<4x16x1xf32> to vector<4x16x16xf32>
    %61 = arith.subf %57, %60 : vector<4x16x16xf32>
    %62 = math.exp %61 : vector<4x16x16xf32>
    %cst_13 = arith.constant dense<0.000000e+00> : vector<4x16xf32>
    %63 = vector.multi_reduction <add>, %62, %cst_13 [2] : vector<4x16x16xf32> to vector<4x16xf32>
    %64 = vector.shape_cast %63 : vector<4x16xf32> to vector<4x16x1xf32>
    %65 = tpu.reciprocal %64 {approx = true} : vector<4x16x1xf32> -> vector<4x16x1xf32>
    %66 = vector.broadcast %65 : vector<4x16x1xf32> to vector<4x16x16xf32>
    %67 = arith.mulf %62, %66 : vector<4x16x16xf32>
    %68 = arith.truncf %67 : vector<4x16x16xf32> to vector<4x16x16xbf16>
    "tpu.trace_start"() <{level = 10 : i32, message = "hqk,hkd->hqd"}> : () -> ()
    %cst_14 = arith.constant dense<0.000000e+00> : vector<4x16x32xf32>
    %69 = tpu.matmul %68, %43, %cst_14 {dimension_numbers = #tpu.dot_dimension_numbers<[2], [1], [1], [2], [0, 0, 0, 1, 1, 2], [0], [0]>} : vector<4x16x16xbf16>, vector<4x16x32xbf16>, vector<4x16x32xf32> -> vector<4x16x32xf32>
    "tpu.trace_stop"() : () -> ()
    %70 = vector.extract_strided_slice %69 {offsets = [0, 0, 0], sizes = [1, 16, 32], strides = [1, 1, 1]} : vector<4x16x32xf32> to vector<1x16x32xf32>
    %71 = vector.shape_cast %70 : vector<1x16x32xf32> to vector<16x32xf32>
    %72 = vector.extract_strided_slice %69 {offsets = [1, 0, 0], sizes = [1, 16, 32], strides = [1, 1, 1]} : vector<4x16x32xf32> to vector<1x16x32xf32>
    %73 = vector.shape_cast %72 : vector<1x16x32xf32> to vector<16x32xf32>
    %74 = vector.extract_strided_slice %69 {offsets = [2, 0, 0], sizes = [1, 16, 32], strides = [1, 1, 1]} : vector<4x16x32xf32> to vector<1x16x32xf32>
    %75 = vector.shape_cast %74 : vector<1x16x32xf32> to vector<16x32xf32>
    %76 = vector.extract_strided_slice %69 {offsets = [3, 0, 0], sizes = [1, 16, 32], strides = [1, 1, 1]} : vector<4x16x32xf32> to vector<1x16x32xf32>
    %77 = vector.shape_cast %76 : vector<1x16x32xf32> to vector<16x32xf32>
    %78 = tpu.concatenate %71, %73, %75, %77 in 1 : vector<16x32xf32>, vector<16x32xf32>, vector<16x32xf32>, vector<16x32xf32> -> vector<16x128xf32>
    %79 = arith.truncf %78 : vector<16x128xf32> to vector<16x128xbf16>
    %c0_15 = arith.constant 0 : index
    %c0_16 = arith.constant 0 : index
    %80 = vector.load %arg4[%c0_15, %c0_16] : memref<128x128xbf16, #tpu.memory_space<vmem>>, vector<128x128xbf16>
    %cst_17 = arith.constant dense<0.000000e+00> : vector<16x128xf32>
    %81 = tpu.matmul %79, %80, %cst_17 {dimension_numbers = #tpu.dot_dimension_numbers<[1], [0], [0], [1], [0, 0, 1, 1], [], []>} : vector<16x128xbf16>, vector<128x128xbf16>, vector<16x128xf32> -> vector<16x128xf32>
    %c0_18 = arith.constant 0 : index
    %c0_19 = arith.constant 0 : index
    %82 = vector.load %arg5[%c0_18, %c0_19] : memref<1x128xf32, #tpu.memory_space<vmem>>, vector<1x128xf32>
    %83 = vector.broadcast %82 : vector<1x128xf32> to vector<16x128xf32>
    %84 = arith.addf %81, %83 : vector<16x128xf32>
    %85 = arith.extf %1 : vector<16x128xbf16> to vector<16x128xf32>
    %c0_20 = arith.constant 0 : index
    %c0_21 = arith.constant 0 : index
    %86 = vector.load %arg6[%c0_20, %c0_21] : memref<1x128xf32, #tpu.memory_space<vmem>>, vector<1x128xf32>
    %c0_22 = arith.constant 0 : index
    %c0_23 = arith.constant 0 : index
    %87 = vector.load %arg7[%c0_22, %c0_23] : memref<1x128xf32, #tpu.memory_space<vmem>>, vector<1x128xf32>
    %c0_24 = arith.constant 0 : index
    %c0_25 = arith.constant 0 : index
    %c0_26 = arith.constant 0 : index
    %88 = vector.load %arg9[%c0_24, %c0_25, %c0_26] : memref<1x16x1xf32, #tpu.memory_space<vmem>>, vector<1x16x1xf32>
    %89 = vector.shape_cast %88 : vector<1x16x1xf32> to vector<16x1xf32>
    %90 = arith.addf %84, %85 : vector<16x128xf32>
    %cst_27 = arith.constant dense<0.000000e+00> : vector<16xf32>
    %91 = vector.multi_reduction <add>, %90, %cst_27 [1] : vector<16x128xf32> to vector<16xf32>
    %92 = vector.shape_cast %91 : vector<16xf32> to vector<16x1xf32>
    %cst_28 = arith.constant 1.280000e+02 : f32
    %93 = vector.broadcast %cst_28 : f32 to vector<16x1xf32>
    %94 = arith.divf %92, %93 : vector<16x1xf32>
    %95 = vector.broadcast %94 : vector<16x1xf32> to vector<16x128xf32>
    %96 = arith.subf %90, %95 : vector<16x128xf32>
    %97 = vector.broadcast %94 : vector<16x1xf32> to vector<16x128xf32>
    %98 = arith.subf %90, %97 : vector<16x128xf32>
    %99 = arith.mulf %96, %98 : vector<16x128xf32>
    %cst_29 = arith.constant dense<0.000000e+00> : vector<16xf32>
    %100 = vector.multi_reduction <add>, %99, %cst_29 [1] : vector<16x128xf32> to vector<16xf32>
    %101 = vector.shape_cast %100 : vector<16xf32> to vector<16x1xf32>
    %cst_30 = arith.constant 1.280000e+02 : f32
    %102 = vector.broadcast %cst_30 : f32 to vector<16x1xf32>
    %103 = arith.divf %101, %102 : vector<16x1xf32>
    %104 = vector.broadcast %94 : vector<16x1xf32> to vector<16x128xf32>
    %105 = arith.subf %90, %104 : vector<16x128xf32>
    %cst_31 = arith.constant 9.99999974E-6 : f32
    %106 = vector.broadcast %cst_31 : f32 to vector<16x1xf32>
    %107 = arith.addf %103, %106 : vector<16x1xf32>
    %108 = math.rsqrt %107 : vector<16x1xf32>
    %109 = vector.broadcast %108 : vector<16x1xf32> to vector<16x128xf32>
    %110 = arith.mulf %105, %109 : vector<16x128xf32>
    %111 = vector.broadcast %86 : vector<1x128xf32> to vector<16x128xf32>
    %112 = arith.mulf %110, %111 : vector<16x128xf32>
    %113 = vector.broadcast %87 : vector<1x128xf32> to vector<16x128xf32>
    %114 = arith.addf %112, %113 : vector<16x128xf32>
    %115 = vector.broadcast %89 : vector<16x1xf32> to vector<16x128xf32>
    %116 = arith.mulf %114, %115 : vector<16x128xf32>
    %117 = arith.truncf %116 : vector<16x128xf32> to vector<16x128xbf16>
    %c0_32 = arith.constant 0 : index
    %c0_33 = arith.constant 0 : index
    %c0_34 = arith.constant 0 : index
    %118 = vector.load %arg10[%c0_32, %c0_33, %c0_34] : memref<1x16x128xbf16, #tpu.memory_space<vmem>>, vector<1x16x128xbf16>
    %119 = vector.shape_cast %118 : vector<1x16x128xbf16> to vector<16x128xbf16>
    %120 = vector.shape_cast %117 : vector<16x128xbf16> to vector<1x16x128xbf16>
    tpu.vector_store %arg10[%c0_32, %c0_33, %c0_34], %120 {strides = array<i32>} : memref<1x16x128xbf16, #tpu.memory_space<vmem>>, vector<1x16x128xbf16>,
    return
  }
  func.func @transform_0(%arg0: i32) -> (i32, i32, i32) {
    %c0_i32 = arith.constant 0 : i32
    %c0_i32_0 = arith.constant 0 : i32
    %c0_i32_1 = arith.constant 0 : i32
    return %arg0, %c0_i32, %c0_i32_0 : i32, i32, i32
  }
  func.func @transform_1(%arg0: i32) -> (i32, i32) {
    %c0_i32 = arith.constant 0 : i32
    %c0_i32_0 = arith.constant 0 : i32
    %c0_i32_1 = arith.constant 0 : i32
    return %c0_i32, %c0_i32_0 : i32, i32
  }
  func.func @transform_2(%arg0: i32) -> (i32, i32) {
    %c0_i32 = arith.constant 0 : i32
    %c0_i32_0 = arith.constant 0 : i32
    %c0_i32_1 = arith.constant 0 : i32
    return %c0_i32, %c0_i32_0 : i32, i32
  }
  func.func @transform_3(%arg0: i32) -> (i32, i32) {
    %c0_i32 = arith.constant 0 : i32
    %c0_i32_0 = arith.constant 0 : i32
    %c0_i32_1 = arith.constant 0 : i32
    return %c0_i32, %c0_i32_0 : i32, i32
  }
  func.func @transform_4(%arg0: i32) -> (i32, i32) {
    %c0_i32 = arith.constant 0 : i32
    %c0_i32_0 = arith.constant 0 : i32
    %c0_i32_1 = arith.constant 0 : i32
    return %c0_i32, %c0_i32_0 : i32, i32
  }
  func.func @transform_5(%arg0: i32) -> (i32, i32) {
    %c0_i32 = arith.constant 0 : i32
    %c0_i32_0 = arith.constant 0 : i32
    %c0_i32_1 = arith.constant 0 : i32
    return %c0_i32, %c0_i32_0 : i32, i32
  }
  func.func @transform_6(%arg0: i32) -> (i32, i32) {
    %c0_i32 = arith.constant 0 : i32
    %c0_i32_0 = arith.constant 0 : i32
    %c0_i32_1 = arith.constant 0 : i32
    return %c0_i32, %c0_i32_0 : i32, i32
  }
  func.func @transform_7(%arg0: i32) -> (i32, i32, i32) {
    %c0_i32 = arith.constant 0 : i32
    %c0_i32_0 = arith.constant 0 : i32
    %c0_i32_1 = arith.constant 0 : i32
    return %arg0, %c0_i32, %c0_i32_0 : i32, i32, i32
  }
  func.func @transform_8(%arg0: i32) -> (i32, i32, i32) {
    %c0_i32 = arith.constant 0 : i32
    %c0_i32_0 = arith.constant 0 : i32
    %c0_i32_1 = arith.constant 0 : i32
    return %arg0, %c0_i32, %c0_i32_0 : i32, i32, i32
  }
  func.func @transform_9(%arg0: i32) -> (i32, i32, i32) {
    %c0_i32 = arith.constant 0 : i32
    %c0_i32_0 = arith.constant 0 : i32
    %c0_i32_1 = arith.constant 0 : i32
    return %arg0, %c0_i32, %c0_i32_0 : i32, i32, i32
  }
}

module attributes {stable_mosaic.version = 11 : i64} {
  func.func @_cross_attn_layer_kernel(%arg0: i32, %arg1: memref<1x16x128xbf16, #tpu.memory_space<vmem>>, %arg2: memref<1x16x128xbf16, #tpu.memory_space<vmem>>, %arg3: memref<128x128xbf16, #tpu.memory_space<vmem>>, %arg4: memref<1x128xf32, #tpu.memory_space<vmem>>, %arg5: memref<128x256xbf16, #tpu.memory_space<vmem>>, %arg6: memref<1x256xf32, #tpu.memory_space<vmem>>, %arg7: memref<128x128xbf16, #tpu.memory_space<vmem>>, %arg8: memref<1x128xf32, #tpu.memory_space<vmem>>, %arg9: memref<1x128xf32, #tpu.memory_space<vmem>>, %arg10: memref<1x128xf32, #tpu.memory_space<vmem>>, %arg11: memref<1x1x16xf32, #tpu.memory_space<vmem>>, %arg12: memref<1x16x1xf32, #tpu.memory_space<vmem>>, %arg13: memref<1x16x128xbf16, #tpu.memory_space<vmem>>) attributes {dimension_semantics = [#tpu.dimension_semantics<parallel>], iteration_bounds = array<i64: 2>, scalar_prefetch = 0 : i64, scratch_operands = 0 : i64, tpu.core_type = #tpu.core_type<tc>, window_params = [{transform_indices = @transform_0, window_bounds = array<i64: 1, 16, 128>}, {transform_indices = @transform_1, window_bounds = array<i64: 1, 16, 128>}, {pipeline_mode = #tpu.pipeline_mode<synchronous>, transform_indices = @transform_2, window_bounds = array<i64: 128, 128>}, {pipeline_mode = #tpu.pipeline_mode<synchronous>, transform_indices = @transform_3, window_bounds = array<i64: 1, 128>}, {pipeline_mode = #tpu.pipeline_mode<synchronous>, transform_indices = @transform_4, window_bounds = array<i64: 128, 256>}, {pipeline_mode = #tpu.pipeline_mode<synchronous>, transform_indices = @transform_5, window_bounds = array<i64: 1, 256>}, {pipeline_mode = #tpu.pipeline_mode<synchronous>, transform_indices = @transform_6, window_bounds = array<i64: 128, 128>}, {pipeline_mode = #tpu.pipeline_mode<synchronous>, transform_indices = @transform_7, window_bounds = array<i64: 1, 128>}, {pipeline_mode = #tpu.pipeline_mode<synchronous>, transform_indices = @transform_8, window_bounds = array<i64: 1, 128>}, {pipeline_mode = #tpu.pipeline_mode<synchronous>, transform_indices = @transform_9, window_bounds = array<i64: 1, 128>}, {transform_indices = @transform_10, window_bounds = array<i64: 1, 1, 16>}, {transform_indices = @transform_11, window_bounds = array<i64: 1, 16, 1>}, {transform_indices = @transform_12, window_bounds = array<i64: 1, 16, 128>}]} {
    %c0 = arith.constant 0 : index
    %c0_0 = arith.constant 0 : index
    %c0_1 = arith.constant 0 : index
    %0 = vector.load %arg1[%c0, %c0_0, %c0_1] : memref<1x16x128xbf16, #tpu.memory_space<vmem>>, vector<1x16x128xbf16>
    %1 = vector.shape_cast %0 : vector<1x16x128xbf16> to vector<16x128xbf16>
    %c0_2 = arith.constant 0 : index
    %c0_3 = arith.constant 0 : index
    %c0_4 = arith.constant 0 : index
    %2 = vector.load %arg2[%c0_2, %c0_3, %c0_4] : memref<1x16x128xbf16, #tpu.memory_space<vmem>>, vector<1x16x128xbf16>
    %3 = vector.shape_cast %2 : vector<1x16x128xbf16> to vector<16x128xbf16>
    %c0_5 = arith.constant 0 : index
    %c0_6 = arith.constant 0 : index
    %4 = vector.load %arg3[%c0_5, %c0_6] : memref<128x128xbf16, #tpu.memory_space<vmem>>, vector<128x128xbf16>
    %cst = arith.constant dense<0.000000e+00> : vector<16x128xf32>
    %5 = tpu.matmul %1, %4, %cst {dimension_numbers = #tpu.dot_dimension_numbers<[1], [0], [0], [1], [0, 0, 1, 1], [], []>} : vector<16x128xbf16>, vector<128x128xbf16>, vector<16x128xf32> -> vector<16x128xf32>
    %c0_7 = arith.constant 0 : index
    %c0_8 = arith.constant 0 : index
    %6 = vector.load %arg4[%c0_7, %c0_8] : memref<1x128xf32, #tpu.memory_space<vmem>>, vector<1x128xf32>
    %7 = vector.broadcast %6 : vector<1x128xf32> to vector<16x128xf32>
    %8 = arith.addf %5, %7 : vector<16x128xf32>
    %c0_9 = arith.constant 0 : index
    %c0_10 = arith.constant 0 : index
    %9 = vector.load %arg5[%c0_9, %c0_10] : memref<128x256xbf16, #tpu.memory_space<vmem>>, vector<128x256xbf16>
    %cst_11 = arith.constant dense<0.000000e+00> : vector<16x256xf32>
    %10 = tpu.matmul %3, %9, %cst_11 {dimension_numbers = #tpu.dot_dimension_numbers<[1], [0], [0], [1], [0, 0, 1, 1], [], []>} : vector<16x128xbf16>, vector<128x256xbf16>, vector<16x256xf32> -> vector<16x256xf32>
    %c0_12 = arith.constant 0 : index
    %c0_13 = arith.constant 0 : index
    %11 = vector.load %arg6[%c0_12, %c0_13] : memref<1x256xf32, #tpu.memory_space<vmem>>, vector<1x256xf32>
    %12 = vector.broadcast %11 : vector<1x256xf32> to vector<16x256xf32>
    %13 = arith.addf %10, %12 : vector<16x256xf32>
    %14 = vector.extract_strided_slice %8 {offsets = [0, 0], sizes = [16, 32], strides = [1, 1]} : vector<16x128xf32> to vector<16x32xf32>
    %15 = vector.extract_strided_slice %8 {offsets = [0, 32], sizes = [16, 32], strides = [1, 1]} : vector<16x128xf32> to vector<16x32xf32>
    %16 = vector.extract_strided_slice %8 {offsets = [0, 64], sizes = [16, 32], strides = [1, 1]} : vector<16x128xf32> to vector<16x32xf32>
    %17 = vector.extract_strided_slice %8 {offsets = [0, 96], sizes = [16, 32], strides = [1, 1]} : vector<16x128xf32> to vector<16x32xf32>
    %18 = vector.shape_cast %14 : vector<16x32xf32> to vector<1x16x32xf32>
    %19 = vector.shape_cast %15 : vector<16x32xf32> to vector<1x16x32xf32>
    %20 = vector.shape_cast %16 : vector<16x32xf32> to vector<1x16x32xf32>
    %21 = vector.shape_cast %17 : vector<16x32xf32> to vector<1x16x32xf32>
    %22 = tpu.concatenate %18, %19, %20, %21 in 0 : vector<1x16x32xf32>, vector<1x16x32xf32>, vector<1x16x32xf32>, vector<1x16x32xf32> -> vector<4x16x32xf32>
    %23 = arith.truncf %22 : vector<4x16x32xf32> to vector<4x16x32xbf16>
    %24 = vector.extract_strided_slice %13 {offsets = [0, 0], sizes = [16, 128], strides = [1, 1]} : vector<16x256xf32> to vector<16x128xf32>
    %25 = vector.extract_strided_slice %24 {offsets = [0, 0], sizes = [16, 32], strides = [1, 1]} : vector<16x128xf32> to vector<16x32xf32>
    %26 = tpu.transpose %25, [1, 0] : vector<16x32xf32> -> vector<32x16xf32>
    %27 = vector.extract_strided_slice %24 {offsets = [0, 32], sizes = [16, 32], strides = [1, 1]} : vector<16x128xf32> to vector<16x32xf32>
    %28 = tpu.transpose %27, [1, 0] : vector<16x32xf32> -> vector<32x16xf32>
    %29 = vector.extract_strided_slice %24 {offsets = [0, 64], sizes = [16, 32], strides = [1, 1]} : vector<16x128xf32> to vector<16x32xf32>
    %30 = tpu.transpose %29, [1, 0] : vector<16x32xf32> -> vector<32x16xf32>
    %31 = vector.extract_strided_slice %24 {offsets = [0, 96], sizes = [16, 32], strides = [1, 1]} : vector<16x128xf32> to vector<16x32xf32>
    %32 = tpu.transpose %31, [1, 0] : vector<16x32xf32> -> vector<32x16xf32>
    %33 = vector.shape_cast %26 : vector<32x16xf32> to vector<1x32x16xf32>
    %34 = vector.shape_cast %28 : vector<32x16xf32> to vector<1x32x16xf32>
    %35 = vector.shape_cast %30 : vector<32x16xf32> to vector<1x32x16xf32>
    %36 = vector.shape_cast %32 : vector<32x16xf32> to vector<1x32x16xf32>
    %37 = tpu.concatenate %33, %34, %35, %36 in 0 : vector<1x32x16xf32>, vector<1x32x16xf32>, vector<1x32x16xf32>, vector<1x32x16xf32> -> vector<4x32x16xf32>
    %38 = arith.truncf %37 : vector<4x32x16xf32> to vector<4x32x16xbf16>
    %39 = vector.extract_strided_slice %13 {offsets = [0, 128], sizes = [16, 128], strides = [1, 1]} : vector<16x256xf32> to vector<16x128xf32>
    %40 = vector.extract_strided_slice %39 {offsets = [0, 0], sizes = [16, 32], strides = [1, 1]} : vector<16x128xf32> to vector<16x32xf32>
    %41 = vector.extract_strided_slice %39 {offsets = [0, 32], sizes = [16, 32], strides = [1, 1]} : vector<16x128xf32> to vector<16x32xf32>
    %42 = vector.extract_strided_slice %39 {offsets = [0, 64], sizes = [16, 32], strides = [1, 1]} : vector<16x128xf32> to vector<16x32xf32>
    %43 = vector.extract_strided_slice %39 {offsets = [0, 96], sizes = [16, 32], strides = [1, 1]} : vector<16x128xf32> to vector<16x32xf32>
    %44 = vector.shape_cast %40 : vector<16x32xf32> to vector<1x16x32xf32>
    %45 = vector.shape_cast %41 : vector<16x32xf32> to vector<1x16x32xf32>
    %46 = vector.shape_cast %42 : vector<16x32xf32> to vector<1x16x32xf32>
    %47 = vector.shape_cast %43 : vector<16x32xf32> to vector<1x16x32xf32>
    %48 = tpu.concatenate %44, %45, %46, %47 in 0 : vector<1x16x32xf32>, vector<1x16x32xf32>, vector<1x16x32xf32>, vector<1x16x32xf32> -> vector<4x16x32xf32>
    %49 = arith.truncf %48 : vector<4x16x32xf32> to vector<4x16x32xbf16>
    %c0_14 = arith.constant 0 : index
    %c0_15 = arith.constant 0 : index
    %c0_16 = arith.constant 0 : index
    %50 = vector.load %arg11[%c0_14, %c0_15, %c0_16] : memref<1x1x16xf32, #tpu.memory_space<vmem>>, vector<1x1x16xf32>
    "tpu.trace_start"() <{level = 10 : i32, message = "hqd,hdk->hqk"}> : () -> ()
    %cst_17 = arith.constant dense<0.000000e+00> : vector<4x16x16xf32>
    %51 = tpu.matmul %23, %38, %cst_17 {dimension_numbers = #tpu.dot_dimension_numbers<[2], [1], [1], [2], [0, 0, 0, 1, 1, 2], [0], [0]>} : vector<4x16x32xbf16>, vector<4x32x16xbf16>, vector<4x16x16xf32> -> vector<4x16x16xf32>
    "tpu.trace_stop"() : () -> ()
    %cst_18 = arith.constant 0.176776692 : f32
    %52 = vector.broadcast %cst_18 : f32 to vector<4x16x16xf32>
    %53 = arith.mulf %51, %52 : vector<4x16x16xf32>
    %54 = vector.broadcast %50 : vector<1x1x16xf32> to vector<4x16x16xf32>
    %55 = arith.addf %53, %54 : vector<4x16x16xf32>
    %cst_19 = arith.constant dense<0xFF800000> : vector<4x16xf32>
    %56 = vector.multi_reduction <maximumf>, %55, %cst_19 [2] : vector<4x16x16xf32> to vector<4x16xf32>
    %57 = vector.shape_cast %56 : vector<4x16xf32> to vector<4x16x1xf32>
    %58 = vector.broadcast %57 : vector<4x16x1xf32> to vector<4x16x16xf32>
    %59 = arith.subf %55, %58 : vector<4x16x16xf32>
    %60 = math.exp %59 : vector<4x16x16xf32>
    %cst_20 = arith.constant dense<0.000000e+00> : vector<4x16xf32>
    %61 = vector.multi_reduction <add>, %60, %cst_20 [2] : vector<4x16x16xf32> to vector<4x16xf32>
    %62 = vector.shape_cast %61 : vector<4x16xf32> to vector<4x16x1xf32>
    %63 = tpu.reciprocal %62 {approx = true} : vector<4x16x1xf32> -> vector<4x16x1xf32>
    %64 = vector.broadcast %63 : vector<4x16x1xf32> to vector<4x16x16xf32>
    %65 = arith.mulf %60, %64 : vector<4x16x16xf32>
    %66 = arith.truncf %65 : vector<4x16x16xf32> to vector<4x16x16xbf16>
    "tpu.trace_start"() <{level = 10 : i32, message = "hqk,hkd->hqd"}> : () -> ()
    %cst_21 = arith.constant dense<0.000000e+00> : vector<4x16x32xf32>
    %67 = tpu.matmul %66, %49, %cst_21 {dimension_numbers = #tpu.dot_dimension_numbers<[2], [1], [1], [2], [0, 0, 0, 1, 1, 2], [0], [0]>} : vector<4x16x16xbf16>, vector<4x16x32xbf16>, vector<4x16x32xf32> -> vector<4x16x32xf32>
    "tpu.trace_stop"() : () -> ()
    %68 = vector.extract_strided_slice %67 {offsets = [0, 0, 0], sizes = [1, 16, 32], strides = [1, 1, 1]} : vector<4x16x32xf32> to vector<1x16x32xf32>
    %69 = vector.shape_cast %68 : vector<1x16x32xf32> to vector<16x32xf32>
    %70 = vector.extract_strided_slice %67 {offsets = [1, 0, 0], sizes = [1, 16, 32], strides = [1, 1, 1]} : vector<4x16x32xf32> to vector<1x16x32xf32>
    %71 = vector.shape_cast %70 : vector<1x16x32xf32> to vector<16x32xf32>
    %72 = vector.extract_strided_slice %67 {offsets = [2, 0, 0], sizes = [1, 16, 32], strides = [1, 1, 1]} : vector<4x16x32xf32> to vector<1x16x32xf32>
    %73 = vector.shape_cast %72 : vector<1x16x32xf32> to vector<16x32xf32>
    %74 = vector.extract_strided_slice %67 {offsets = [3, 0, 0], sizes = [1, 16, 32], strides = [1, 1, 1]} : vector<4x16x32xf32> to vector<1x16x32xf32>
    %75 = vector.shape_cast %74 : vector<1x16x32xf32> to vector<16x32xf32>
    %76 = tpu.concatenate %69, %71, %73, %75 in 1 : vector<16x32xf32>, vector<16x32xf32>, vector<16x32xf32>, vector<16x32xf32> -> vector<16x128xf32>
    %77 = arith.truncf %76 : vector<16x128xf32> to vector<16x128xbf16>
    %c0_22 = arith.constant 0 : index
    %c0_23 = arith.constant 0 : index
    %78 = vector.load %arg7[%c0_22, %c0_23] : memref<128x128xbf16, #tpu.memory_space<vmem>>, vector<128x128xbf16>
    %cst_24 = arith.constant dense<0.000000e+00> : vector<16x128xf32>
    %79 = tpu.matmul %77, %78, %cst_24 {dimension_numbers = #tpu.dot_dimension_numbers<[1], [0], [0], [1], [0, 0, 1, 1], [], []>} : vector<16x128xbf16>, vector<128x128xbf16>, vector<16x128xf32> -> vector<16x128xf32>
    %c0_25 = arith.constant 0 : index
    %c0_26 = arith.constant 0 : index
    %80 = vector.load %arg8[%c0_25, %c0_26] : memref<1x128xf32, #tpu.memory_space<vmem>>, vector<1x128xf32>
    %81 = vector.broadcast %80 : vector<1x128xf32> to vector<16x128xf32>
    %82 = arith.addf %79, %81 : vector<16x128xf32>
    %83 = arith.extf %1 : vector<16x128xbf16> to vector<16x128xf32>
    %c0_27 = arith.constant 0 : index
    %c0_28 = arith.constant 0 : index
    %84 = vector.load %arg9[%c0_27, %c0_28] : memref<1x128xf32, #tpu.memory_space<vmem>>, vector<1x128xf32>
    %c0_29 = arith.constant 0 : index
    %c0_30 = arith.constant 0 : index
    %85 = vector.load %arg10[%c0_29, %c0_30] : memref<1x128xf32, #tpu.memory_space<vmem>>, vector<1x128xf32>
    %c0_31 = arith.constant 0 : index
    %c0_32 = arith.constant 0 : index
    %c0_33 = arith.constant 0 : index
    %86 = vector.load %arg12[%c0_31, %c0_32, %c0_33] : memref<1x16x1xf32, #tpu.memory_space<vmem>>, vector<1x16x1xf32>
    %87 = vector.shape_cast %86 : vector<1x16x1xf32> to vector<16x1xf32>
    %88 = arith.addf %82, %83 : vector<16x128xf32>
    %cst_34 = arith.constant dense<0.000000e+00> : vector<16xf32>
    %89 = vector.multi_reduction <add>, %88, %cst_34 [1] : vector<16x128xf32> to vector<16xf32>
    %90 = vector.shape_cast %89 : vector<16xf32> to vector<16x1xf32>
    %cst_35 = arith.constant 1.280000e+02 : f32
    %91 = vector.broadcast %cst_35 : f32 to vector<16x1xf32>
    %92 = arith.divf %90, %91 : vector<16x1xf32>
    %93 = vector.broadcast %92 : vector<16x1xf32> to vector<16x128xf32>
    %94 = arith.subf %88, %93 : vector<16x128xf32>
    %95 = vector.broadcast %92 : vector<16x1xf32> to vector<16x128xf32>
    %96 = arith.subf %88, %95 : vector<16x128xf32>
    %97 = arith.mulf %94, %96 : vector<16x128xf32>
    %cst_36 = arith.constant dense<0.000000e+00> : vector<16xf32>
    %98 = vector.multi_reduction <add>, %97, %cst_36 [1] : vector<16x128xf32> to vector<16xf32>
    %99 = vector.shape_cast %98 : vector<16xf32> to vector<16x1xf32>
    %cst_37 = arith.constant 1.280000e+02 : f32
    %100 = vector.broadcast %cst_37 : f32 to vector<16x1xf32>
    %101 = arith.divf %99, %100 : vector<16x1xf32>
    %102 = vector.broadcast %92 : vector<16x1xf32> to vector<16x128xf32>
    %103 = arith.subf %88, %102 : vector<16x128xf32>
    %cst_38 = arith.constant 9.99999974E-6 : f32
    %104 = vector.broadcast %cst_38 : f32 to vector<16x1xf32>
    %105 = arith.addf %101, %104 : vector<16x1xf32>
    %106 = math.rsqrt %105 : vector<16x1xf32>
    %107 = vector.broadcast %106 : vector<16x1xf32> to vector<16x128xf32>
    %108 = arith.mulf %103, %107 : vector<16x128xf32>
    %109 = vector.broadcast %84 : vector<1x128xf32> to vector<16x128xf32>
    %110 = arith.mulf %108, %109 : vector<16x128xf32>
    %111 = vector.broadcast %85 : vector<1x128xf32> to vector<16x128xf32>
    %112 = arith.addf %110, %111 : vector<16x128xf32>
    %113 = vector.broadcast %87 : vector<16x1xf32> to vector<16x128xf32>
    %114 = arith.mulf %112, %113 : vector<16x128xf32>
    %115 = arith.truncf %114 : vector<16x128xf32> to vector<16x128xbf16>
    %c0_39 = arith.constant 0 : index
    %c0_40 = arith.constant 0 : index
    %c0_41 = arith.constant 0 : index
    %116 = vector.load %arg13[%c0_39, %c0_40, %c0_41] : memref<1x16x128xbf16, #tpu.memory_space<vmem>>, vector<1x16x128xbf16>
    %117 = vector.shape_cast %116 : vector<1x16x128xbf16> to vector<16x128xbf16>
    %118 = vector.shape_cast %115 : vector<16x128xbf16> to vector<1x16x128xbf16>
    tpu.vector_store %arg13[%c0_39, %c0_40, %c0_41], %118 {strides = array<i32>} : memref<1x16x128xbf16, #tpu.memory_space<vmem>>, vector<1x16x128xbf16>,
    return
  }
  func.func @transform_0(%arg0: i32) -> (i32, i32, i32) {
    %c0_i32 = arith.constant 0 : i32
    %c0_i32_0 = arith.constant 0 : i32
    %c0_i32_1 = arith.constant 0 : i32
    return %arg0, %c0_i32, %c0_i32_0 : i32, i32, i32
  }
  func.func @transform_1(%arg0: i32) -> (i32, i32, i32) {
    %c0_i32 = arith.constant 0 : i32
    %c0_i32_0 = arith.constant 0 : i32
    %c0_i32_1 = arith.constant 0 : i32
    return %arg0, %c0_i32, %c0_i32_0 : i32, i32, i32
  }
  func.func @transform_2(%arg0: i32) -> (i32, i32) {
    %c0_i32 = arith.constant 0 : i32
    %c0_i32_0 = arith.constant 0 : i32
    %c0_i32_1 = arith.constant 0 : i32
    return %c0_i32, %c0_i32_0 : i32, i32
  }
  func.func @transform_3(%arg0: i32) -> (i32, i32) {
    %c0_i32 = arith.constant 0 : i32
    %c0_i32_0 = arith.constant 0 : i32
    %c0_i32_1 = arith.constant 0 : i32
    return %c0_i32, %c0_i32_0 : i32, i32
  }
  func.func @transform_4(%arg0: i32) -> (i32, i32) {
    %c0_i32 = arith.constant 0 : i32
    %c0_i32_0 = arith.constant 0 : i32
    %c0_i32_1 = arith.constant 0 : i32
    return %c0_i32, %c0_i32_0 : i32, i32
  }
  func.func @transform_5(%arg0: i32) -> (i32, i32) {
    %c0_i32 = arith.constant 0 : i32
    %c0_i32_0 = arith.constant 0 : i32
    %c0_i32_1 = arith.constant 0 : i32
    return %c0_i32, %c0_i32_0 : i32, i32
  }
  func.func @transform_6(%arg0: i32) -> (i32, i32) {
    %c0_i32 = arith.constant 0 : i32
    %c0_i32_0 = arith.constant 0 : i32
    %c0_i32_1 = arith.constant 0 : i32
    return %c0_i32, %c0_i32_0 : i32, i32
  }
  func.func @transform_7(%arg0: i32) -> (i32, i32) {
    %c0_i32 = arith.constant 0 : i32
    %c0_i32_0 = arith.constant 0 : i32
    %c0_i32_1 = arith.constant 0 : i32
    return %c0_i32, %c0_i32_0 : i32, i32
  }
  func.func @transform_8(%arg0: i32) -> (i32, i32) {
    %c0_i32 = arith.constant 0 : i32
    %c0_i32_0 = arith.constant 0 : i32
    %c0_i32_1 = arith.constant 0 : i32
    return %c0_i32, %c0_i32_0 : i32, i32
  }
  func.func @transform_9(%arg0: i32) -> (i32, i32) {
    %c0_i32 = arith.constant 0 : i32
    %c0_i32_0 = arith.constant 0 : i32
    %c0_i32_1 = arith.constant 0 : i32
    return %c0_i32, %c0_i32_0 : i32, i32
  }
  func.func @transform_10(%arg0: i32) -> (i32, i32, i32) {
    %c0_i32 = arith.constant 0 : i32
    %c0_i32_0 = arith.constant 0 : i32
    %c0_i32_1 = arith.constant 0 : i32
    return %arg0, %c0_i32, %c0_i32_0 : i32, i32, i32
  }
  func.func @transform_11(%arg0: i32) -> (i32, i32, i32) {
    %c0_i32 = arith.constant 0 : i32
    %c0_i32_0 = arith.constant 0 : i32
    %c0_i32_1 = arith.constant 0 : i32
    return %arg0, %c0_i32, %c0_i32_0 : i32, i32, i32
  }
  func.func @transform_12(%arg0: i32) -> (i32, i32, i32) {
    %c0_i32 = arith.constant 0 : i32
    %c0_i32_0 = arith.constant 0 : i32
    %c0_i32_1 = arith.constant 0 : i32
    return %arg0, %c0_i32, %c0_i32_0 : i32, i32, i32
  }
}

module attributes {stable_mosaic.version = 11 : i64} {
  func.func @_log_softmax_apply_kernel(%arg0: i32, %arg1: i32, %arg2: memref<16x256xf32, #tpu.memory_space<vmem>>, %arg3: memref<16x1xf32, #tpu.memory_space<vmem>>, %arg4: memref<16x1xf32, #tpu.memory_space<vmem>>, %arg5: memref<16x256xf32, #tpu.memory_space<vmem>>) attributes {dimension_semantics = [#tpu.dimension_semantics<parallel>, #tpu.dimension_semantics<parallel>], iteration_bounds = array<i64: 2, 1>, scalar_prefetch = 0 : i64, scratch_operands = 0 : i64, tpu.core_type = #tpu.core_type<tc>, window_params = [{transform_indices = @transform_0, window_bounds = array<i64: 16, 256>}, {transform_indices = @transform_1, window_bounds = array<i64: 16, 1>}, {transform_indices = @transform_2, window_bounds = array<i64: 16, 1>}, {transform_indices = @transform_3, window_bounds = array<i64: 16, 256>}]} {
    %c0 = arith.constant 0 : index
    %c0_0 = arith.constant 0 : index
    %0 = vector.load %arg2[%c0, %c0_0] : memref<16x256xf32, #tpu.memory_space<vmem>>, vector<16x256xf32>
    %c0_1 = arith.constant 0 : index
    %c0_2 = arith.constant 0 : index
    %1 = vector.load %arg3[%c0_1, %c0_2] : memref<16x1xf32, #tpu.memory_space<vmem>>, vector<16x1xf32>
    %2 = vector.broadcast %1 : vector<16x1xf32> to vector<16x256xf32>
    %3 = arith.subf %0, %2 : vector<16x256xf32>
    %c0_3 = arith.constant 0 : index
    %c0_4 = arith.constant 0 : index
    %4 = vector.load %arg4[%c0_3, %c0_4] : memref<16x1xf32, #tpu.memory_space<vmem>>, vector<16x1xf32>
    %5 = math.log %4 : vector<16x1xf32>
    %6 = vector.broadcast %5 : vector<16x1xf32> to vector<16x256xf32>
    %7 = arith.subf %3, %6 : vector<16x256xf32>
    %c0_5 = arith.constant 0 : index
    %c0_6 = arith.constant 0 : index
    %8 = vector.load %arg5[%c0_5, %c0_6] : memref<16x256xf32, #tpu.memory_space<vmem>>, vector<16x256xf32>
    tpu.vector_store %arg5[%c0_5, %c0_6], %7 {strides = array<i32>} : memref<16x256xf32, #tpu.memory_space<vmem>>, vector<16x256xf32>,
    return
  }
  func.func @transform_0(%arg0: i32, %arg1: i32) -> (i32, i32) {
    %c0_i32 = arith.constant 0 : i32
    return %arg0, %arg1 : i32, i32
  }
  func.func @transform_1(%arg0: i32, %arg1: i32) -> (i32, i32) {
    %c0_i32 = arith.constant 0 : i32
    %c0_i32_0 = arith.constant 0 : i32
    return %arg0, %c0_i32 : i32, i32
  }
  func.func @transform_2(%arg0: i32, %arg1: i32) -> (i32, i32) {
    %c0_i32 = arith.constant 0 : i32
    %c0_i32_0 = arith.constant 0 : i32
    return %arg0, %c0_i32 : i32, i32
  }
  func.func @transform_3(%arg0: i32, %arg1: i32) -> (i32, i32) {
    %c0_i32 = arith.constant 0 : i32
    return %arg0, %arg1 : i32, i32
  }
}

</mosaic_0001>

<bundles_post_ra>
// kernel: transformer_decoder_forward.14
= control target key start
LH: loop header
LB: loop body
LE: loop exit
PB: predicated region body
PF: predicated region fallthrough
CT: control target
= control target key end

     0   :  { %10 = vsyncpa [#allocation4], 0  ;;  %s1544_s0 = inlined_call_operand.hbm [shape: bf16[32,128], index: 0, kind: input, shape index: {}]   ;;  %s1545_s1 = inlined_call_operand.hbm [shape: bf16[128,256], index: 1, kind: input, shape index: {}]   ;;  %s1546_s2 = inlined_call_operand.hbm [shape: f32[32,256], index: 2, kind: output, shape index: {0}]   ;;  %s1547_s3 = inlined_call_operand.hbm [shape: f32[32,1], index: 3, kind: output, shape index: {1}]   ;;  %s1548_s4 = inlined_call_operand.hbm [shape: f32[32,1], index: 4, kind: output, shape index: {2}]  }
   0x1   :  { %12 = vsyncpa [#allocation4 + $0x1], 0 }
   0x2   :  { %13 = vsyncpa [#allocation7], 0 }
   0x3   :  { %14 = vsyncpa [#allocation5], 0 }
   0x4   :  { %16 = vsyncpa [#allocation5 + $0x1], 0 }
   0x5   :  { %17 = vsyncpa [#allocation10], 0 }
   0x6   :  { %19 = vsyncpa [#allocation10 + $0x1], 0  ;;  %s1189_s15 = smov 0   ;;  %s1191_s16 = smov 0  }
   0x7   :  { %s1193_s17 = smov 0   ;;  %s1195_s18 = smov 0  }
   0x8   :  { %s1197_s19 = smov 0   ;;  %s1199_s20 = smov 0  }
   0x9 LB: > { %s1220_s21 = sadd.s32 4294967295, %s1146_s20   ;;  %s1552_s22 = sadd.s32 4294967294, %s1146_s20   ;;  %s1146_s20 = sphi %s1199_s20, %s25_s20   ;;  %s1142_s19 = sphi %s1197_s19, %s1574_s19   ;;  %s1138_s18 = sphi %s1195_s18, %s1573_s18   ;;  %s1134_s17 = sphi %s1193_s17, %s1572_s17   ;;  %s1130_s16 = sphi %s1191_s16, %s1571_s16   ;;  %s1126_s15 = sphi %s1189_s15, %s1570_s15  }
   0xa   : > { %p66_p0 = scmp.ne.s32.totalorder %s1130_s16, %s1126_s15  ;;  %p1549_p1 = scmp.eq.s32.totalorder %s1220_s21, 0 }
   0xb   : > { %p126_p3 = scmp.eq.s32.totalorder %s1552_s22, 1  ;;  %p763_p5 = scmp.ge.s32.totalorder %s1146_s20, 1 }
   0xc   : > { %p1231_p4 = por %p1549_p1, %p66_p0  ;;  %p185_p7 = scmp.lt.s32.totalorder %s1146_s20, 3 }
   0xd   : > { %p1236_p6 = por %p126_p3, %p66_p0  ;;  %s1148_s26 = smov [#allocation6]  }
   0xe   : > { %s1554_s23 = scalar_select %p1231_p4, 1, 0 }
   0xf   : > { %s1555_s24 = scalar_select %p1236_p6, 1, 0 }
  0x10   : > { %p1241_p8 = pnand %p763_p5, %p185_p7  ;;  %s203_s27 = sshll.u32 %s1148_s26, 4  ;;  %s204_s27 = int_to_ptr.vmem [resolvable:$true] %s203_s27 }
  0x11   : > { %s44_s29 = sadd.s32 1, %s1142_s19  ;;  %s942_s6 = scalar_lea.hbm %s1545_s1, 2048 }
  0x12   : > { %s1556_s25 = scalar_select %p1241_p8, 1, 0 }
  0x13   : > { %p821_p9 = pneg %p1241_p8  ;;  %p943_p12 = scmp.ne.s32.totalorder %s1545_s1, %s942_s6 }
  0x14   : > { %p949_p5 = scmp.lt.u32.totalorder %s942_s6, %s1545_s1 }
  0x15   : > { %p1250_p11 = pnand %p821_p9, %p1549_p1 }
  0x17   : > { %p944_p13 = pneg %p1250_p11 }
  0x19   : > { %p945_p0 = pnand %p944_p13, %p943_p12 }
  0x1b   : > { %p946_p3 = pneg %p945_p0 }
  0x1d   : > { %p951_p7 = pnand %p949_p5, %p946_p3 }
  0x1f   : > { %954 = shalt.err (!%p951_p7)
}
  0x20   : > { %s955_s11 = scalar_lea.vmem %s204_s27, 2048  ;;  %p963_p2 = scmp.lt.s32.totalorder %s204_s27, %s204_s27 }
  0x21   : > { %p956_p9 = scmp.ne.s32.totalorder %s204_s27, %s955_s11  ;;  %p964_p6 = scmp.lt.s32.totalorder %s955_s11, %s955_s11 }
  0x23   : > { %p958_p10 = pnand %p956_p9, %p944_p13  ;;  %p965_p4 = por %p964_p6, %p963_p2 }
  0x25   : > { %p959_p1 = pneg %p958_p10 }
  0x27   : > { %p966_p8 = pnand %p965_p4, %p959_p1 }
  0x29   : > { %969 = shalt.err (!%p966_p8)
}
  0x2a   : > { %s1149_s12 = smov 128   ;;  %s1150_s13 = smov 8  }
  0x2b   : > { %824 = dma.hbm_to_vmem [thread:$0]  (!%p1250_p11), %s1545_s1, 2048, %s204_s27, [#allocation7], %s1149_s12, %s1149_s12, %s1150_s13  }
  0x2c   : > { %p46_p1 = scmp.ge.s32.totalorder %s44_s29, 2  ;;  %s53_s30 = sadd.s32 1, %s1134_s17 }
  0x2d   : > { %p60_p2 = scmp.ne.s32.totalorder %s1134_s17, %s1130_s16  ;;  %p61_p4 = scmp.eq.s32.totalorder %s1146_s20, 0 }
  0x2e   : > { %s1576_s29 = smov (%p46_p1, %s44_s29), 0  ;;  %p1559_p8 = scmp.eq.s32.totalorder %s1220_s21, 1 }
  0x2f   : > { %p1277_p6 = por %p61_p4, %p60_p2  ;;  %s48_s28 = ssub.s32 %s1142_s19, %s1576_s29 }
  0x30   : > { %p1283_p10 = por %p1559_p8, %p60_p2  ;;  %p840_p12 = scmp.lt.s32.totalorder %s1146_s20, 2 }
  0x31   : > { %p51_p11 = scmp.eq.s32.totalorder %s48_s28, 0  ;;  %s217_s27 = sand.u32 1, %s1134_s17  }
  0x32   : > { %s766_s7 = sshll.u32 %s217_s27, 3  ;;  %s804_s9 = sshll.u32 %s1142_s19, 7 }
  0x33   : > { %s1292_s8 = scalar_select %p51_p11, %s1134_s17, %s53_s30  }
  0x34   : > { %s1298_s12 = scalar_lea.hbm %s1544_s0, %s804_s9  ;;  %s221_s13 = scalar_lea.vmem [#allocation3], %s766_s7 }
  0x35   : > { %s229_s14 = sshll.u32 %s221_s13, 4  ;;  %p1304_p13 = pnand %p840_p12, %p1277_p6  ;;  %s1300_s14 = int_to_ptr.vmem [resolvable:$true] %s229_s14 }
  0x36   : > { %s1308_s30 = scalar_lea.sflag [#allocation4], %s217_s27  ;;  %s970_s28 = scalar_lea.hbm %s1298_s12, 128 }
  0x37   : > { %p971_p0 = scmp.ne.s32.totalorder %s1298_s12, %s970_s28  ;;  %p972_p3 = pneg %p1304_p13 }
  0x38   : > { %s975_s5 = scalar_lea.hbm %s1544_s0, 256  ;;  %p976_p9 = scmp.lt.u32.totalorder %s1298_s12, %s1544_s0 }
  0x39   : > { %p973_p5 = pnand %p972_p3, %p971_p0  ;;  %p977_p1 = scmp.lt.u32.totalorder %s975_s5, %s970_s28 }
  0x3a   : > { %p979_p4 = scmp.lt.u32.totalorder %s970_s28, %s1298_s12 }
  0x3b   : > { %p974_p7 = pneg %p973_p5  ;;  %p978_p2 = por %p977_p1, %p976_p9 }
  0x3d   : > { %p980_p6 = por %p979_p4, %p978_p2 }
  0x3f   : > { %p981_p8 = pnand %p980_p6, %p974_p7 }
  0x41   : > { %984 = shalt.err (!%p981_p8)
}
  0x42   : > { %s985_s27 = scalar_lea.vmem %s1300_s14, 128  ;;  %s1151_s13 = smov [#allocation3]  }
  0x43   : > { %p986_p12 = scmp.ne.s32.totalorder %s1300_s14, %s985_s27  ;;  %s990_s7 = sshll.u32 %s1151_s13, 4  ;;  %s991_s7 = int_to_ptr.vmem [resolvable:$false] %s990_s7 }
  0x44   : > { %s992_s9 = scalar_lea.vmem %s991_s7, 256  ;;  %p993_p5 = scmp.lt.s32.totalorder %s1300_s14, %s991_s7 }
  0x45   : > { %p988_p11 = pnand %p986_p12, %p972_p3  ;;  %p994_p9 = scmp.lt.s32.totalorder %s992_s9, %s985_s27 }
  0x47   : > { %p989_p0 = pneg %p988_p11  ;;  %p995_p1 = por %p994_p9, %p993_p5 }
  0x49   : > { %p996_p2 = pnand %p995_p1, %p989_p0 }
  0x4b   : > { %999 = shalt.err (!%p996_p2)
}
  0x4c   : > { %s1152_s28 = smov 64   ;;  %s1153_s5 = smov 4  }
  0x4d   : > { %828 = dma.hbm_to_vmem [thread:$0]  (!%p1304_p13), %s1298_s12, 128, %s1300_s14, %s1308_s30, %s1152_s28, %s1152_s28, %s1153_s5  }
  0x4e   : > { %p1562_p3 = scmp.ne.s32.totalorder %s1556_s25, 0 }
  0x4f   : > { %s1339_s10 = sand.u32 (!%p1562_p3), 1, %s1130_s16   ;;  %p1563_p7 = scmp.ne.s32.totalorder (!%p1562_p3), %s1554_s23, 0 }
  0x50   : > { %241 = sbr.rel (%p1562_p3) target bundleno = 792 (0x318), region = 28  ;;  %s770_s11 = sshll.u32 (!%p1562_p3), %s1339_s10, 3 }
  0x51   : > { %s244_s27 = scalar_lea.sflag (!%p1562_p3), [#allocation4], %s1339_s10  ;;  %s1343_s13 = scalar_lea.vmem (!%p1562_p3), [#allocation3], %s770_s11 }
  0x57   : > { %1109 = dma.done.wait (%p1563_p7), %s244_s27, 128  }
  0x58   : > { %1111 = vsyncadd (%p1563_p7), %s244_s27, 4294967168  ;;  %p1564_p13 = scmp.eq.s32.totalorder %s1220_s21, 0 }
  0x5a   : > { %1113 = dma.done.wait (%p1564_p13), [#allocation7], 2048   ;;  %p1565_p4 = pmov %p1564_p13 }
  0x5b   : > { %v1154_v0 = vmov 0   ;;  %v905_v1 = vld [vmem:[#allocation6 + $0x4] ss:$8 sps:$4 sm:$0xff]   ;;  %v907_v2 = vld [vmem:[#allocation6] ss:$8 sps:$4 sm:$0xff]   ;;  %v929_v17 = vld [vmem:[%s1343_s13] sm:$0xff]  }
  0x5c   : > { %1115 = vsyncadd (%p1565_p4), [#allocation7], 4294965248  ;;  %452 = vmatprep.mubr.bf16.mxu0 %v1154_v0  ;;  %903 = vset.pattern.permute.xlu1 %v1154_v0  ;;  %v908_v3 = vld [vmem:[#allocation6 + $0x14] ss:$8 sps:$4 sm:$0xff]   ;;  %v910_v4 = vld [vmem:[#allocation6 + $0x10] ss:$8 sps:$4 sm:$0xff]  }
  0x5d   : > { %904 = vset.pattern.permute.xlu0 %v1154_v0  ;;  %420 = vmatprep.subr.bf16.mxu0 %v905_v1  ;;  %v911_v5 = vld [vmem:[#allocation6 + $0x24] ss:$8 sps:$4 sm:$0xff]   ;;  %v913_v6 = vld [vmem:[#allocation6 + $0x20] ss:$8 sps:$4 sm:$0xff]   ;;  %v914_v7 = vld [vmem:[#allocation6 + $0x34] ss:$8 sps:$4 sm:$0xff]  }
  0x5e   : > { %421 = vmatpush1.bf16.msra.mxu0 %v907_v2  ;;  %v916_v8 = vld [vmem:[#allocation6 + $0x30] ss:$8 sps:$4 sm:$0xff]   ;;  %v917_v9 = vld [vmem:[#allocation6 + $0x44] ss:$8 sps:$4 sm:$0xff]   ;;  %v919_v10 = vld [vmem:[#allocation6 + $0x40] ss:$8 sps:$4 sm:$0xff]  }
  0x5f   : > { %422 = vmatprep.subr.bf16.mxu0 %v908_v3  ;;  %v920_v11 = vld [vmem:[#allocation6 + $0x54] ss:$8 sps:$4 sm:$0xff]   ;;  %v922_v12 = vld [vmem:[#allocation6 + $0x50] ss:$8 sps:$4 sm:$0xff]   ;;  %v923_v13 = vld [vmem:[#allocation6 + $0x64] ss:$8 sps:$4 sm:$0xff]  }
  0x60   : > { %v925_v14 = vld [vmem:[#allocation6 + $0x60] ss:$8 sps:$4 sm:$0xff]   ;;  %v926_v15 = vld [vmem:[#allocation6 + $0x74] ss:$8 sps:$4 sm:$0xff]   ;;  %v928_v16 = vld [vmem:[#allocation6 + $0x70] ss:$8 sps:$4 sm:$0xff]  }
  0x61   : > { %s773_s23 = sshll.u32 %s1339_s10, 4  ;;  %vm300_vm0 = vcmask 7168   ;;  %v1155_v18 = vmov -1e+30   ;;  %s772_s12 = sshll.u32 %s1339_s10, 5  ;;  %v1156_v25 = vmov 0.0  }
  0x62   : > { %423 = vmatpush1.bf16.msra.mxu0 %v910_v4  ;;  %s1355_s25 = scalar_lea.vmem [#allocation9], %s773_s23  ;;  %s1362_s14 = scalar_lea.vmem [#allocation8], %s772_s12 }
  0x63   : > { %424 = vmatprep.subr.bf16.mxu0 %v911_v5  ;;  %301 = vst.msk [vmem:[%s1355_s25] sm:$0xff] %vm300_vm0, %v1155_v18  ;;  %302 = vst.msk [vmem:[%s1355_s25 + $0x8] sm:$0xff] %vm300_vm0, %v1155_v18  ;;  %s1368_s26 = scalar_lea.vmem [#allocation11], %s773_s23  ;;  %s564_s30 = sshll.u32 %s1362_s14, 4  ;;  %s1440_s30 = int_to_ptr.vmem [resolvable:$true] %s564_s30 }
  0x64   : > { %303 = vst.msk [vmem:[%s1368_s26] sm:$0xff] %vm300_vm0, %v1156_v25  ;;  %304 = vst.msk [vmem:[%s1368_s26 + $0x8] sm:$0xff] %vm300_vm0, %v1156_v25  ;;  %s542_s7 = sand.u32 1, %s1220_s21   ;;  %s1553_s9 = sshll.u32 %s1138_s18, 8 }
  0x65   : > { %s1406_s11 = scalar_lea.hbm %s1547_s3, %s1553_s9  ;;  %s580_s27 = sshll.u32 %s1355_s25, 4  ;;  %s1409_s27 = int_to_ptr.vmem [resolvable:$true] %s580_s27 }
  0x66   : > { %425 = vmatpush1.bf16.msra.mxu0 %v913_v6  ;;  %s1411_s13 = scalar_lea.sflag [#allocation10], %s542_s7  ;;  %s1000_s23 = scalar_lea.vmem %s1409_s27, 256 }
  0x67   : > { %426 = vmatprep.subr.bf16.mxu0 %v914_v7  ;;  %p1001_p6 = scmp.ne.s32.totalorder %s1409_s27, %s1000_s23  ;;  %s1157_s21 = smov [#allocation9]  }
  0x68   : > { %s1004_s12 = sshll.u32 %s1157_s21, 4  ;;  %s1005_s12 = int_to_ptr.vmem [resolvable:$false] %s1004_s12 }
  0x69   : > { %p1002_p8 = pnand %p1001_p6, %p1283_p10  ;;  %s1006_s22 = scalar_lea.vmem %s1005_s12, 512 }
  0x6a   : > { %427 = vmatpush1.bf16.msra.mxu0 %v916_v8  ;;  %v1375_v26 = vld [vmem:[%s1355_s25] sm:$0xff]  ;;  %v1381_v29 = vld [vmem:[%s1355_s25 + $0x8] sm:$0xff]  ;;  %p1007_p11 = scmp.lt.s32.totalorder %s1409_s27, %s1005_s12  ;;  %p1008_p0 = scmp.lt.s32.totalorder %s1006_s22, %s1000_s23 }
  0x6b   : > { %428 = vmatprep.subr.bf16.mxu0 %v917_v9  ;;  %p1003_p12 = pneg %p1002_p8 }
  0x6c   : > { %p1009_p5 = por %p1008_p0, %p1007_p11 }
  0x6e   : > { %429 = vmatpush1.bf16.msra.mxu0 %v919_v10  ;;  %p1010_p9 = pnand %p1009_p5, %p1003_p12 }
  0x6f   : > { %430 = vmatprep.subr.bf16.mxu0 %v920_v11 }
  0x72   : > { %431 = vmatpush1.bf16.msra.mxu0 %v922_v12 }
  0x73   : > { %432 = vmatprep.subr.bf16.mxu0 %v923_v13 }
  0x76   : > { %433 = vmatpush1.bf16.msra.mxu0 %v925_v14 }
  0x77   : > { %434 = vmatprep.subr.bf16.mxu0 %v926_v15 }
  0x7a   : > { %435 = vmatpush1.bf16.msra.mxu0 %v928_v16 }
  0x7d   : > { %453 = vmatmul.mubr.bf16.vlgmr.msra.gmra.mrb[0].mxu0 %v929_v17 }
 0x150   : > { %v454_v19 = vpop.f32.mrb[0].mxu0 }
 0x151   : > { %478 = vst [vmem:[%s1362_s14] sm:$0xff] %v454_v19  ;;  %v456_v20 = vpop.f32.mrb[1].mxu0 }
 0x152   : > { %479 = vst [vmem:[%s1362_s14 + $0x8] sm:$0xff] %v456_v20  ;;  %v458_v21 = vpop.f32.mrb[2].mxu0  ;;  %v482_v22 = vmax.f32 %v454_v19, %v456_v20 }
 0x153   : > { %480 = vst [vmem:[%s1362_s14 + $0x10] sm:$0xff] %v458_v21  ;;  %v460_v23 = vpop.f32.mrb[3].mxu0 }
 0x154   : > { %481 = vst [vmem:[%s1362_s14 + $0x18] sm:$0xff] %v460_v23  ;;  %483 = vmax.xlane.f32.xlu0 %v482_v22  ;;  %v485_v24 = vmax.f32 %v458_v21, %v460_v23 }
 0x158   : > { %486 = vmax.xlane.f32.xlu0 %v485_v24 }
 0x1e1   : > { %v484_v27 = vpop.xlane.xlu0 %483 }
 0x1e2   : > { %v1378_v28 = vmax.f32 %v1375_v26, %v484_v27 }
 0x1e4   : > { %v494_v30 = vsub.f32 %v1375_v26, %v1378_v28  ;;  %535 = vst.msk [vmem:[%s1355_s25] sm:$0xff] %vm300_vm0, %v1378_v28  ;;  %504 = vperm.xlu1 %903, %v1378_v28  }
 0x1e5   : > { %v487_v31 = vpop.xlane.xlu0 %486 }
 0x1e6   : > { %v1390_v32 = vmax.f32 %v1381_v29, %v487_v31 }
 0x1e8   : > { %v495_v33 = vsub.f32 %v1381_v29, %v1390_v32  ;;  %536 = vst.msk [vmem:[%s1355_s25 + $0x8] sm:$0xff] %vm300_vm0, %v1390_v32  ;;  %509 = vperm.xlu1 %903, %v1390_v32  }
 0x263   : > { %v505_v34 = vpop.permute.xlu1 %504 }
 0x264   : > { %v512_v35 = vsub.f32 %v454_v19, %v505_v34  ;;  %v513_v36 = vsub.f32 %v456_v20, %v505_v34 }
 0x266   : > { %v516_v37 = vmul.f32 1.442695, %v512_v35  ;;  %v518_v38 = vmul.f32 1.442695, %v513_v36 }
 0x267   : > { %v510_v39 = vpop.permute.xlu1 %509 }
 0x268   : > { %930 = vpow2.f32 %v516_v37  ;;  %v514_v40 = vsub.f32 %v458_v21, %v510_v39  ;;  %v515_v41 = vsub.f32 %v460_v23, %v510_v39 }
 0x269   : > { %932 = vpow2.f32 %v518_v38 }
 0x26a   : > { %v520_v42 = vmul.f32 1.442695, %v514_v40  ;;  %v522_v43 = vmul.f32 1.442695, %v515_v41 }
 0x26c   : > { %934 = vpow2.f32 %v520_v42 }
 0x26d   : > { %936 = vpow2.f32 %v522_v43 }
 0x272   : > { %v931_v44 = vpop.eup %930 }
 0x273   : > { %v933_v45 = vpop.eup %932 }
 0x274   : > { %v524_v46 = vadd.f32 %v933_v45, %v931_v44 }
 0x276   : > { %v935_v47 = vpop.eup %934  ;;  %525 = vadd.xlane.f32.xlu0 %v524_v46 }
 0x277   : > { %v937_v48 = vpop.eup %936 }
 0x278   : > { %v527_v49 = vadd.f32 %v937_v48, %v935_v47 }
 0x27a   : > { %528 = vadd.xlane.f32.xlu1 %v527_v49 }
 0x27b   : > { %1013 = shalt.err (!%p1010_p9)
}
 0x27c   : > { %s1014_s25 = scalar_lea.hbm %s1406_s11, 256  ;;  %s1018_s5 = scalar_lea.hbm %s1547_s3, 512 }
 0x27d   : > { %p1015_p1 = scmp.ne.s32.totalorder %s1406_s11, %s1014_s25  ;;  %p1019_p7 = scmp.lt.u32.totalorder %s1406_s11, %s1547_s3 }
 0x27e   : > { %p1020_p13 = scmp.lt.u32.totalorder %s1018_s5, %s1014_s25  ;;  %p1022_p6 = scmp.lt.u32.totalorder %s1014_s25, %s1406_s11 }
 0x27f   : > { %p1016_p2 = pnand %p1015_p1, %p1283_p10 }
 0x280   : > { %p1021_p4 = por %p1020_p13, %p1019_p7 }
 0x281   : > { %p1017_p3 = pneg %p1016_p2 }
 0x282   : > { %p1023_p8 = por %p1022_p6, %p1021_p4 }
 0x284   : > { %p1024_p12 = pnand %p1023_p8, %p1017_p3 }
 0x286   : > { %1027 = shalt.err (!%p1024_p12)
}
 0x287   : > { %s1158_s22 = smov 128   ;;  %s1159_s23 = smov 8  }
 0x288   : > { %816 = dma.vmem_to_hbm [thread:$0]  (%p1283_p10), %s1409_s27, 256, %s1406_s11, %s1411_s13, %s1158_s22, %s1158_s22, %s1159_s23  }
 0x289   : > { %s806_s25 = sshll.u32 %s1138_s18, 9  ;;  %s538_s21 = scalar_lea.sflag [#allocation5], %s1339_s10 }
 0x28a   : > { %s1446_s5 = scalar_lea.hbm %s1546_s2, %s806_s25  ;;  %s1028_s12 = scalar_lea.vmem %s1440_s30, 512 }
 0x28b   : > { %p1029_p11 = scmp.ne.s32.totalorder %s1440_s30, %s1028_s12  ;;  %s1160_s9 = smov [#allocation8]  }
 0x28c   : > { %s1032_s11 = sshll.u32 %s1160_s9, 4  ;;  %s1033_s11 = int_to_ptr.vmem [resolvable:$false] %s1032_s11 }
 0x28d   : > { %p1030_p0 = pnand %p1029_p11, %p1283_p10  ;;  %s1034_s14 = scalar_lea.vmem %s1033_s11, 1024 }
 0x28e   : > { %p1035_p9 = scmp.lt.s32.totalorder %s1440_s30, %s1033_s11  ;;  %p1036_p1 = scmp.lt.s32.totalorder %s1034_s14, %s1028_s12 }
 0x28f   : > { %p1031_p5 = pneg %p1030_p0 }
 0x290   : > { %p1037_p2 = por %p1036_p1, %p1035_p9 }
 0x292   : > { %p1038_p3 = pnand %p1037_p2, %p1031_p5 }
 0x294   : > { %1041 = shalt.err (!%p1038_p3)
}
 0x295   : > { %s1042_s27 = scalar_lea.hbm %s1446_s5, 512  ;;  %s1046_s9 = scalar_lea.hbm %s1546_s2, 1024 }
 0x296   : > { %p1043_p7 = scmp.ne.s32.totalorder %s1446_s5, %s1042_s27  ;;  %p1047_p6 = scmp.lt.u32.totalorder %s1446_s5, %s1546_s2 }
 0x297   : > { %p1048_p8 = scmp.lt.u32.totalorder %s1046_s9, %s1042_s27  ;;  %p1050_p11 = scmp.lt.u32.totalorder %s1042_s27, %s1446_s5 }
 0x298   : > { %p1044_p13 = pnand %p1043_p7, %p1283_p10 }
 0x299   : > { %p1049_p12 = por %p1048_p8, %p1047_p6 }
 0x29a   : > { %p1045_p4 = pneg %p1044_p13 }
 0x29b   : > { %p1051_p0 = por %p1050_p11, %p1049_p12 }
 0x29d   : > { %p1052_p5 = pnand %p1051_p0, %p1045_p4 }
 0x29f   : > { %1055 = shalt.err (!%p1052_p5)
}
 0x2a0   : > { %s1161_s12 = smov 256   ;;  %s1162_s14 = smov 16   ;;  %v496_v50 = vmul.f32 1.442695, %v494_v30  ;;  %v498_v51 = vmul.f32 1.442695, %v495_v33 }
 0x2a1   : > { %815 = dma.vmem_to_hbm [thread:$0]  (%p1283_p10), %s1440_s30, 512, %s1446_s5, %s538_s21, %s1161_s12, %s1161_s12, %s1162_s14  }
 0x2a2   : > { %938 = vpow2.f32 %v496_v50  ;;  %v492_v53 = vld [vmem:[%s1368_s26] sm:$0xff]  ;;  %v493_v57 = vld [vmem:[%s1368_s26 + $0x8] sm:$0xff]  ;;  %s596_s10 = sshll.u32 %s1368_s26, 4  ;;  %s1566_s30 = sshll.u32 %s1138_s18, 8  ;;  %s1490_s10 = int_to_ptr.vmem [resolvable:$true] %s596_s10 }
 0x2a3   : > { %940 = vpow2.f32 %v498_v51  ;;  %s1488_s27 = scalar_lea.hbm %s1548_s4, %s1566_s30  ;;  %s1056_s25 = scalar_lea.vmem %s1490_s10, 256 }
 0x2a4   : > { %p1057_p9 = scmp.ne.s32.totalorder %s1490_s10, %s1056_s25  ;;  %s1163_s7 = smov [#allocation11]  }
 0x2a5   : > { %s1060_s9 = sshll.u32 %s1163_s7, 4  ;;  %s1061_s9 = int_to_ptr.vmem [resolvable:$false] %s1060_s9 }
 0x2a6   : > { %p1058_p1 = pnand %p1057_p9, %p1283_p10  ;;  %s1062_s18 = scalar_lea.vmem %s1061_s9, 512 }
 0x2a7   : > { %p1063_p3 = scmp.lt.s32.totalorder %s1490_s10, %s1061_s9  ;;  %p1064_p7 = scmp.lt.s32.totalorder %s1062_s18, %s1056_s25 }
 0x2a8   : > { %p1059_p2 = pneg %p1058_p1 }
 0x2a9   : > { %p1065_p13 = por %p1064_p7, %p1063_p3 }
 0x2ab   : > { %p1066_p4 = pnand %p1065_p13, %p1059_p2 }
 0x2ac   : > { %v939_v52 = vpop.eup %938 }
 0x2ad   : > { %v500_v54 = vmul.f32 %v939_v52, %v492_v53  ;;  %v941_v55 = vpop.eup %940 }
 0x2ae   : > { %v501_v59 = vmul.f32 %v941_v55, %v493_v57 }
 0x303   : > { %v526_v56 = vpop.xlane.xlu0 %525 }
 0x304   : > { %v530_v58 = vadd.f32 %v526_v56, %v500_v54 }
 0x306   : > { %533 = vst.msk [vmem:[%s1368_s26] sm:$0xff] %vm300_vm0, %v530_v58 }
 0x307   : > { %v529_v60 = vpop.xlane.xlu1 %528 }
 0x308   : > { %v531_v61 = vadd.f32 %v529_v60, %v501_v59 }
 0x30a   : > { %534 = vst.msk [vmem:[%s1368_s26 + $0x8] sm:$0xff] %vm300_vm0, %v531_v61 }
 0x30b   : > { %1069 = shalt.err (!%p1066_p4)
}
 0x30c   : > { %s1070_s26 = scalar_lea.hbm %s1488_s27, 256  ;;  %s1074_s12 = scalar_lea.hbm %s1548_s4, 512 }
 0x30d   : > { %p1071_p6 = scmp.ne.s32.totalorder %s1488_s27, %s1070_s26  ;;  %p1075_p11 = scmp.lt.u32.totalorder %s1488_s27, %s1548_s4 }
 0x30e   : > { %p1076_p0 = scmp.lt.u32.totalorder %s1074_s12, %s1070_s26  ;;  %p1078_p9 = scmp.lt.u32.totalorder %s1070_s26, %s1488_s27 }
 0x30f   : > { %p1072_p8 = pnand %p1071_p6, %p1283_p10 }
 0x310   : > { %p1077_p5 = por %p1076_p0, %p1075_p11 }
 0x311   : > { %p1073_p12 = pneg %p1072_p8 }
 0x312   : > { %p1079_p1 = por %p1078_p9, %p1077_p5 }
 0x314   : > { %p1080_p2 = pnand %p1079_p1, %p1073_p12 }
 0x316   : > { %1083 = shalt.err (!%p1080_p2)
}
 0x317   : > { %817 = dma.vmem_to_hbm [thread:$0]  (%p1283_p10), %s1490_s10, 256, %s1488_s27, %s1411_s13, %s1158_s22, %s1158_s22, %s1159_s23  }
 0x318 PF: > { %s611_s5 = sand.u32 1, %s1126_s15   ;;  %p1567_p3 = scmp.ne.s32.totalorder %s1555_s24, 0 }
 0x319   : > { %p1568_p7 = scmp.ge.s32.totalorder %s1146_s20, 2  ;;  %s612_s21 = scalar_lea.sflag [#allocation5], %s611_s5 }
 0x31b   : > { %p830_p13 = pnand %p1568_p7, %p1567_p3 }
 0x31d   : > { %1117 = dma.done.wait (!%p830_p13), %s612_s21, 512  }
 0x31e   : > { %1119 = vsyncadd (!%p830_p13), %s612_s21, 4294966784  ;;  %s1569_s6 = sadd.s32 4294967294, %s1146_s20  }
 0x31f   : > { %s620_s25 = sand.u32 1, %s1569_s6  }
 0x320   : > { %s621_s7 = scalar_lea.sflag [#allocation10], %s620_s25 }
 0x321   : > { %1121 = dma.done.wait (!%p830_p13), %s621_s7, 512  }
 0x322   : > { %1123 = vsyncadd (!%p830_p13), %s621_s7, 4294966784  ;;  %s25_s20 = sadd.s32 1, %s1146_s20   ;;  %s1570_s15 = smov %s1130_s16 }
 0x323   : > { %p22_p10 = scmp.ge.s32.totalorder %s25_s20, 4   ;;  %s1571_s16 = smov %s1134_s17 }
 0x324   : > { %s1572_s17 = smov %s1292_s8  ;;  %s1573_s18 = smov %s1142_s19 }
 0x325   : > { %s1574_s19 = smov %s1576_s29  ;;  %24 = sbr.rel (!%p22_p10) target bundleno = 9 (0x9), region = 122 }
 0x32c   :  { %635 = vsyncpa [#allocation4], 1 }
 0x32d   :  { %637 = vsyncpa [#allocation4 + $0x1], 1 }
 0x32e   :  { %638 = vsyncpa [#allocation7], 1 }
 0x32f   :  { %639 = vsyncpa [#allocation5], 1 }
 0x330   :  { %641 = vsyncpa [#allocation5 + $0x1], 1 }
 0x331   :  { %642 = vsyncpa [#allocation10], 1 }
 0x332   :  { %644 = vsyncpa [#allocation10 + $0x1], 1 }

// kernel: transformer_decoder_forward.10
= control target key start
LH: loop header
LB: loop body
LE: loop exit
PB: predicated region body
PF: predicated region fallthrough
CT: control target
= control target key end

     0   :  { %s2051_s0 = inlined_call_operand.hbm [shape: bf16[2,16,128], index: 0, kind: input, shape index: {}]   ;;  %s2052_s1 = inlined_call_operand.hbm [shape: bf16[128,256], index: 1, kind: input, shape index: {}]   ;;  %s2053_s2 = inlined_call_operand.hbm [shape: f32[1,256], index: 2, kind: input, shape index: {}]   ;;  %s2054_s3 = inlined_call_operand.hbm [shape: bf16[256,128], index: 3, kind: input, shape index: {}]   ;;  %s2055_s4 = inlined_call_operand.hbm [shape: f32[1,128], index: 4, kind: input, shape index: {}]   ;;  %s2056_s5 = inlined_call_operand.hbm [shape: f32[1,128], index: 5, kind: input, shape index: {}]   ;;  %s2057_s6 = inlined_call_operand.hbm [shape: f32[1,128], index: 6, kind: input, shape index: {}]   ;;  %s2058_s7 = inlined_call_operand.hbm [shape: f32[2,16,1], index: 7, kind: input, shape index: {}]   ;;  %s2059_s8 = inlined_call_operand.hbm [shape: bf16[2,16,128], index: 8, kind: output, shape index: {}]  }
   0x1   :  { %2067 = sst [smem:[#allocation23_spill]] %s2051_s0 }
   0x2   :  { %2068 = sst [smem:[#allocation24_spill]] %s2052_s1 }
   0x3   :  { %2069 = sst [smem:[#allocation25_spill]] %s2053_s2 }
   0x4   :  { %2070 = sst [smem:[#allocation26_spill]] %s2054_s3 }
   0x5   :  { %2071 = sst [smem:[#allocation27_spill]] %s2055_s4 }
   0x6   :  { %13 = vsyncpa [#allocation3], 0 }
   0x7   :  { %15 = vsyncpa [#allocation3 + $0x1], 0 }
   0x8   :  { %16 = vsyncpa [#allocation6], 0 }
   0x9   :  { %17 = vsyncpa [#allocation9], 0 }
   0xa   :  { %18 = vsyncpa [#allocation12], 0 }
   0xb   :  { %19 = vsyncpa [#allocation15], 0 }
   0xc   :  { %21 = vsyncpa [#allocation15 + $0x1], 0 }
   0xd   :  { %22 = vsyncpa [#allocation4], 0 }
   0xe   :  { %24 = vsyncpa [#allocation4 + $0x1], 0  ;;  %s1661_s27 = smov 0   ;;  %s1663_s28 = smov 0  }
   0xf   :  { %s1665_s29 = smov 0   ;;  %s1667_s30 = smov 0  }
  0x10 LB: > { %s1600_s9 = smov [#allocation5]   ;;  %s1682_s11 = sadd.s32 4294967295, %s1598_s30   ;;  %s1598_s30 = sphi %s1667_s30, %s2104_s30   ;;  %s1594_s29 = sphi %s1665_s29, %s2103_s29   ;;  %s1590_s28 = sphi %s1663_s28, %s2102_s28   ;;  %s1586_s27 = sphi %s1661_s27, %s2101_s27  }
  0x11   : > { %s251_s10 = sshll.u32 %s1600_s9, 4  ;;  %p1022_p0 = scmp.ge.s32.totalorder %s1598_s30, 1  ;;  %s1687_s10 = int_to_ptr.vmem [resolvable:$true] %s251_s10 }
  0x12   : > { %p2061_p1 = scmp.eq.s32.totalorder %s1682_s11, 0  ;;  %p239_p2 = scmp.lt.s32.totalorder %s1598_s30, 3 }
  0x13   : > { %s1601_s13 = smov [#allocation8]   ;;  %s1602_s16 = smov [#allocation11]  }
  0x14   : > { %p1689_p3 = pnand %p1022_p0, %p239_p2  ;;  %s275_s14 = sshll.u32 %s1601_s13, 4  ;;  %s1702_s14 = int_to_ptr.vmem [resolvable:$true] %s275_s14 }
  0x15   : > { %s1704_s17 = sshll.u32 %s1602_s16, 4  ;;  %s2074_s1 = sld [smem:[#allocation24_spill]]  ;;  %s301_s17 = int_to_ptr.vmem [resolvable:$true] %s1704_s17 }
  0x16   : > { %s2072_s12 = scalar_select %p1689_p3, 1, 0 }
  0x17   : > { %p1151_p5 = pneg %p1689_p3 }
  0x19   : > { %p1698_p6 = pnand %p1151_p5, %p2061_p1 }
  0x1b   : > { %s1288_s20 = scalar_lea.hbm %s2074_s1, 2048  ;;  %p1714_p8 = pneg %p1698_p6 }
  0x1c   : > { %p1289_p7 = scmp.ne.s32.totalorder %s2074_s1, %s1288_s20  ;;  %p1295_p11 = scmp.lt.u32.totalorder %s1288_s20, %s2074_s1 }
  0x1e   : > { %p1291_p9 = pnand %p1714_p8, %p1289_p7 }
  0x20   : > { %p1292_p10 = pneg %p1291_p9 }
  0x22   : > { %p1297_p12 = pnand %p1295_p11, %p1292_p10 }
  0x24   : > { %1300 = shalt.err (!%p1297_p12)
}
  0x25   : > { %s1301_s26 = scalar_lea.vmem %s1687_s10, 2048  ;;  %p1309_p5 = scmp.lt.s32.totalorder %s1687_s10, %s1687_s10 }
  0x26   : > { %p1302_p13 = scmp.ne.s32.totalorder %s1687_s10, %s1301_s26  ;;  %p1310_p4 = scmp.lt.s32.totalorder %s1301_s26, %s1301_s26 }
  0x28   : > { %p1304_p0 = pnand %p1302_p13, %p1714_p8  ;;  %p1311_p7 = por %p1310_p4, %p1309_p5 }
  0x2a   : > { %p1305_p2 = pneg %p1304_p0 }
  0x2c   : > { %p1312_p9 = pnand %p1311_p7, %p1305_p2 }
  0x2e   : > { %1315 = shalt.err (!%p1312_p9)
}
  0x2f   : > { %s2060_s9 = smov 128   ;;  %s2063_s13 = smov 8  }
  0x30   : > { %1154 = dma.hbm_to_vmem [thread:$0]  (!%p1698_p6), %s2074_s1, 2048, %s1687_s10, [#allocation6], %s2060_s9, %s2060_s9, %s2063_s13  }
  0x31   : > { %s2076_s3 = sld [smem:[#allocation26_spill]] }
  0x37   : > { %s1316_s21 = scalar_lea.hbm %s2076_s3, 2048 }
  0x38   : > { %p1317_p4 = scmp.ne.s32.totalorder %s2076_s3, %s1316_s21  ;;  %p1323_p12 = scmp.lt.u32.totalorder %s1316_s21, %s2076_s3 }
  0x3a   : > { %p1319_p10 = pnand %p1317_p4, %p1714_p8 }
  0x3c   : > { %p1320_p11 = pneg %p1319_p10 }
  0x3e   : > { %p1325_p13 = pnand %p1323_p12, %p1320_p11 }
  0x40   : > { %1328 = shalt.err (!%p1325_p13)
}
  0x41   : > { %s1329_s10 = scalar_lea.vmem %s1702_s14, 2048  ;;  %p1337_p7 = scmp.lt.s32.totalorder %s1702_s14, %s1702_s14 }
  0x42   : > { %p1330_p0 = scmp.ne.s32.totalorder %s1702_s14, %s1329_s10  ;;  %p1338_p9 = scmp.lt.s32.totalorder %s1329_s10, %s1329_s10 }
  0x44   : > { %p1332_p2 = pnand %p1330_p0, %p1714_p8  ;;  %p1339_p4 = por %p1338_p9, %p1337_p7 }
  0x46   : > { %p1333_p5 = pneg %p1332_p2 }
  0x48   : > { %p1340_p10 = pnand %p1339_p4, %p1333_p5 }
  0x4a   : > { %1343 = shalt.err (!%p1340_p10)
}
  0x4b   : > { %s2064_s16 = smov 64   ;;  %s2065_s18 = smov 4  }
  0x4c   : > { %1160 = dma.hbm_to_vmem [thread:$0]  (!%p1698_p6), %s2076_s3, 2048, %s1702_s14, [#allocation9], %s2064_s16, %s2064_s16, %s2065_s18  }
  0x4d   : > { %s1344_s24 = scalar_lea.hbm %s2056_s5, 16 }
  0x4e   : > { %p1345_p11 = scmp.ne.s32.totalorder %s2056_s5, %s1344_s24  ;;  %p1351_p0 = scmp.lt.u32.totalorder %s1344_s24, %s2056_s5 }
  0x50   : > { %p1347_p12 = pnand %p1345_p11, %p1714_p8 }
  0x52   : > { %p1348_p13 = pneg %p1347_p12 }
  0x54   : > { %p1353_p2 = pnand %p1351_p0, %p1348_p13 }
  0x56   : > { %1356 = shalt.err (!%p1353_p2)
}
  0x57   : > { %s1357_s19 = scalar_lea.vmem %s301_s17, 16  ;;  %s1364_s14 = scalar_lea.vmem %s301_s17, 32 }
  0x58   : > { %p1358_p5 = scmp.ne.s32.totalorder %s301_s17, %s1357_s19  ;;  %p1365_p4 = scmp.lt.s32.totalorder %s301_s17, %s301_s17 }
  0x59   : > { %p1366_p10 = scmp.lt.s32.totalorder %s1364_s14, %s1357_s19 }
  0x5a   : > { %p1360_p7 = pnand %p1358_p5, %p1714_p8 }
  0x5b   : > { %p1367_p1 = por %p1366_p10, %p1365_p4 }
  0x5c   : > { %p1361_p9 = pneg %p1360_p7 }
  0x5e   : > { %p1368_p3 = pnand %p1367_p1, %p1361_p9 }
  0x60   : > { %1371 = shalt.err (!%p1368_p3)
}
  0x61   : > { %1166 = dma.hbm_to_vmem [thread:$0]  (!%p1698_p6), %s2056_s5, 16, %s301_s17, [#allocation12]  }
  0x62   : > { %s1607_s9 = smov [#allocation7]   ;;  %s1608_s24 = smov [#allocation10]  }
  0x63   : > { %s265_s22 = sshll.u32 %s1607_s9, 4  ;;  %s289_s25 = sshll.u32 %s1608_s24, 4  ;;  %s266_s22 = int_to_ptr.vmem [resolvable:$true] %s265_s22  ;;  %s290_s25 = int_to_ptr.vmem [resolvable:$true] %s289_s25 }
  0x64   : > { %s2077_s2 = sld [smem:[#allocation25_spill]] }
  0x6a   : > { %s1372_s13 = scalar_lea.hbm %s2077_s2, 32 }
  0x6b   : > { %p1373_p1 = scmp.ne.s32.totalorder %s2077_s2, %s1372_s13  ;;  %p1379_p12 = scmp.lt.u32.totalorder %s1372_s13, %s2077_s2 }
  0x6d   : > { %p1375_p3 = pnand %p1373_p1, %p1714_p8 }
  0x6f   : > { %p1376_p11 = pneg %p1375_p3 }
  0x71   : > { %p1381_p13 = pnand %p1379_p12, %p1376_p11 }
  0x73   : > { %1384 = shalt.err (!%p1381_p13)
}
  0x74   : > { %s1385_s17 = scalar_lea.vmem %s266_s22, 32  ;;  %p1393_p7 = scmp.lt.s32.totalorder %s266_s22, %s266_s22 }
  0x75   : > { %p1386_p0 = scmp.ne.s32.totalorder %s266_s22, %s1385_s17  ;;  %p1394_p9 = scmp.lt.s32.totalorder %s1385_s17, %s1385_s17 }
  0x77   : > { %p1388_p2 = pnand %p1386_p0, %p1714_p8  ;;  %p1395_p4 = por %p1394_p9, %p1393_p7 }
  0x79   : > { %p1389_p5 = pneg %p1388_p2 }
  0x7b   : > { %p1396_p10 = pnand %p1395_p4, %p1389_p5 }
  0x7d   : > { %1399 = shalt.err (!%p1396_p10)
}
  0x7e   : > { %1157 = dma.hbm_to_vmem [thread:$0]  (!%p1698_p6), %s2077_s2, 32, %s266_s22, [#allocation6]  }
  0x7f   : > { %s2078_s4 = sld [smem:[#allocation27_spill]] }
  0x85   : > { %s1400_s24 = scalar_lea.hbm %s2078_s4, 16 }
  0x86   : > { %p1401_p1 = scmp.ne.s32.totalorder %s2078_s4, %s1400_s24  ;;  %p1407_p12 = scmp.lt.u32.totalorder %s1400_s24, %s2078_s4 }
  0x88   : > { %p1403_p3 = pnand %p1401_p1, %p1714_p8 }
  0x8a   : > { %p1404_p11 = pneg %p1403_p3 }
  0x8c   : > { %p1409_p13 = pnand %p1407_p12, %p1404_p11 }
  0x8e   : > { %1412 = shalt.err (!%p1409_p13)
}
  0x8f   : > { %s1413_s20 = scalar_lea.vmem %s290_s25, 16  ;;  %s1420_s22 = scalar_lea.vmem %s290_s25, 32 }
  0x90   : > { %p1414_p0 = scmp.ne.s32.totalorder %s290_s25, %s1413_s20  ;;  %p1421_p7 = scmp.lt.s32.totalorder %s290_s25, %s290_s25 }
  0x91   : > { %p1422_p9 = scmp.lt.s32.totalorder %s1420_s22, %s1413_s20 }
  0x92   : > { %p1416_p2 = pnand %p1414_p0, %p1714_p8 }
  0x93   : > { %p1423_p4 = por %p1422_p9, %p1421_p7 }
  0x94   : > { %p1417_p5 = pneg %p1416_p2 }
  0x96   : > { %p1424_p10 = pnand %p1423_p4, %p1417_p5 }
  0x98   : > { %1427 = shalt.err (!%p1424_p10)
}
  0x99   : > { %1163 = dma.hbm_to_vmem [thread:$0]  (!%p1698_p6), %s2078_s4, 16, %s290_s25, [#allocation9]  }
  0x9a   : > { %s1609_s9 = smov [#allocation13]   ;;  %s1428_s26 = scalar_lea.hbm %s2057_s6, 16 }
  0x9b   : > { %s311_s13 = sshll.u32 %s1609_s9, 4  ;;  %p1429_p1 = scmp.ne.s32.totalorder %s2057_s6, %s1428_s26  ;;  %s312_s13 = int_to_ptr.vmem [resolvable:$true] %s311_s13 }
  0x9c   : > { %p1435_p12 = scmp.lt.u32.totalorder %s1428_s26, %s2057_s6 }
  0x9d   : > { %p1431_p3 = pnand %p1429_p1, %p1714_p8 }
  0x9f   : > { %p1432_p11 = pneg %p1431_p3 }
  0xa1   : > { %p1437_p13 = pnand %p1435_p12, %p1432_p11 }
  0xa3   : > { %1440 = shalt.err (!%p1437_p13)
}
  0xa4   : > { %s1441_s25 = scalar_lea.vmem %s312_s13, 16  ;;  %s1448_s22 = scalar_lea.vmem %s312_s13, 32 }
  0xa5   : > { %p1442_p0 = scmp.ne.s32.totalorder %s312_s13, %s1441_s25  ;;  %p1449_p7 = scmp.lt.s32.totalorder %s312_s13, %s312_s13 }
  0xa6   : > { %p1450_p9 = scmp.lt.s32.totalorder %s1448_s22, %s1441_s25 }
  0xa7   : > { %p1444_p2 = pnand %p1442_p0, %p1714_p8 }
  0xa8   : > { %p1451_p4 = por %p1450_p9, %p1449_p7 }
  0xa9   : > { %p1445_p5 = pneg %p1444_p2 }
  0xab   : > { %p1452_p10 = pnand %p1451_p4, %p1445_p5 }
  0xad   : > { %1455 = shalt.err (!%p1452_p10)
}
  0xae   : > { %1169 = dma.hbm_to_vmem [thread:$0]  (!%p1698_p6), %s2057_s6, 16, %s312_s13, [#allocation12]  }
  0xaf   : > { %s1021_s23 = sadd.s32 4294967294, %s1598_s30   ;;  %s1839_s15 = sadd.s32 1, %s1598_s30  }
  0xb0   : > { %s34_s9 = ssub.s32 %s1598_s30, %s1839_s15  ;;  %s37_s16 = sadd.s32 1, %s1594_s29 }
  0xb1   : > { %p35_p8 = scmp.eq.s32.totalorder %s34_s9, 0  ;;  %p44_p1 = scmp.ne.s32.totalorder %s1594_s29, %s1590_s28 }
  0xb2   : > { %p45_p3 = scmp.eq.s32.totalorder %s1598_s30, 0  ;;  %p50_p11 = scmp.ne.s32.totalorder %s1590_s28, %s1586_s27 }
  0xb3   : > { %s1850_s24 = scalar_select %p35_p8, %s1594_s29, %s37_s16  }
  0xb4   : > { %p1852_p12 = por %p45_p3, %p44_p1  ;;  %p2080_p13 = scmp.eq.s32.totalorder %s1682_s11, 0 }
  0xb5   : > { %p226_p0 = scmp.eq.s32.totalorder %s1682_s11, 1  ;;  %p232_p2 = scmp.eq.s32.totalorder %s1021_s23, 1 }
  0xb6   : > { %p1858_p6 = por %p2080_p13, %p50_p11  ;;  %p1187_p5 = scmp.lt.s32.totalorder %s1598_s30, 2 }
  0xb7   : > { %s1865_s10 = sand.u32 1, %s1594_s29   ;;  %p1867_p7 = por %p226_p0, %p44_p1 }
  0xb8   : > { %p1871_p9 = por %p232_p2, %p50_p11  ;;  %s1030_s20 = sshll.u32 %s1865_s10, 3 }
  0xb9   : > { %s2082_s19 = scalar_select %p1867_p7, 1, 0 }
  0xba   : > { %s2083_s14 = scalar_select %p1871_p9, 1, 0 }
  0xbb   : > { %s1089_s25 = sshll.u32 %s1598_s30, 7  ;;  %s2084_s0 = sld [smem:[#allocation23_spill]] }
  0xbc   : > { %s326_s23 = scalar_lea.vmem [#allocation2], %s1030_s20  ;;  %p1886_p4 = pnand %p1187_p5, %p1852_p12 }
  0xbd   : > { %s333_s9 = sshll.u32 %s326_s23, 4  ;;  %s323_s1 = scalar_lea.sflag [#allocation3], %s1865_s10  ;;  %s1882_s9 = int_to_ptr.vmem [resolvable:$true] %s333_s9 }
  0xbe   : > { %p1458_p8 = pneg %p1886_p4 }
  0xc1   : > { %s1880_s21 = scalar_lea.hbm %s2084_s0, %s1089_s25  ;;  %s1461_s26 = scalar_lea.hbm %s2084_s0, 256 }
  0xc2   : > { %s1456_s22 = scalar_lea.hbm %s1880_s21, 128  ;;  %p1462_p11 = scmp.lt.u32.totalorder %s1880_s21, %s2084_s0 }
  0xc3   : > { %p1457_p10 = scmp.ne.s32.totalorder %s1880_s21, %s1456_s22  ;;  %p1463_p12 = scmp.lt.u32.totalorder %s1461_s26, %s1456_s22 }
  0xc4   : > { %p1465_p0 = scmp.lt.u32.totalorder %s1456_s22, %s1880_s21 }
  0xc5   : > { %p1459_p1 = pnand %p1458_p8, %p1457_p10  ;;  %p1464_p13 = por %p1463_p12, %p1462_p11 }
  0xc7   : > { %p1460_p3 = pneg %p1459_p1  ;;  %p1466_p2 = por %p1465_p0, %p1464_p13 }
  0xc9   : > { %p1467_p5 = pnand %p1466_p2, %p1460_p3 }
  0xcb   : > { %1470 = shalt.err (!%p1467_p5)
}
  0xcc   : > { %s1471_s18 = scalar_lea.vmem %s1882_s9, 128  ;;  %s1610_s20 = smov [#allocation2]  }
  0xcd   : > { %p1472_p10 = scmp.ne.s32.totalorder %s1882_s9, %s1471_s18  ;;  %s1476_s25 = sshll.u32 %s1610_s20, 4  ;;  %s1477_s25 = int_to_ptr.vmem [resolvable:$false] %s1476_s25 }
  0xce   : > { %s1478_s17 = scalar_lea.vmem %s1477_s25, 256  ;;  %p1479_p7 = scmp.lt.s32.totalorder %s1882_s9, %s1477_s25 }
  0xcf   : > { %p1474_p1 = pnand %p1472_p10, %p1458_p8  ;;  %p1480_p11 = scmp.lt.s32.totalorder %s1478_s17, %s1471_s18 }
  0xd1   : > { %p1475_p9 = pneg %p1474_p1  ;;  %p1481_p12 = por %p1480_p11, %p1479_p7 }
  0xd3   : > { %p1482_p13 = pnand %p1481_p12, %p1475_p9 }
  0xd5   : > { %1485 = shalt.err (!%p1482_p13)
}
  0xd6   : > { %s2086_s22 = smov 4   ;;  %s2087_s26 = smov 64  }
  0xd7   : > { %1173 = dma.hbm_to_vmem [thread:$0]  (!%p1886_p4), %s1880_s21, 128, %s1882_s9, %s323_s1, %s2087_s26, %s2087_s26, %s2086_s22  }
  0xd8   : > { %s1090_s23 = sshll.u32 %s1598_s30, 8  ;;  %s2088_s20 = sshll.u32 %s1865_s10, 4 }
  0xd9   : > { %s347_s18 = scalar_lea.vmem [#allocation14], %s2088_s20  ;;  %s1928_s2 = scalar_lea.hbm %s2058_s7, %s1090_s23 }
  0xda   : > { %s354_s25 = sshll.u32 %s347_s18, 4  ;;  %s344_s3 = scalar_lea.sflag [#allocation15], %s1865_s10  ;;  %s1930_s25 = int_to_ptr.vmem [resolvable:$true] %s354_s25 }
  0xdb   : > { %s1486_s4 = scalar_lea.hbm %s1928_s2, 256  ;;  %s1491_s9 = scalar_lea.hbm %s2058_s7, 512 }
  0xdc   : > { %p1487_p7 = scmp.ne.s32.totalorder %s1928_s2, %s1486_s4  ;;  %p1492_p0 = scmp.lt.u32.totalorder %s1928_s2, %s2058_s7 }
  0xdd   : > { %p1493_p2 = scmp.lt.u32.totalorder %s1491_s9, %s1486_s4  ;;  %p1495_p10 = scmp.lt.u32.totalorder %s1486_s4, %s1928_s2 }
  0xde   : > { %p1489_p9 = pnand %p1487_p7, %p1458_p8 }
  0xdf   : > { %p1494_p5 = por %p1493_p2, %p1492_p0 }
  0xe0   : > { %p1490_p3 = pneg %p1489_p9 }
  0xe1   : > { %p1496_p1 = por %p1495_p10, %p1494_p5 }
  0xe3   : > { %p1497_p11 = pnand %p1496_p1, %p1490_p3 }
  0xe5   : > { %1500 = shalt.err (!%p1497_p11)
}
  0xe6   : > { %s1501_s26 = scalar_lea.vmem %s1930_s25, 256  ;;  %s1611_s23 = smov [#allocation14]  }
  0xe7   : > { %p1502_p12 = scmp.ne.s32.totalorder %s1930_s25, %s1501_s26  ;;  %s1506_s20 = sshll.u32 %s1611_s23, 4  ;;  %s1507_s20 = int_to_ptr.vmem [resolvable:$false] %s1506_s20 }
  0xe8   : > { %s1508_s18 = scalar_lea.vmem %s1507_s20, 512  ;;  %p1509_p9 = scmp.lt.s32.totalorder %s1930_s25, %s1507_s20 }
  0xe9   : > { %p1504_p13 = pnand %p1502_p12, %p1458_p8  ;;  %p1510_p0 = scmp.lt.s32.totalorder %s1508_s18, %s1501_s26 }
  0xeb   : > { %p1505_p7 = pneg %p1504_p13  ;;  %p1511_p2 = por %p1510_p0, %p1509_p9 }
  0xed   : > { %p1512_p5 = pnand %p1511_p2, %p1505_p7 }
  0xef   : > { %1515 = shalt.err (!%p1512_p5)
}
  0xf0   : > { %s2089_s4 = smov 8   ;;  %s2090_s17 = smov 128  }
  0xf1   : > { %1176 = dma.hbm_to_vmem [thread:$0]  (!%p1886_p4), %s1928_s2, 256, %s1930_s25, %s344_s3, %s2090_s17, %s2090_s17, %s2089_s4  }
  0xf2   : > { %p2091_p8 = scmp.ne.s32.totalorder %s2072_s12, 0 }
  0xf3   : > { %s1964_s1 = sand.u32 (!%p2091_p8), 1, %s1590_s28  }
  0xf4   : > { %366 = sbr.rel (%p2091_p8) target bundleno = 1074 (0x432), region = 52  ;;  %s1037_s21 = sshll.u32 (!%p2091_p8), %s1964_s1, 3 }
  0xf5   : > { %s369_s16 = scalar_lea.sflag (!%p2091_p8), [#allocation3], %s1964_s1  ;;  %s1970_s9 = scalar_lea.vmem (!%p2091_p8), [#allocation2], %s1037_s21 }
  0xfb   : > { %1561 = dma.done.wait (%p1858_p6), %s369_s16, 128  }
  0xfc   : > { %1563 = vsyncadd (%p1858_p6), %s369_s16, 4294967168  ;;  %p2092_p4 = scmp.eq.s32.totalorder %s1682_s11, 0 }
  0xfe   : > { %1565 = dma.done.wait (%p2092_p4), [#allocation6], 2080   ;;  %p2093_p3 = pmov %p2092_p4 }
 0x100   : > { %1567 = vsyncadd (%p2093_p3), [#allocation6], 4294965216  ;;  %p2094_p10 = pmov %p2093_p3 }
 0x101   : > { %p2095_p1 = pmov %p2093_p3 }
 0x102   : > { %1569 = dma.done.wait (%p2094_p10), [#allocation9], 2064  }
 0x103   : > { %1571 = vsyncadd (%p2095_p1), [#allocation9], 4294965232  ;;  %p2096_p11 = pmov %p2095_p1 }
 0x104   : > { %p2097_p12 = pmov %p2095_p1 }
 0x105   : > { %1573 = dma.done.wait (%p2096_p11), [#allocation12], 32  }
 0x106   : > { %1575 = vsyncadd (%p2097_p12), [#allocation12], 4294967264  ;;  %s1044_s2 = sshll.u32 %s1964_s1, 4  ;;  %s402_s3 = scalar_lea.sflag [#allocation15], %s1964_s1 }
 0x107   : > { %s1990_s12 = scalar_lea.vmem [#allocation14], %s1044_s2 }
 0x108   : > { %1577 = dma.done.wait (%p1858_p6), %s402_s3, 256  }
 0x109   : > { %1579 = vsyncadd (%p1858_p6), %s402_s3, 4294967040  ;;  %v1612_v0 = vmov 0   ;;  %v1242_v1 = vld [vmem:[#allocation5 + $0x4] ss:$8 sps:$4 sm:$0xff]   ;;  %v1244_v2 = vld [vmem:[#allocation5] ss:$8 sps:$4 sm:$0xff]   ;;  %v464_v34 = vlaneseq }
 0x10a   : > { %592 = vmatprep.mubr.bf16.mxu0 %v1612_v0  ;;  %1240 = vset.pattern.permute.xlu0 %v1612_v0  ;;  %v1245_v3 = vld [vmem:[#allocation5 + $0x14] ss:$8 sps:$4 sm:$0xff]   ;;  %v1247_v4 = vld [vmem:[#allocation5 + $0x10] ss:$8 sps:$4 sm:$0xff]   ;;  %v1248_v5 = vld [vmem:[#allocation5 + $0x24] ss:$8 sps:$4 sm:$0xff]  }
 0x10b   : > { %1241 = vset.pattern.permute.xlu1 %v1612_v0  ;;  %560 = vmatprep.subr.bf16.mxu0 %v1242_v1  ;;  %v1250_v6 = vld [vmem:[#allocation5 + $0x20] ss:$8 sps:$4 sm:$0xff]   ;;  %v1251_v7 = vld [vmem:[#allocation5 + $0x34] ss:$8 sps:$4 sm:$0xff]   ;;  %v1253_v8 = vld [vmem:[#allocation5 + $0x30] ss:$8 sps:$4 sm:$0xff]  }
 0x10c   : > { %561 = vmatpush1.bf16.msra.mxu0 %v1244_v2  ;;  %v1254_v9 = vld [vmem:[#allocation5 + $0x44] ss:$8 sps:$4 sm:$0xff]   ;;  %v1256_v12 = vld [vmem:[#allocation5 + $0x40] ss:$8 sps:$4 sm:$0xff]   ;;  %v1271_v15 = vld [vmem:[#allocation8 + $0x50] sm:$0xff]   ;;  %v465_v35 = vshrl.u32 %v464_v34, 7 }
 0x10d   : > { %562 = vmatprep.subr.bf16.mxu0 %v1245_v3  ;;  %v1267_v10 = vld [vmem:[#allocation8 + $0x40] sm:$0xff]   ;;  %v1269_v13 = vld [vmem:[#allocation8 + $0x48] sm:$0xff]   ;;  %v1257_v16 = vld [vmem:[#allocation5 + $0x54] ss:$8 sps:$4 sm:$0xff]   ;;  %s442_s13 = scalar_lea.vmem [#allocation16], %s1037_s21  ;;  %s1093_s25 = sshll.u32 %s1682_s11, 7 }
 0x10e   : > { %v1268_v11 = vld [vmem:[#allocation8] sm:$0xff]   ;;  %1099 = vmatprep.subr.bf16.mxu1 %v1267_v10  ;;  %v1270_v14 = vld [vmem:[#allocation8 + $0x8] sm:$0xff]   ;;  %v1272_v18 = vld [vmem:[#allocation8 + $0x10] sm:$0xff]   ;;  %v466_v36 = vsub.s32 0, %v465_v35  ;;  %v470_v38 = vsub.s32 1, %v465_v35  ;;  %s868_s10 = sshll.u32 %s442_s13, 4  ;;  %s2007_s26 = scalar_lea.hbm %s2059_s8, %s1093_s25  ;;  %s2002_s10 = int_to_ptr.vmem [resolvable:$true] %s868_s10 }
 0x10f   : > { %1100 = vmatpush3.bf16.msra.mxu1 %v1268_v11  ;;  %v1259_v17 = vld [vmem:[#allocation5 + $0x50] ss:$8 sps:$4 sm:$0xff]   ;;  %v1260_v20 = vld [vmem:[#allocation5 + $0x64] ss:$8 sps:$4 sm:$0xff]   ;;  %v1262_v21 = vld [vmem:[#allocation5 + $0x60] ss:$8 sps:$4 sm:$0xff]  }
 0x110   : > { %563 = vmatpush1.bf16.msra.mxu0 %v1247_v4  ;;  %1101 = vmatprep.subr.bf16.mxu1 %v1269_v13  ;;  %v1273_v19 = vld [vmem:[#allocation8 + $0x58] sm:$0xff]   ;;  %v1275_v24 = vld [vmem:[#allocation8 + $0x60] sm:$0xff]   ;;  %v1277_v28 = vld [vmem:[#allocation8 + $0x68] sm:$0xff]   ;;  %s855_s23 = scalar_lea.sflag [#allocation4], %s1964_s1  ;;  %s1516_s20 = scalar_lea.vmem %s2002_s10, 128 }
 0x111   : > { %564 = vmatprep.subr.bf16.mxu0 %v1248_v5  ;;  %v1274_v22 = vld [vmem:[#allocation8 + $0x18] sm:$0xff]   ;;  %v1276_v25 = vld [vmem:[#allocation8 + $0x20] sm:$0xff]   ;;  %v1278_v29 = vld [vmem:[#allocation8 + $0x28] sm:$0xff]   ;;  %p1517_p6 = scmp.ne.s32.totalorder %s2002_s10, %s1516_s20  ;;  %p2098_p13 = scmp.ne.s32.totalorder %s2082_s19, 0 }
 0x112   : > { %v1263_v23 = vld [vmem:[#allocation5 + $0x74] ss:$8 sps:$4 sm:$0xff]   ;;  %v1265_v26 = vld [vmem:[#allocation5 + $0x70] ss:$8 sps:$4 sm:$0xff]   ;;  %v462_v37 = vld [vmem:[#allocation7] sm:$0x3] }
 0x113   : > { %1102 = vmatpush3.bf16.msra.mxu1 %v1270_v14  ;;  %v444_v27 = vld [vmem:[%s1970_s9] sm:$0xff]   ;;  %v467_v39 = vrot.slane %v462_v37, %v466_v36  ;;  %v471_v40 = vrot.slane %v462_v37, %v470_v38  ;;  %v1063_v56 = vld [vmem:[#allocation10] ss:$0 sm:$0xff]  ;;  %p1518_p7 = pnand %p1517_p6, %p2098_p13  ;;  %s1613_s11 = smov [#allocation16]  }
 0x114   : > { %565 = vmatpush1.bf16.msra.mxu0 %v1250_v6  ;;  %1103 = vmatprep.subr.bf16.mxu1 %v1271_v15  ;;  %v1279_v30 = vld [vmem:[#allocation8 + $0x70] sm:$0xff]   ;;  %v1281_v32 = vld [vmem:[#allocation8 + $0x78] sm:$0xff]   ;;  %v785_v60 = vunpack.c.l.bf16 %v444_v27  ;;  %v786_v2 = vunpack.c.h.bf16 %v444_v27  ;;  %s1520_s18 = sshll.u32 %s1613_s11, 4  ;;  %s1521_s18 = int_to_ptr.vmem [resolvable:$false] %s1520_s18 }
 0x115   : > { %566 = vmatprep.subr.bf16.mxu0 %v1251_v7  ;;  %v1280_v31 = vld [vmem:[#allocation8 + $0x30] sm:$0xff]   ;;  %v1282_v33 = vld [vmem:[#allocation8 + $0x38] sm:$0xff]   ;;  %p1519_p9 = pneg %p1518_p7  ;;  %s1522_s4 = scalar_lea.vmem %s1521_s18, 256 }
 0x116   : > { %v789_v4 = vld [vmem:[%s1990_s12] sm:$0xff]  ;;  %v790_v13 = vld [vmem:[%s1990_s12 + $0x8] sm:$0xff]  ;;  %p1523_p0 = scmp.lt.s32.totalorder %s2002_s10, %s1521_s18  ;;  %p1524_p2 = scmp.lt.s32.totalorder %s1522_s4, %s1516_s20 }
 0x117   : > { %1104 = vmatpush3.bf16.msra.mxu1 %v1272_v18 }
 0x118   : > { %567 = vmatpush1.bf16.msra.mxu0 %v1253_v8  ;;  %1105 = vmatprep.subr.bf16.mxu1 %v1273_v19  ;;  %p1525_p5 = por %p1524_p2, %p1523_p0 }
 0x119   : > { %568 = vmatprep.subr.bf16.mxu0 %v1254_v9 }
 0x11a   : > { %p1526_p8 = pnand %p1525_p5, %p1519_p9 }
 0x11b   : > { %1106 = vmatpush3.bf16.msra.mxu1 %v1274_v22 }
 0x11c   : > { %569 = vmatpush1.bf16.msra.mxu0 %v1256_v12  ;;  %1107 = vmatprep.subr.bf16.mxu1 %v1275_v24 }
 0x11d   : > { %570 = vmatprep.subr.bf16.mxu0 %v1257_v16 }
 0x11f   : > { %1108 = vmatpush3.bf16.msra.mxu1 %v1276_v25  ;;  %v1081_v25 = vld [vmem:[#allocation13] ss:$0 sm:$0xff] }
 0x120   : > { %571 = vmatpush1.bf16.msra.mxu0 %v1259_v17  ;;  %1109 = vmatprep.subr.bf16.mxu1 %v1277_v28 }
 0x121   : > { %572 = vmatprep.subr.bf16.mxu0 %v1260_v20 }
 0x123   : > { %1110 = vmatpush3.bf16.msra.mxu1 %v1278_v29 }
 0x124   : > { %573 = vmatpush1.bf16.msra.mxu0 %v1262_v21  ;;  %1111 = vmatprep.subr.bf16.mxu1 %v1279_v30  ;;  %v1080_v21 = vld [vmem:[#allocation11] ss:$0 sm:$0xff] }
 0x125   : > { %574 = vmatprep.subr.bf16.mxu0 %v1263_v23 }
 0x127   : > { %1112 = vmatpush3.bf16.msra.mxu1 %v1280_v31 }
 0x128   : > { %575 = vmatpush1.bf16.msra.mxu0 %v1265_v26  ;;  %1113 = vmatprep.subr.bf16.mxu1 %v1281_v32 }
 0x12b   : > { %593 = vmatmul.mubr.bf16.vlgmr.msra.gmra.mrb[0].mxu0 %v444_v27  ;;  %1114 = vmatpush3.bf16.msra.mxu1 %v1282_v33 }
 0x1fe   : > { %v594_v41 = vpop.f32.mrb[0].mxu0 }
 0x1ff   : > { %v595_v42 = vadd.f32 %v594_v41, %v467_v39  ;;  %v596_v43 = vpop.f32.mrb[1].mxu0 }
 0x200   : > { %v597_v44 = vadd.f32 %v596_v43, %v471_v40  ;;  %v598_v45 = vpop.f32.mrb[2].mxu0 }
 0x201   : > { %v599_v46 = vadd.f32 %v598_v45, %v467_v39  ;;  %v600_v47 = vpop.f32.mrb[3].mxu0  ;;  %v603_v49 = vmax.f32 %v595_v42, 0.0 }
 0x202   : > { %v601_v48 = vadd.f32 %v600_v47, %v471_v40  ;;  %v604_v51 = vmax.f32 %v597_v44, 0.0 }
 0x203   : > { %v605_v50 = vmax.f32 %v599_v46, 0.0 }
 0x204   : > { %v606_v52 = vmax.f32 %v601_v48, 0.0 }
 0x205   : > { %v607_v53 = vpack.c.bf16 %v605_v50, %v603_v49 }
 0x206   : > { %v608_v54 = vpack.c.bf16 %v606_v52, %v604_v51 }
 0x208   : > { %776 = vmatprep.mubr.bf16.mxu1 %v608_v54 }
 0x209   : > { %777 = vmatmul.mubr.bf16.vlgmr.msra.gmra.mrb[0].mxu1 %v607_v53 }
 0x2dc   : > { %v1115_v55 = vpop.f32.mrb[0].mxu1 }
 0x2dd   : > { %v1116_v57 = vpop.f32.mrb[1].mxu1 }
 0x2de   : > { %v1117_v58 = vadd.f32 %v1116_v57, %v1115_v55  ;;  %v1118_v59 = vpop.f32.mrb[2].mxu1 }
 0x2df   : > { %v1119_v61 = vpop.f32.mrb[3].mxu1 }
 0x2e0   : > { %v779_v62 = vadd.f32 %v1117_v58, %v1063_v56  ;;  %v1120_v63 = vadd.f32 %v1119_v61, %v1118_v59 }
 0x2e2   : > { %v782_v0 = vadd.f32 %v1120_v63, %v1063_v56  ;;  %v791_v1 = vadd.f32 %v785_v60, %v779_v62 }
 0x2e4   : > { %793 = vadd.xlane.f32.xlu0 %v791_v1  ;;  %v792_v3 = vadd.f32 %v786_v2, %v782_v0 }
 0x2e8   : > { %795 = vadd.xlane.f32.xlu0 %v792_v3 }
 0x2fe   : > { %834 = vperm.xlu0 %1240, %v789_v4  }
 0x371   : > { %v794_v5 = vpop.xlane.xlu0 %793 }
 0x372   : > { %v798_v6 = vmul.f32 0.0078125, %v794_v5 }
 0x374   : > { %v800_v7 = vsub.f32 %v791_v1, %v798_v6 }
 0x375   : > { %v796_v8 = vpop.xlane.xlu0 %795 }
 0x376   : > { %v799_v9 = vmul.f32 0.0078125, %v796_v8  ;;  %v802_v10 = vmul.f32 %v800_v7, %v800_v7 }
 0x378   : > { %v801_v11 = vsub.f32 %v792_v3, %v799_v9  ;;  %804 = vadd.xlane.f32.xlu1 %v802_v10 }
 0x37a   : > { %v803_v12 = vmul.f32 %v801_v11, %v801_v11 }
 0x37c   : > { %806 = vadd.xlane.f32.xlu1 %v803_v12 }
 0x37d   : > { %v835_v29 = vpop.permute.xlu0 %834 }
 0x38d   : > { %839 = vperm.xlu1 %1241, %v790_v13  }
 0x405   : > { %v805_v14 = vpop.xlane.xlu1 %804 }
 0x406   : > { %v808_v15 = vmul.f32 0.0078125, %v805_v14 }
 0x408   : > { %v810_v16 = vadd.f32 1e-05, %v808_v15 }
 0x409   : > { %v807_v17 = vpop.xlane.xlu1 %806 }
 0x40a   : > { %1284 = vrsqrt.f32 %v810_v16  ;;  %v809_v18 = vmul.f32 0.0078125, %v807_v17 }
 0x40c   : > { %v811_v19 = vadd.f32 1e-05, %v809_v18 }
 0x40d   : > { %v840_v30 = vpop.permute.xlu1 %839 }
 0x40e   : > { %1286 = vrsqrt.f32 %v811_v19 }
 0x414   : > { %v1285_v20 = vpop.eup %1284 }
 0x415   : > { %v814_v22 = vmul.f32 %v1285_v20, %v800_v7 }
 0x417   : > { %v822_v23 = vmul.f32 %v1080_v21, %v814_v22 }
 0x418   : > { %v1287_v24 = vpop.eup %1286 }
 0x419   : > { %v815_v26 = vmul.f32 %v1287_v24, %v801_v11  ;;  %v830_v27 = vadd.f32 %v1081_v25, %v822_v23 }
 0x41b   : > { %v823_v28 = vmul.f32 %v1080_v21, %v815_v26  ;;  %v842_v32 = vmul.f32 %v835_v29, %v830_v27 }
 0x41d   : > { %v831_v31 = vadd.f32 %v1081_v25, %v823_v28 }
 0x41f   : > { %v843_v33 = vmul.f32 %v840_v30, %v831_v31 }
 0x421   : > { %v1097_v34 = vpack.c.bf16 %v843_v33, %v842_v32 }
 0x423   : > { %1098 = vst [vmem:[%s442_s13] sm:$0xff] %v1097_v34  }
 0x424   : > { %1529 = shalt.err (!%p1526_p8)
}
 0x425   : > { %s1530_s17 = scalar_lea.hbm %s2007_s26, 128  ;;  %s1534_s9 = scalar_lea.hbm %s2059_s8, 256 }
 0x426   : > { %p1531_p4 = scmp.ne.s32.totalorder %s2007_s26, %s1530_s17  ;;  %p1535_p1 = scmp.lt.u32.totalorder %s2007_s26, %s2059_s8 }
 0x427   : > { %p1536_p11 = scmp.lt.u32.totalorder %s1534_s9, %s1530_s17  ;;  %p1538_p6 = scmp.lt.u32.totalorder %s1530_s17, %s2007_s26 }
 0x428   : > { %p1532_p3 = pnand %p1531_p4, %p2098_p13 }
 0x429   : > { %p1537_p12 = por %p1536_p11, %p1535_p1 }
 0x42a   : > { %p1533_p10 = pneg %p1532_p3 }
 0x42b   : > { %p1539_p7 = por %p1538_p6, %p1537_p12 }
 0x42d   : > { %p1540_p9 = pnand %p1539_p7, %p1533_p10 }
 0x42f   : > { %1543 = shalt.err (!%p1540_p9)
}
 0x430   : > { %s1614_s12 = smov 64   ;;  %s1615_s13 = smov 4  }
 0x431   : > { %1149 = dma.vmem_to_hbm [thread:$0]  (%p2098_p13), %s2002_s10, 128, %s2007_s26, %s855_s23, %s1614_s12, %s1614_s12, %s1615_s13  }
 0x432 PF: > { %s883_s25 = sand.u32 1, %s1586_s27   ;;  %p2099_p0 = scmp.ne.s32.totalorder %s2083_s14, 0 }
 0x433   : > { %p2100_p2 = scmp.ge.s32.totalorder %s1598_s30, 2  ;;  %s884_s0 = scalar_lea.sflag [#allocation4], %s883_s25 }
 0x435   : > { %p1178_p5 = pnand %p2100_p2, %p2099_p0 }
 0x437   : > { %1581 = dma.done.wait (!%p1178_p5), %s884_s0, 128  }
 0x438   : > { %1583 = vsyncadd (!%p1178_p5), %s884_s0, 4294967168  ;;  %p27_p8 = scmp.ge.s32.totalorder %s1839_s15, 4   ;;  %s2101_s27 = smov %s1590_s28 }
 0x439   : > { %s2102_s28 = smov %s1594_s29  ;;  %s2103_s29 = smov %s1850_s24 }
 0x43a   : > { %s2104_s30 = smov %s1839_s15  ;;  %29 = sbr.rel (!%p27_p8) target bundleno = 16 (0x10), region = 134 }
 0x441   :  { %889 = vsyncpa [#allocation3], 1 }
 0x442   :  { %891 = vsyncpa [#allocation3 + $0x1], 1 }
 0x443   :  { %892 = vsyncpa [#allocation6], 1 }
 0x444   :  { %893 = vsyncpa [#allocation9], 1 }
 0x445   :  { %894 = vsyncpa [#allocation12], 1 }
 0x446   :  { %895 = vsyncpa [#allocation15], 1 }
 0x447   :  { %897 = vsyncpa [#allocation15 + $0x1], 1 }
 0x448   :  { %898 = vsyncpa [#allocation4], 1 }
 0x449   :  { %900 = vsyncpa [#allocation4 + $0x1], 1 }

// kernel: transformer_decoder_forward.8
= control target key start
LH: loop header
LB: loop body
LE: loop exit
PB: predicated region body
PF: predicated region fallthrough
CT: control target
= control target key end

     0   :  { %s3348_s0 = inlined_call_operand.hbm [shape: bf16[2,16,128], index: 0, kind: input, shape index: {}]   ;;  %s3349_s1 = inlined_call_operand.hbm [shape: bf16[128,384], index: 1, kind: input, shape index: {}]   ;;  %s3350_s2 = inlined_call_operand.hbm [shape: f32[1,384], index: 2, kind: input, shape index: {}]   ;;  %s3351_s3 = inlined_call_operand.hbm [shape: bf16[128,128], index: 3, kind: input, shape index: {}]   ;;  %s3352_s4 = inlined_call_operand.hbm [shape: f32[1,128], index: 4, kind: input, shape index: {}]   ;;  %s3353_s5 = inlined_call_operand.hbm [shape: f32[1,128], index: 5, kind: input, shape index: {}]   ;;  %s3354_s6 = inlined_call_operand.hbm [shape: f32[1,128], index: 6, kind: input, shape index: {}]   ;;  %s3355_s7 = inlined_call_operand.hbm [shape: f32[2,1,16], index: 7, kind: input, shape index: {}]   ;;  %s3356_s8 = inlined_call_operand.hbm [shape: f32[2,16,1], index: 8, kind: input, shape index: {}]   ;;  %s3357_s9 = inlined_call_operand.hbm [shape: bf16[2,16,128], index: 9, kind: output, shape index: {}]  }
   0x1   :  { %3377 = sst [smem:[#allocation28_spill]] %s3349_s1 }
   0x2   :  { %3378 = sst [smem:[#allocation29_spill]] %s3351_s3 }
   0x3   :  { %3379 = sst [smem:[#allocation30_spill]] %s3353_s5 }
   0x4   :  { %3380 = sst [smem:[#allocation31_spill]] %s3355_s7 }
   0x5   :  { %3381 = sst [smem:[#allocation32_spill]] %s3357_s9 }
   0x6   :  { %14 = vsyncpa [#allocation3], 0 }
   0x7   :  { %16 = vsyncpa [#allocation3 + $0x1], 0 }
   0x8   :  { %17 = vsyncpa [#allocation6], 0 }
   0x9   :  { %18 = vsyncpa [#allocation9], 0 }
   0xa   :  { %19 = vsyncpa [#allocation12], 0 }
   0xb   :  { %20 = vsyncpa [#allocation15], 0 }
   0xc   :  { %22 = vsyncpa [#allocation15 + $0x1], 0 }
   0xd   :  { %23 = vsyncpa [#allocation4], 0 }
   0xe   :  { %25 = vsyncpa [#allocation4 + $0x1], 0  ;;  %s2792_s30 = smov 0   ;;  %s2794_s10 = smov 0  }
   0xf   :  { %s2796_s11 = smov 0   ;;  %s2798_s12 = smov 0  }
  0x10 LB: > { %3382 = sst [smem:[#allocation24_spill]] %s2713_s11  ;;  %s2719_s13 = smov [#allocation5]   ;;  %s2717_s12 = sphi %s2798_s12, %s3419_s12   ;;  %s2713_s11 = sphi %s2796_s11, %s3421_s11   ;;  %s2709_s10 = sphi %s2794_s10, %s3423_s10   ;;  %s2705_s30 = sphi %s2792_s30, %s3422_s30  }
  0x11   : > { %s278_s14 = sshll.u32 %s2719_s13, 4  ;;  %s2813_s15 = sadd.s32 4294967295, %s2717_s12   ;;  %s2818_s14 = int_to_ptr.vmem [resolvable:$true] %s278_s14 }
  0x12   : > { %p1862_p0 = scmp.ge.s32.totalorder %s2717_s12, 1  ;;  %p3359_p1 = scmp.eq.s32.totalorder %s2813_s15, 0 }
  0x13   : > { %p266_p2 = scmp.lt.s32.totalorder %s2717_s12, 3  ;;  %s2720_s17 = smov [#allocation8]  }
  0x14   : > { %s302_s18 = sshll.u32 %s2720_s17, 4  ;;  %s2721_s20 = smov [#allocation11]   ;;  %s2833_s18 = int_to_ptr.vmem [resolvable:$true] %s302_s18 }
  0x15   : > { %p2820_p3 = pnand %p1862_p0, %p266_p2  ;;  %s2835_s21 = sshll.u32 %s2721_s20, 4  ;;  %s328_s21 = int_to_ptr.vmem [resolvable:$true] %s2835_s21 }
  0x16   : > { %s3385_s1 = sld [smem:[#allocation28_spill]] }
  0x17   : > { %s3383_s16 = scalar_select %p2820_p3, 1, 0 }
  0x18   : > { %p2115_p5 = pneg %p2820_p3 }
  0x1a   : > { %p2829_p6 = pnand %p2115_p5, %p3359_p1 }
  0x1c   : > { %s3384_s19 = scalar_select %p2829_p6, 1, 0 }
  0x1d   : > { %s2377_s24 = scalar_lea.hbm %s3385_s1, 3072  ;;  %p2845_p8 = pneg %p2829_p6 }
  0x1e   : > { %p2378_p7 = scmp.ne.s32.totalorder %s3385_s1, %s2377_s24  ;;  %p2384_p11 = scmp.lt.u32.totalorder %s2377_s24, %s3385_s1 }
  0x1f   : > { %s3386_s27 = scalar_select %p2845_p8, 1, 0 }
  0x20   : > { %p2380_p9 = pnand %p2845_p8, %p2378_p7 }
  0x22   : > { %p2381_p10 = pneg %p2380_p9 }
  0x24   : > { %p2386_p12 = pnand %p2384_p11, %p2381_p10 }
  0x26   : > { %2389 = shalt.err (!%p2386_p12)
}
  0x27   : > { %s2390_s13 = scalar_lea.vmem %s2818_s14, 3072  ;;  %p2398_p5 = scmp.lt.s32.totalorder %s2818_s14, %s2818_s14 }
  0x28   : > { %p2391_p13 = scmp.ne.s32.totalorder %s2818_s14, %s2390_s13  ;;  %p2399_p4 = scmp.lt.s32.totalorder %s2390_s13, %s2390_s13 }
  0x2a   : > { %p2393_p0 = pnand %p2391_p13, %p2845_p8  ;;  %p2400_p7 = por %p2399_p4, %p2398_p5 }
  0x2c   : > { %p2394_p2 = pneg %p2393_p0 }
  0x2e   : > { %p2401_p9 = pnand %p2400_p7, %p2394_p2 }
  0x30   : > { %2404 = shalt.err (!%p2401_p9)
}
  0x31   : > { %s2722_s17 = smov 192   ;;  %s2723_s20 = smov 12  }
  0x32   : > { %2118 = dma.hbm_to_vmem [thread:$0]  (!%p2829_p6), %s3385_s1, 3072, %s2818_s14, [#allocation6], %s2722_s17, %s2722_s17, %s2723_s20  }
  0x33   : > { %s3387_s3 = sld [smem:[#allocation29_spill]] }
  0x39   : > { %s2405_s26 = scalar_lea.hbm %s3387_s3, 1024 }
  0x3a   : > { %p2406_p4 = scmp.ne.s32.totalorder %s3387_s3, %s2405_s26  ;;  %p2412_p12 = scmp.lt.u32.totalorder %s2405_s26, %s3387_s3 }
  0x3c   : > { %p2408_p10 = pnand %p2406_p4, %p2845_p8 }
  0x3e   : > { %p2409_p11 = pneg %p2408_p10 }
  0x40   : > { %p2414_p13 = pnand %p2412_p12, %p2409_p11 }
  0x42   : > { %2417 = shalt.err (!%p2414_p13)
}
  0x43   : > { %s2418_s14 = scalar_lea.vmem %s2833_s18, 1024  ;;  %p2426_p7 = scmp.lt.s32.totalorder %s2833_s18, %s2833_s18 }
  0x44   : > { %p2419_p0 = scmp.ne.s32.totalorder %s2833_s18, %s2418_s14  ;;  %p2427_p9 = scmp.lt.s32.totalorder %s2418_s14, %s2418_s14 }
  0x46   : > { %p2421_p2 = pnand %p2419_p0, %p2845_p8  ;;  %p2428_p4 = por %p2427_p9, %p2426_p7 }
  0x48   : > { %p2422_p5 = pneg %p2421_p2 }
  0x4a   : > { %p2429_p10 = pnand %p2428_p4, %p2422_p5 }
  0x4c   : > { %2432 = shalt.err (!%p2429_p10)
}
  0x4d   : > { %s3361_s17 = smov 64   ;;  %s3362_s9 = smov 4  }
  0x4e   : > { %2124 = dma.hbm_to_vmem [thread:$0]  (!%p2829_p6), %s3387_s3, 1024, %s2833_s18, [#allocation9], %s3361_s17, %s3361_s17, %s3362_s9  }
  0x4f   : > { %s3388_s5 = sld [smem:[#allocation30_spill]] }
  0x55   : > { %s2433_s25 = scalar_lea.hbm %s3388_s5, 16 }
  0x56   : > { %p2434_p11 = scmp.ne.s32.totalorder %s3388_s5, %s2433_s25  ;;  %p2440_p0 = scmp.lt.u32.totalorder %s2433_s25, %s3388_s5 }
  0x58   : > { %p2436_p12 = pnand %p2434_p11, %p2845_p8 }
  0x5a   : > { %p2437_p13 = pneg %p2436_p12 }
  0x5c   : > { %p2442_p2 = pnand %p2440_p0, %p2437_p13 }
  0x5e   : > { %2445 = shalt.err (!%p2442_p2)
}
  0x5f   : > { %s2446_s14 = scalar_lea.vmem %s328_s21, 16  ;;  %s2453_s18 = scalar_lea.vmem %s328_s21, 32 }
  0x60   : > { %p2447_p5 = scmp.ne.s32.totalorder %s328_s21, %s2446_s14  ;;  %p2454_p4 = scmp.lt.s32.totalorder %s328_s21, %s328_s21 }
  0x61   : > { %p2455_p10 = scmp.lt.s32.totalorder %s2453_s18, %s2446_s14 }
  0x62   : > { %p2449_p7 = pnand %p2447_p5, %p2845_p8 }
  0x63   : > { %p2456_p1 = por %p2455_p10, %p2454_p4 }
  0x64   : > { %p2450_p9 = pneg %p2449_p7 }
  0x66   : > { %p2457_p3 = pnand %p2456_p1, %p2450_p9 }
  0x68   : > { %2460 = shalt.err (!%p2457_p3)
}
  0x69   : > { %2130 = dma.hbm_to_vmem [thread:$0]  (!%p2829_p6), %s3388_s5, 16, %s328_s21, [#allocation12]  }
  0x6a   : > { %s1861_s23 = sadd.s32 4294967294, %s2717_s12   ;;  %s2913_s24 = sadd.s32 1, %s2717_s12  }
  0x6b   : > { %3389 = sst [smem:[#allocation25_spill]] %s2913_s24  ;;  %s38_s25 = sadd.s32 1, %s2713_s11 }
  0x6c   : > { %s35_s26 = ssub.s32 %s2717_s12, %s2913_s24  ;;  %p45_p1 = scmp.ne.s32.totalorder %s2713_s11, %s2709_s10 }
  0x6d   : > { %p36_p3 = scmp.eq.s32.totalorder %s35_s26, 0  ;;  %p46_p11 = scmp.eq.s32.totalorder %s2717_s12, 0 }
  0x6e   : > { %p51_p12 = scmp.ne.s32.totalorder %s2709_s10, %s2705_s30  ;;  %p253_p13 = scmp.eq.s32.totalorder %s2813_s15, 1 }
  0x6f   : > { %s2925_s28 = scalar_select %p36_p3, %s2713_s11, %s38_s25  }
  0x70   : > { %p47_p0 = por %p46_p11, %p45_p1  ;;  %p3391_p2 = scmp.eq.s32.totalorder %s2813_s15, 0 }
  0x71   : > { %3390 = sst [smem:[#allocation26_spill]] %s2925_s28  ;;  %p2933_p7 = por %p253_p13, %p45_p1 }
  0x72   : > { %p2929_p5 = por %p3391_p2, %p51_p12  ;;  %p259_p9 = scmp.eq.s32.totalorder %s1861_s23, 1 }
  0x73   : > { %s3393_s29 = scalar_select %p2933_p7, 1, 0 }
  0x74   : > { %s3392_s21 = scalar_select %p2929_p5, 1, 0 }
  0x75   : > { %p2154_p4 = scmp.lt.s32.totalorder %s2717_s12, 2  ;;  %s2939_s13 = sand.u32 1, %s2713_s11  }
  0x76   : > { %p2941_p10 = por %p259_p9, %p51_p12  ;;  %s370_s18 = sand.u32 1, %s2717_s12  }
  0x77   : > { %p2946_p3 = pnand %p2154_p4, %p47_p0  ;;  %s1873_s22 = sshll.u32 %s2717_s12, 4 }
  0x78   : > { %s3394_s14 = scalar_select %p2941_p10, 1, 0 }
  0x79   : > { %s3396_s20 = scalar_select %p2946_p3, 1, 0 }
  0x7a   : > { %3395 = sst [smem:[#allocation27_spill]] %s3394_s14  ;;  %s3397_s7 = sld [smem:[#allocation31_spill]] }
  0x7b   : > { %s373_s17 = scalar_lea.vmem [#allocation14], %s2939_s13  ;;  %s2960_s3 = scalar_lea.sflag [#allocation15], %s370_s18 }
  0x7c   : > { %s380_s9 = sshll.u32 %s373_s17, 4  ;;  %p2966_p11 = pneg %p2946_p3  ;;  %s2958_s9 = int_to_ptr.vmem [resolvable:$true] %s380_s9 }
  0x7e   : > { %s3398_s28 = scalar_select %p2966_p11, 1, 0 }
  0x80   : > { %s2954_s23 = scalar_lea.hbm %s3397_s7, %s1873_s22  ;;  %s2466_s17 = scalar_lea.hbm %s3397_s7, 32 }
  0x81   : > { %s2461_s5 = scalar_lea.hbm %s2954_s23, 16  ;;  %p2467_p0 = scmp.lt.u32.totalorder %s2954_s23, %s3397_s7 }
  0x82   : > { %p2462_p1 = scmp.ne.s32.totalorder %s2954_s23, %s2461_s5  ;;  %p2468_p2 = scmp.lt.u32.totalorder %s2466_s17, %s2461_s5 }
  0x83   : > { %p2470_p4 = scmp.lt.u32.totalorder %s2461_s5, %s2954_s23 }
  0x84   : > { %p2464_p12 = pnand %p2966_p11, %p2462_p1  ;;  %p2469_p9 = por %p2468_p2, %p2467_p0 }
  0x86   : > { %p2465_p13 = pneg %p2464_p12  ;;  %p2471_p10 = por %p2470_p4, %p2469_p9 }
  0x88   : > { %p2472_p7 = pnand %p2471_p10, %p2465_p13 }
  0x8a   : > { %2475 = shalt.err (!%p2472_p7)
}
  0x8b   : > { %s2476_s18 = scalar_lea.vmem %s2958_s9, 16  ;;  %s2726_s22 = smov [#allocation14]  }
  0x8c   : > { %p2477_p1 = scmp.ne.s32.totalorder %s2958_s9, %s2476_s18  ;;  %s2481_s25 = sshll.u32 %s2726_s22, 4  ;;  %s2482_s25 = int_to_ptr.vmem [resolvable:$false] %s2481_s25 }
  0x8d   : > { %s2483_s1 = scalar_lea.vmem %s2482_s25, 32  ;;  %p2484_p6 = scmp.lt.s32.totalorder %s2958_s9, %s2482_s25 }
  0x8e   : > { %p2479_p12 = pnand %p2477_p1, %p2966_p11  ;;  %p2485_p8 = scmp.lt.s32.totalorder %s2483_s1, %s2476_s18 }
  0x90   : > { %p2480_p5 = pneg %p2479_p12  ;;  %p2486_p0 = por %p2485_p8, %p2484_p6 }
  0x92   : > { %p2487_p2 = pnand %p2486_p0, %p2480_p5 }
  0x94   : > { %2490 = shalt.err (!%p2487_p2)
}
  0x95   : > { %2140 = dma.hbm_to_vmem [thread:$0]  (!%p2946_p3), %s2954_s23, 16, %s2958_s9, %s2960_s3  }
  0x96   : > { %s2727_s5 = smov [#allocation7]   ;;  %s2728_s26 = smov [#allocation10]  }
  0x97   : > { %s292_s17 = sshll.u32 %s2727_s5, 4  ;;  %s316_s7 = sshll.u32 %s2728_s26, 4  ;;  %s293_s17 = int_to_ptr.vmem [resolvable:$true] %s292_s17  ;;  %s317_s7 = int_to_ptr.vmem [resolvable:$true] %s316_s7 }
  0x98   : > { %s2491_s25 = scalar_lea.hbm %s3350_s2, 48  ;;  %p3399_p8 = scmp.ne.s32.totalorder %s3386_s27, 0 }
  0x99   : > { %p2492_p6 = scmp.ne.s32.totalorder %s3350_s2, %s2491_s25  ;;  %p2498_p10 = scmp.lt.u32.totalorder %s2491_s25, %s3350_s2 }
  0x9b   : > { %p2494_p5 = pnand %p2492_p6, %p3399_p8 }
  0x9d   : > { %p2495_p7 = pneg %p2494_p5 }
  0x9f   : > { %p2500_p13 = pnand %p2498_p10, %p2495_p7 }
  0xa1   : > { %2503 = shalt.err (!%p2500_p13)
}
  0xa2   : > { %s2504_s9 = scalar_lea.vmem %s293_s17, 48  ;;  %s2511_s11 = scalar_lea.vmem %s293_s17, 64 }
  0xa3   : > { %p2505_p9 = scmp.ne.s32.totalorder %s293_s17, %s2504_s9  ;;  %p2512_p12 = scmp.lt.s32.totalorder %s293_s17, %s293_s17 }
  0xa4   : > { %p2513_p0 = scmp.lt.s32.totalorder %s2511_s11, %s2504_s9 }
  0xa5   : > { %p2507_p4 = pnand %p2505_p9, %p3399_p8 }
  0xa6   : > { %p2514_p2 = por %p2513_p0, %p2512_p12 }
  0xa7   : > { %p2508_p1 = pneg %p2507_p4 }
  0xa9   : > { %p2515_p3 = pnand %p2514_p2, %p2508_p1 }
  0xab   : > { %2518 = shalt.err (!%p2515_p3)
}
  0xac   : > { %p3400_p6 = scmp.ne.s32.totalorder %s3384_s19, 0  ;;  %s2519_s26 = scalar_lea.hbm %s3352_s4, 16 }
  0xad   : > { %p2520_p5 = scmp.ne.s32.totalorder %s3352_s4, %s2519_s26  ;;  %p2526_p3 = scmp.lt.u32.totalorder %s2519_s26, %s3352_s4 }
  0xae   : > { %2121 = dma.hbm_to_vmem [thread:$0]  (!%p3400_p6), %s3350_s2, 48, %s293_s17, [#allocation6]  }
  0xaf   : > { %p2522_p7 = pnand %p2520_p5, %p3399_p8 }
  0xb1   : > { %p2523_p10 = pneg %p2522_p7 }
  0xb3   : > { %p2528_p13 = pnand %p2526_p3, %p2523_p10 }
  0xb5   : > { %2531 = shalt.err (!%p2528_p13)
}
  0xb6   : > { %s2532_s9 = scalar_lea.vmem %s317_s7, 16  ;;  %s2539_s17 = scalar_lea.vmem %s317_s7, 32 }
  0xb7   : > { %p2533_p9 = scmp.ne.s32.totalorder %s317_s7, %s2532_s9  ;;  %p2540_p12 = scmp.lt.s32.totalorder %s317_s7, %s317_s7 }
  0xb8   : > { %p2541_p0 = scmp.lt.s32.totalorder %s2539_s17, %s2532_s9 }
  0xb9   : > { %p2535_p4 = pnand %p2533_p9, %p3399_p8 }
  0xba   : > { %p2542_p2 = por %p2541_p0, %p2540_p12 }
  0xbb   : > { %p2536_p1 = pneg %p2535_p4 }
  0xbd   : > { %p2543_p11 = pnand %p2542_p2, %p2536_p1 }
  0xbf   : > { %2546 = shalt.err (!%p2543_p11)
}
  0xc0   : > { %2127 = dma.hbm_to_vmem [thread:$0]  (!%p3400_p6), %s3352_s4, 16, %s317_s7, [#allocation9]  }
  0xc1   : > { %s2729_s5 = smov [#allocation13]   ;;  %s1870_s14 = sshll.u32 %s2939_s13, 3 }
  0xc2   : > { %s338_s24 = sshll.u32 %s2729_s5, 4  ;;  %s2547_s25 = scalar_lea.hbm %s3354_s6, 16  ;;  %s339_s24 = int_to_ptr.vmem [resolvable:$true] %s338_s24 }
  0xc3   : > { %p2548_p11 = scmp.ne.s32.totalorder %s3354_s6, %s2547_s25  ;;  %p2554_p10 = scmp.lt.u32.totalorder %s2547_s25, %s3354_s6 }
  0xc5   : > { %p2550_p5 = pnand %p2548_p11, %p3399_p8 }
  0xc7   : > { %p2551_p7 = pneg %p2550_p5 }
  0xc9   : > { %p2556_p3 = pnand %p2554_p10, %p2551_p7 }
  0xcb   : > { %2559 = shalt.err (!%p2556_p3)
}
  0xcc   : > { %s2560_s7 = scalar_lea.vmem %s339_s24, 16  ;;  %s2567_s11 = scalar_lea.vmem %s339_s24, 32 }
  0xcd   : > { %p2561_p13 = scmp.ne.s32.totalorder %s339_s24, %s2560_s7  ;;  %p2568_p1 = scmp.lt.s32.totalorder %s339_s24, %s339_s24 }
  0xce   : > { %p2569_p12 = scmp.lt.s32.totalorder %s2567_s11, %s2560_s7 }
  0xcf   : > { %p2563_p9 = pnand %p2561_p13, %p3399_p8 }
  0xd0   : > { %p2570_p0 = por %p2569_p12, %p2568_p1 }
  0xd1   : > { %p2564_p4 = pneg %p2563_p9 }
  0xd3   : > { %p2571_p2 = pnand %p2570_p0, %p2564_p4 }
  0xd5   : > { %2574 = shalt.err (!%p2571_p2)
}
  0xd6   : > { %2133 = dma.hbm_to_vmem [thread:$0]  (!%p3400_p6), %s3354_s6, 16, %s339_s24, [#allocation12]  }
  0xd7   : > { %s1939_s26 = sshll.u32 %s2717_s12, 7  ;;  %s353_s18 = scalar_lea.vmem [#allocation2], %s1870_s14 }
  0xd8   : > { %s3049_s25 = scalar_lea.hbm %s3348_s0, %s1939_s26  ;;  %s360_s1 = sshll.u32 %s353_s18, 4  ;;  %s3051_s1 = int_to_ptr.vmem [resolvable:$true] %s360_s1 }
  0xd9   : > { %s350_s19 = scalar_lea.sflag [#allocation3], %s2939_s13  ;;  %s2575_s9 = scalar_lea.hbm %s3049_s25, 128 }
  0xda   : > { %p2576_p8 = scmp.ne.s32.totalorder %s3049_s25, %s2575_s9  ;;  %p3401_p11 = scmp.ne.s32.totalorder %s3398_s28, 0 }
  0xdb   : > { %s2580_s7 = scalar_lea.hbm %s3348_s0, 256  ;;  %p2581_p7 = scmp.lt.u32.totalorder %s3049_s25, %s3348_s0 }
  0xdc   : > { %p2578_p5 = pnand %p2576_p8, %p3401_p11  ;;  %p2582_p10 = scmp.lt.u32.totalorder %s2580_s7, %s2575_s9 }
  0xdd   : > { %p2584_p13 = scmp.lt.u32.totalorder %s2575_s9, %s3049_s25 }
  0xde   : > { %p2579_p6 = pneg %p2578_p5  ;;  %p2583_p3 = por %p2582_p10, %p2581_p7 }
  0xe0   : > { %p2585_p9 = por %p2584_p13, %p2583_p3 }
  0xe2   : > { %p2586_p4 = pnand %p2585_p9, %p2579_p6 }
  0xe4   : > { %2589 = shalt.err (!%p2586_p4)
}
  0xe5   : > { %s2590_s14 = scalar_lea.vmem %s3051_s1, 128  ;;  %s2730_s5 = smov [#allocation2]  }
  0xe6   : > { %p2591_p1 = scmp.ne.s32.totalorder %s3051_s1, %s2590_s14  ;;  %s2595_s26 = sshll.u32 %s2730_s5, 4  ;;  %s2596_s26 = int_to_ptr.vmem [resolvable:$false] %s2595_s26 }
  0xe7   : > { %s2597_s22 = scalar_lea.vmem %s2596_s26, 256  ;;  %p2598_p2 = scmp.lt.s32.totalorder %s3051_s1, %s2596_s26 }
  0xe8   : > { %p2593_p12 = pnand %p2591_p1, %p3401_p11  ;;  %p2599_p8 = scmp.lt.s32.totalorder %s2597_s22, %s2590_s14 }
  0xea   : > { %p2594_p0 = pneg %p2593_p12  ;;  %p2600_p5 = por %p2599_p8, %p2598_p2 }
  0xec   : > { %p2601_p7 = pnand %p2600_p5, %p2594_p0 }
  0xee   : > { %2604 = shalt.err (!%p2601_p7)
}
  0xef   : > { %p3402_p6 = scmp.ne.s32.totalorder %s3396_s20, 0  ;;  %s3403_s27 = smov 4  }
  0xf0   : > { %s3404_s18 = smov 64   ;;  %s1940_s9 = sshll.u32 %s2717_s12, 8 }
  0xf1   : > { %2137 = dma.hbm_to_vmem [thread:$0]  (!%p3402_p6), %s3049_s25, 128, %s3051_s1, %s350_s19, %s3404_s18, %s3404_s18, %s3403_s27  }
  0xf2   : > { %s3405_s24 = sshll.u32 %s2939_s13, 4  ;;  %s3086_s14 = scalar_lea.hbm %s3356_s8, %s1940_s9 }
  0xf3   : > { %s391_s17 = scalar_lea.vmem [#allocation16], %s3405_s24  ;;  %s2605_s5 = scalar_lea.hbm %s3086_s14, 256 }
  0xf4   : > { %s398_s7 = sshll.u32 %s391_s17, 4  ;;  %p2606_p10 = scmp.ne.s32.totalorder %s3086_s14, %s2605_s5  ;;  %s3088_s7 = int_to_ptr.vmem [resolvable:$true] %s398_s7 }
  0xf5   : > { %s2610_s1 = scalar_lea.hbm %s3356_s8, 512  ;;  %p2611_p9 = scmp.lt.u32.totalorder %s3086_s14, %s3356_s8 }
  0xf6   : > { %p2608_p3 = pnand %p2606_p10, %p3401_p11  ;;  %p2612_p4 = scmp.lt.u32.totalorder %s2610_s1, %s2605_s5 }
  0xf7   : > { %p2614_p12 = scmp.lt.u32.totalorder %s2605_s5, %s3086_s14 }
  0xf8   : > { %p2609_p13 = pneg %p2608_p3  ;;  %p2613_p1 = por %p2612_p4, %p2611_p9 }
  0xfa   : > { %p2615_p0 = por %p2614_p12, %p2613_p1 }
  0xfc   : > { %p2616_p2 = pnand %p2615_p0, %p2609_p13 }
  0xfe   : > { %2619 = shalt.err (!%p2616_p2)
}
  0xff   : > { %s2620_s22 = scalar_lea.vmem %s3088_s7, 256  ;;  %s2731_s27 = smov [#allocation16]  }
 0x100   : > { %p2621_p8 = scmp.ne.s32.totalorder %s3088_s7, %s2620_s22  ;;  %s2625_s18 = sshll.u32 %s2731_s27, 4  ;;  %s2626_s18 = int_to_ptr.vmem [resolvable:$false] %s2625_s18 }
 0x101   : > { %s2627_s9 = scalar_lea.vmem %s2626_s18, 512  ;;  %p2628_p10 = scmp.lt.s32.totalorder %s3088_s7, %s2626_s18 }
 0x102   : > { %p2623_p5 = pnand %p2621_p8, %p3401_p11  ;;  %p2629_p3 = scmp.lt.s32.totalorder %s2627_s9, %s2620_s22 }
 0x104   : > { %p2624_p7 = pneg %p2623_p5  ;;  %p2630_p9 = por %p2629_p3, %p2628_p10 }
 0x106   : > { %p2631_p4 = pnand %p2630_p9, %p2624_p7 }
 0x108   : > { %2634 = shalt.err (!%p2631_p4)
}
 0x109   : > { %s2732_s24 = smov 128   ;;  %s2733_s17 = smov 8  }
 0x10a   : > { %2143 = dma.hbm_to_vmem [thread:$0]  (!%p3402_p6), %s3086_s14, 256, %s3088_s7, %s2960_s3, %s2732_s24, %s2732_s24, %s2733_s17  }
 0x10b   : > { %p3406_p11 = scmp.ne.s32.totalorder %s3383_s16, 0 }
 0x10c   : > { %s3115_s28 = sand.u32 (!%p3406_p11), 1, %s2709_s10   ;;  %p3407_p13 = scmp.ne.s32.totalorder (!%p3406_p11), %s3392_s21, 0 }
 0x10d   : > { %410 = sbr.rel (%p3406_p11) target bundleno = 2299 (0x8fb), region = 56  ;;  %s1878_s11 = sshll.u32 (!%p3406_p11), %s3115_s28, 3 }
 0x10e   : > { %s413_s23 = scalar_lea.sflag (!%p3406_p11), [#allocation3], %s3115_s28  ;;  %s3121_s5 = scalar_lea.vmem (!%p3406_p11), [#allocation2], %s1878_s11 }
 0x114   : > { %2680 = dma.done.wait (%p3407_p13), %s413_s23, 128  }
 0x115   : > { %2682 = vsyncadd (%p3407_p13), %s413_s23, 4294967168  ;;  %p3408_p6 = scmp.eq.s32.totalorder %s2813_s15, 0 }
 0x117   : > { %2684 = dma.done.wait (%p3408_p6), [#allocation6], 3120   ;;  %p3409_p1 = pmov %p3408_p6 }
 0x119   : > { %2686 = vsyncadd (%p3409_p1), [#allocation6], 4294964176  ;;  %p3410_p12 = pmov %p3409_p1 }
 0x11a   : > { %p3411_p0 = pmov %p3409_p1 }
 0x11b   : > { %2688 = dma.done.wait (%p3410_p12), [#allocation9], 1040  }
 0x11c   : > { %2690 = vsyncadd (%p3411_p0), [#allocation9], 4294966256  ;;  %p3412_p2 = pmov %p3411_p0 }
 0x11d   : > { %p3413_p8 = pmov %p3411_p0 }
 0x11e   : > { %2692 = dma.done.wait (%p3412_p2), [#allocation12], 32  }
 0x11f   : > { %2694 = vsyncadd (%p3413_p8), [#allocation12], 4294967264  ;;  %s445_s3 = sand.u32 1, %s2813_s15   ;;  %s448_s20 = scalar_lea.vmem [#allocation14], %s3115_s28 }
 0x120   : > { %s446_s16 = scalar_lea.sflag [#allocation15], %s445_s3 }
 0x121   : > { %2696 = dma.done.wait (%p3407_p13), %s446_s16, 272  }
 0x122   : > { %2698 = vsyncadd (%p3407_p13), %s446_s16, 4294967024  ;;  %v2734_v0 = vmov 0   ;;  %v2299_v1 = vld [vmem:[#allocation5 + $0x4] ss:$12 sps:$4 sm:$0xff]   ;;  %v2301_v2 = vld [vmem:[#allocation5] ss:$12 sps:$4 sm:$0xff]   ;;  %v538_v18 = vlaneseq }
 0x123   : > { %719 = vmatprep.mubr.bf16.mxu0 %v2734_v0  ;;  %687 = vmatprep.subr.bf16.mxu0 %v2299_v1  ;;  %v2302_v3 = vld [vmem:[#allocation5 + $0x1c] ss:$12 sps:$4 sm:$0xff]   ;;  %v2304_v4 = vld [vmem:[#allocation5 + $0x18] ss:$12 sps:$4 sm:$0xff]   ;;  %v2305_v5 = vld [vmem:[#allocation5 + $0x34] ss:$12 sps:$4 sm:$0xff]  }
 0x124   : > { %688 = vmatpush1.bf16.msra.mxu0 %v2301_v2  ;;  %v2307_v6 = vld [vmem:[#allocation5 + $0x30] ss:$12 sps:$4 sm:$0xff]   ;;  %v2308_v7 = vld [vmem:[#allocation5 + $0x4c] ss:$12 sps:$4 sm:$0xff]   ;;  %v2310_v8 = vld [vmem:[#allocation5 + $0x48] ss:$12 sps:$4 sm:$0xff]  }
 0x125   : > { %689 = vmatprep.subr.bf16.mxu0 %v2302_v3  ;;  %v2311_v9 = vld [vmem:[#allocation5 + $0x64] ss:$12 sps:$4 sm:$0xff]   ;;  %v2313_v10 = vld [vmem:[#allocation5 + $0x60] ss:$12 sps:$4 sm:$0xff]   ;;  %v2314_v11 = vld [vmem:[#allocation5 + $0x7c] ss:$12 sps:$4 sm:$0xff]  }
 0x126   : > { %v2316_v12 = vld [vmem:[#allocation5 + $0x78] ss:$12 sps:$4 sm:$0xff]   ;;  %v2317_v13 = vld [vmem:[#allocation5 + $0x94] ss:$12 sps:$4 sm:$0xff]   ;;  %v2319_v14 = vld [vmem:[#allocation5 + $0x90] ss:$12 sps:$4 sm:$0xff]  }
 0x127   : > { %v2320_v15 = vld [vmem:[#allocation5 + $0xac] ss:$12 sps:$4 sm:$0xff]   ;;  %v2322_v16 = vld [vmem:[#allocation5 + $0xa8] ss:$12 sps:$4 sm:$0xff]   ;;  %v3151_v19 = vshrl.u32 %v538_v18, 7  ;;  %s2735_s21 = smov 96  }
 0x128   : > { %690 = vmatpush1.bf16.msra.mxu0 %v2304_v4  ;;  %v3147_v17 = vld [vmem:[%s3121_s5] sm:$0xff]   ;;  %v3154_v21 = vld [vmem:[#allocation7] sm:$0x7]  ;;  %s2736_s7 = smov 32   ;;  %s2737_s14 = smov 64   ;;  %v2738_v37 = vmov 0.0  }
 0x129   : > { %691 = vmatprep.subr.bf16.mxu0 %v2305_v5  ;;  %v540_v20 = vsub.s32 0, %v3151_v19  ;;  %v544_v22 = vsub.s32 1, %v3151_v19  ;;  %v2324_v36 = vld [vmem:[#allocation5 + $0x8] ss:$12 sps:$4 sm:$0xff]   ;;  %1987 = vmatprep.subr.bf16.mxu1 %v2738_v37  ;;  %v2325_v38 = vld [vmem:[#allocation5 + $0x20] ss:$12 sps:$4 sm:$0xff]  }
 0x12a   : > { %1988 = vmatpush3.bf16.msra.mxu1 %v2324_v36  ;;  %v2326_v39 = vld [vmem:[#allocation5 + $0x38] ss:$12 sps:$4 sm:$0xff]   ;;  %v2327_v40 = vld [vmem:[#allocation5 + $0x50] ss:$12 sps:$4 sm:$0xff]   ;;  %v2328_v41 = vld [vmem:[#allocation5 + $0x68] ss:$12 sps:$4 sm:$0xff]  }
 0x12b   : > { %v541_v23 = vrot.slane %v3154_v21, %v540_v20  ;;  %v545_v25 = vrot.slane %v3154_v21, %v544_v22  ;;  %1989 = vmatprep.subr.bf16.mxu1 %v2738_v37  ;;  %v2329_v42 = vld [vmem:[#allocation5 + $0x80] ss:$12 sps:$4 sm:$0xff]   ;;  %v2330_v48 = vld [vmem:[#allocation5 + $0x98] ss:$12 sps:$4 sm:$0xff]   ;;  %v2331_v52 = vld [vmem:[#allocation5 + $0xb0] ss:$12 sps:$4 sm:$0xff]  }
 0x12c   : > { %692 = vmatpush1.bf16.msra.mxu0 %v2307_v6  ;;  %vm2739_vm0 = vmmov 0   ;;  %vm976_vm1 = vcmask 261120   ;;  %v548_v36 = vsub.s32 2, %v3151_v19  ;;  %vm1194_vm3 = vcmask 130048   ;;  %s1885_s25 = sshll.u32 %s3115_s28, 4  ;;  %s500_s1 = scalar_lea.vmem [#allocation17], %s1878_s11 }
 0x12d   : > { %693 = vmatprep.subr.bf16.mxu0 %v2308_v7  ;;  %2003 = vmatprep.mubr.msk.bf16.mxu1 %vm2739_vm0, %v2738_v37  ;;  %vm1489_vm5 = vcmask 523264   ;;  %vm1492_vm6 = vcmask 785408   ;;  %s457_s13 = scalar_lea.vmem [#allocation16], %s1885_s25  ;;  %s1691_s19 = sshll.u32 %s500_s1, 4  ;;  %s3297_s19 = int_to_ptr.vmem [resolvable:$true] %s1691_s19 }
 0x12e   : > { %1990 = vmatpush3.bf16.msra.mxu1 %v2325_v38  ;;  %v549_v38 = vrot.slane %v3154_v21, %v548_v36  ;;  %s1943_s26 = sshll.u32 %s2813_s15, 7  ;;  %s3414_s18 = sld [smem:[#allocation32_spill]] }
 0x12f   : > { %1991 = vmatprep.subr.bf16.mxu1 %v2738_v37  ;;  %s1678_s24 = scalar_lea.sflag [#allocation4], %s3115_s28  ;;  %s2635_s17 = scalar_lea.vmem %s3297_s19, 128 }
 0x130   : > { %694 = vmatpush1.bf16.msra.mxu0 %v2310_v8  ;;  %p2636_p5 = scmp.ne.s32.totalorder %s3297_s19, %s2635_s17  ;;  %p3415_p7 = scmp.ne.s32.totalorder %s3393_s29, 0 }
 0x131   : > { %695 = vmatprep.subr.bf16.mxu0 %v2311_v9  ;;  %s2740_s15 = smov [#allocation17]  }
 0x132   : > { %1992 = vmatpush3.bf16.msra.mxu1 %v2326_v39  ;;  %p2637_p10 = pnand %p2636_p5, %p3415_p7  ;;  %s2639_s11 = sshll.u32 %s2740_s15, 4  ;;  %s2640_s11 = int_to_ptr.vmem [resolvable:$false] %s2639_s11 }
 0x133   : > { %1993 = vmatprep.subr.bf16.mxu1 %v2738_v37  ;;  %s2641_s23 = scalar_lea.vmem %s2640_s11, 256  ;;  %p2642_p9 = scmp.lt.s32.totalorder %s3297_s19, %s2640_s11 }
 0x134   : > { %696 = vmatpush1.bf16.msra.mxu0 %v2313_v10  ;;  %s3302_s9 = scalar_lea.hbm %s3414_s18, %s1943_s26  ;;  %p2638_p3 = pneg %p2637_p10 }
 0x135   : > { %697 = vmatprep.subr.bf16.mxu0 %v2314_v11  ;;  %p2643_p4 = scmp.lt.s32.totalorder %s2641_s23, %s2635_s17 }
 0x136   : > { %1994 = vmatpush3.bf16.msra.mxu1 %v2327_v40 }
 0x137   : > { %1995 = vmatprep.subr.bf16.mxu1 %v2738_v37  ;;  %p2644_p11 = por %p2643_p4, %p2642_p9 }
 0x138   : > { %698 = vmatpush1.bf16.msra.mxu0 %v2316_v12 }
 0x139   : > { %699 = vmatprep.subr.bf16.mxu0 %v2317_v13  ;;  %p2645_p13 = pnand %p2644_p11, %p2638_p3 }
 0x13a   : > { %1996 = vmatpush3.bf16.msra.mxu1 %v2328_v41 }
 0x13b   : > { %1997 = vmatprep.subr.bf16.mxu1 %v2738_v37 }
 0x13c   : > { %700 = vmatpush1.bf16.msra.mxu0 %v2319_v14 }
 0x13d   : > { %701 = vmatprep.subr.bf16.mxu0 %v2320_v15 }
 0x13e   : > { %1998 = vmatpush3.bf16.msra.mxu1 %v2329_v42 }
 0x13f   : > { %1999 = vmatprep.subr.bf16.mxu1 %v2738_v37 }
 0x140   : > { %702 = vmatpush1.bf16.msra.mxu0 %v2322_v16 }
 0x141   : > { %2039 = vmatprep.subr.bf16.mxu0 %v2738_v37 }
 0x142   : > { %2000 = vmatpush3.bf16.msra.mxu1 %v2330_v48  ;;  %v1916_v48 = vld [vmem:[%s448_s20] ss:$0 sm:$0xff] }
 0x143   : > { %720 = vmatmul.mubr.bf16.vlgmr.msra.gmra.mrb[0].mxu0 %v3147_v17  ;;  %2001 = vmatprep.subr.bf16.mxu1 %v2738_v37 }
 0x144   : > { %2041 = vmatprep.mubr.msk.bf16.mxu0 %vm2739_vm0, %v2738_v37 }
 0x146   : > { %2002 = vmatpush3.bf16.msra.mxu1 %v2331_v52 }
 0x147   : > { %2007 = vmatprep.subr.bf16.mxu1 %v2738_v37 }
 0x149   : > { %2004 = vmatmul.mubr.bf16.vlgmr.msra.gmra.mrb[0].mxu1 %v3147_v17 }
 0x14a   : > { %2011 = vmatprep.mubr.msk.bf16.mxu1 %vm2739_vm0, %v2738_v37 }
 0x216   : > { %v721_v24 = vpop.f32.mrb[0].mxu0 }
 0x217   : > { %v723_v26 = vpop.f32.mrb[1].mxu0  ;;  %v3159_v28 = vadd.f32 %v721_v24, %v541_v23 }
 0x218   : > { %v725_v27 = vpop.f32.mrb[2].mxu0  ;;  %v724_v31 = vadd.f32 %v723_v26, %v545_v25 }
 0x219   : > { %v3161_v29 = vadd.f32 %v725_v27, %v541_v23  ;;  %v727_v30 = vpop.f32.mrb[3].mxu0 }
 0x21a   : > { %v728_v32 = vadd.f32 %v727_v30, %v545_v25 }
 0x21b   : > { %v791_v33 = vpack.c.bf16 %v3161_v29, %v3159_v28  ;;  %v2223_v34 = vpack.i.bf16 %v3161_v29, %v3159_v28 }
 0x21c   : > { %v2213_v35 = vpack.i.bf16 %v728_v32, %v724_v31  ;;  %v764_v39 = vpop.f32.mrb[0].mxu1 }
 0x21d   : > { %2224 = vrot.lane.b32.xlu1 %v2223_v34, %s2735_s21  ;;  %v765_v40 = vadd.f32 %v764_v39, %v549_v38  ;;  %v2005_v41 = vpop.f32.mrb[1].mxu1 }
 0x21e   : > { %2214 = vrot.lane.b32.xlu0 %v2213_v35, %s2735_s21  ;;  %v767_v42 = vpop.f32.mrb[2].mxu1 }
 0x221   : > { %2229 = vrot.lane.b32.xlu1 %v2213_v35, %s2736_s7 }
 0x222   : > { %2219 = vrot.lane.b32.xlu0 %v2213_v35, %s2737_s14 }
 0x225   : > { %2258 = vrot.lane.b32.xlu1 %v2223_v34, %s2737_s14 }
 0x229   : > { %2263 = vrot.lane.b32.xlu1 %v2223_v34, %s2736_s7 }
 0x28f   : > { %v2225_v50 = vpop.permute.xlu1 %2224 }
 0x290   : > { %v2215_v43 = vpop.permute.xlu0 %2214  ;;  %v2227_v13 = vunpack.i.h.bf16 %v2225_v50  ;;  %v2226_v14 = vunpack.i.l.bf16 %v2225_v50  ;;  %v1177_v50 = vadd.s32 8, %v3151_v19 }
 0x291   : > { %v2216_v44 = vunpack.i.l.bf16 %v2215_v43  ;;  %v2217_v45 = vunpack.i.h.bf16 %v2215_v43  ;;  %v768_v43 = vadd.f32 %v767_v42, %v549_v38 }
 0x292   : > { %v792_v22 = vpack.c.bf16 %v2227_v13, %v2226_v14 }
 0x293   : > { %v2233_v46 = vpack.i.bf16 %v2216_v44, %v724_v31  ;;  %v2235_v51 = vpack.i.bf16 %v2217_v45, %v728_v32  ;;  %v2230_v54 = vpop.permute.xlu1 %2229  ;;  %v2006_v44 = vpop.f32.mrb[3].mxu1  ;;  %v971_v45 = vpack.c.bf16 %v768_v43, %v765_v40 }
 0x294   : > { %v2220_v47 = vpop.permute.xlu0 %2219  ;;  %v2231_v55 = vunpack.i.l.bf16 %v2230_v54  ;;  %v2232_v56 = vunpack.i.h.bf16 %v2230_v54 }
 0x295   : > { %2234 = vxpose.xlu0.b32.start [1/2] (short) (narrow) %v2233_v46, 32  ;;  %v2221_v49 = vunpack.i.l.bf16 %v2220_v47  ;;  %v2222_v53 = vunpack.i.h.bf16 %v2220_v47  ;;  %2040 = vmatpush3.bf16.msra.mxu0 %v971_v45  ;;  %v3217_v46 = vpack.i.bf16 %v768_v43, %v765_v40  ;;  %v1179_v47 = vand.u32 127, %v538_v18 }
 0x296   : > { %2051 = vmatprep.subr.bf16.mxu0 %v2738_v37 }
 0x297   : > { %873 = vxpose.xlu1.b32.start [1/2] (short) (narrow) %v2221_v49, 32  ;;  %v2259_v57 = vpop.permute.xlu1 %2258  ;;  %vm1180_vm2 = vcmp.gt.s32.totalorder %v1179_v47, %v3151_v19  ;;  %vm1181_vm4 = vcmp.gt.s32.totalorder %v1179_v47, %v1177_v50 }
 0x298   : > { %v2261_v26 = vunpack.i.h.bf16 %v2259_v57  ;;  %v2260_v27 = vunpack.i.l.bf16 %v2259_v57 }
 0x299   : > { %2236 = vxpose.xlu0.b32.end [2/2] (short) (narrow) %v2235_v51, 32 }
 0x29a   : > { %v793_v30 = vpack.c.bf16 %v2261_v26, %v2260_v27 }
 0x29b   : > { %874 = vxpose.xlu1.b32.end [2/2] (short) (narrow) %v2222_v53, 32  ;;  %v2264_v62 = vpop.permute.xlu1 %2263 }
 0x29c   : > { %v2265_v34 = vunpack.i.l.bf16 %v2264_v62 }
 0x2a2   : > { %911 = vxpose.xlu0.b32.start [1/2] (short) (narrow) %v2231_v55, 32 }
 0x2a6   : > { %912 = vxpose.xlu0.b32.end [2/2] (short) (narrow) %v2232_v56, 32 }
 0x2b9   : > { %2298 = vset.pattern.permute.xlu1 %v2734_v0 }
 0x2cf   : > { %2297 = vset.pattern.permute.xlu0 %v2734_v0 }
 0x315   : > { %v2237_v58 = vpop.trf.xlu0 }
 0x316   : > { %v2238_v60 = vunpack.i.l.bf16 %v2237_v58  ;;  %v2241_v0 = vunpack.i.h.bf16 %v2237_v58 }
 0x317   : > { %v889_v2 = vpop.trf.xlu1 }
 0x319   : > { %v2242_v59 = vpop.trf.xlu0 }
 0x31a   : > { %v2243_v61 = vunpack.i.l.bf16 %v2242_v59  ;;  %v2246_v6 = vunpack.i.h.bf16 %v2242_v59 }
 0x31b   : > { %v890_v8 = vpop.trf.xlu1 }
 0x31c   : > { %v943_v63 = vpack.c.bf16 %v2243_v61, %v2238_v60  ;;  %v945_v11 = vpack.c.bf16 %v2246_v6, %v2241_v0  ;;  %v947_v23 = vpack.c.bf16 %v890_v8, %v889_v2 }
 0x31d   : > { %v2247_v1 = vpop.trf.xlu0 }
 0x31e   : > { %2008 = vmatpush3.bf16.msra.mxu1 %v943_v63  ;;  %v2248_v4 = vunpack.i.l.bf16 %v2247_v1  ;;  %v2251_v12 = vunpack.i.h.bf16 %v2247_v1 }
 0x31f   : > { %2009 = vmatprep.subr.bf16.mxu1 %v2738_v37  ;;  %v891_v15 = vpop.trf.xlu1 }
 0x321   : > { %v2252_v3 = vpop.trf.xlu0 }
 0x322   : > { %v2253_v5 = vunpack.i.l.bf16 %v2252_v3  ;;  %v2256_v10 = vunpack.i.h.bf16 %v2252_v3 }
 0x323   : > { %v892_v24 = vpop.trf.xlu1 }
 0x324   : > { %v944_v7 = vpack.c.bf16 %v2253_v5, %v2248_v4  ;;  %v946_v20 = vpack.c.bf16 %v2256_v10, %v2251_v12  ;;  %v948_v28 = vpack.c.bf16 %v892_v24, %v891_v15 }
 0x325   : > { %v927_v9 = vpop.trf.xlu0 }
 0x326   : > { %2010 = vmatpush3.bf16.msra.mxu1 %v944_v7 }
 0x327   : > { %2015 = vmatprep.subr.bf16.mxu1 %v2738_v37 }
 0x329   : > { %2012 = vmatmul.mubr.msk.bf16.vlgmr.msra.gmra.mrb[4].mxu1 %vm976_vm1, %v791_v33  ;;  %v928_v16 = vpop.trf.xlu0  ;;  %v2266_v33 = vunpack.i.h.bf16 %v2264_v62 }
 0x32a   : > { %2016 = vmatpush3.bf16.msra.mxu1 %v945_v11  ;;  %2019 = vmatprep.mubr.msk.bf16.mxu1 %vm2739_vm0, %v2738_v37  ;;  %v949_v29 = vpack.c.bf16 %v928_v16, %v927_v9 }
 0x32b   : > { %2017 = vmatprep.subr.bf16.mxu1 %v2738_v37  ;;  %v794_v35 = vpack.c.bf16 %v2266_v33, %v2265_v34 }
 0x32d   : > { %v929_v25 = vpop.trf.xlu0 }
 0x32e   : > { %2018 = vmatpush3.bf16.msra.mxu1 %v946_v20 }
 0x32f   : > { %2023 = vmatprep.subr.bf16.mxu1 %v2738_v37 }
 0x331   : > { %2020 = vmatmul.mubr.msk.bf16.vlgmr.msra.gmra.mrb[8].mxu1 %vm976_vm1, %v792_v22  ;;  %v930_v31 = vpop.trf.xlu0 }
 0x332   : > { %2024 = vmatpush3.bf16.msra.mxu1 %v947_v23  ;;  %2027 = vmatprep.mubr.msk.bf16.mxu1 %vm2739_vm0, %v2738_v37  ;;  %v950_v32 = vpack.c.bf16 %v930_v31, %v929_v25 }
 0x333   : > { %2025 = vmatprep.subr.bf16.mxu1 %v2738_v37 }
 0x336   : > { %2026 = vmatpush3.bf16.msra.mxu1 %v948_v28 }
 0x337   : > { %2031 = vmatprep.subr.bf16.mxu1 %v2738_v37 }
 0x339   : > { %2028 = vmatmul.mubr.msk.bf16.vlgmr.msra.gmra.mrb[12].mxu1 %vm976_vm1, %v793_v30 }
 0x33a   : > { %2032 = vmatpush3.bf16.msra.mxu1 %v949_v29  ;;  %2035 = vmatprep.mubr.msk.bf16.mxu1 %vm2739_vm0, %v2738_v37 }
 0x33b   : > { %2033 = vmatprep.subr.bf16.mxu1 %v2738_v37 }
 0x33e   : > { %2034 = vmatpush3.bf16.msra.mxu1 %v950_v32 }
 0x33f   : > { %2045 = vmatprep.subr.bf16.mxu1 %v2738_v37 }
 0x341   : > { %2036 = vmatmul.mubr.msk.bf16.vlgmr.msra.gmra.mrb[16].mxu1 %vm976_vm1, %v794_v35 }
 0x342   : > { %2047 = vmatprep.mubr.msk.bf16.mxu1 %vm2739_vm0, %v2738_v37 }
 0x3fc   : > { %v1014_v49 = vpop.f32.mrb[4].mxu1 }
 0x3fd   : > { %v1153_v21 = vmul.f32 0.17677669, %v1014_v49  ;;  %v2013_v51 = vpop.f32.mrb[5].mxu1 }
 0x3fe   : > { %v1017_v52 = vpop.f32.mrb[6].mxu1 }
 0x3ff   : > { %v1167_v53 = vadd.f32 %v1916_v48, %v1153_v21  ;;  %v1154_v54 = vmul.f32 0.17677669, %v1017_v52  ;;  %v2014_v55 = vpop.f32.mrb[7].mxu1 }
 0x401   : > { %v1168_v56 = vadd.f32 %v1916_v48, %v1154_v54  ;;  %v1186_v57 = vsel %vm1180_vm2, -1e+30, %v1167_v53 }
 0x402   : > { %v1195_v18 = vsel %vm1194_vm3, %v1186_v57, -inf }
 0x403   : > { %1196 = vmax.xlane.f32.xlu0 %v1195_v18  ;;  %v1187_v58 = vsel %vm1181_vm4, -1e+30, %v1168_v56 }
 0x404   : > { %v1058_v59 = vpop.f32.mrb[8].mxu1  ;;  %v1198_v60 = vsel %vm1194_vm3, %v1187_v58, -inf }
 0x405   : > { %v1155_v61 = vmul.f32 0.17677669, %v1058_v59  ;;  %1199 = vmax.xlane.f32.xlu1 %v1198_v60  ;;  %v2021_v62 = vpop.f32.mrb[9].mxu1 }
 0x406   : > { %v1061_v63 = vpop.f32.mrb[10].mxu1 }
 0x407   : > { %v1169_v1 = vadd.f32 %v1916_v48, %v1155_v61  ;;  %v1156_v2 = vmul.f32 0.17677669, %v1061_v63  ;;  %v2022_v3 = vpop.f32.mrb[11].mxu1 }
 0x409   : > { %v1170_v4 = vadd.f32 %v1916_v48, %v1156_v2  ;;  %v1188_v5 = vsel %vm1180_vm2, -1e+30, %v1169_v1 }
 0x40a   : > { %v1201_v6 = vsel %vm1194_vm3, %v1188_v5, -inf }
 0x40b   : > { %1202 = vmax.xlane.f32.xlu0 %v1201_v6  ;;  %v1189_v7 = vsel %vm1181_vm4, -1e+30, %v1170_v4 }
 0x40c   : > { %v1102_v8 = vpop.f32.mrb[12].mxu1  ;;  %v1204_v9 = vsel %vm1194_vm3, %v1189_v7, -inf }
 0x40d   : > { %v1157_v0 = vmul.f32 0.17677669, %v1102_v8  ;;  %1205 = vmax.xlane.f32.xlu1 %v1204_v9  ;;  %v2029_v10 = vpop.f32.mrb[13].mxu1 }
 0x40e   : > { %v1105_v11 = vpop.f32.mrb[14].mxu1 }
 0x40f   : > { %v1171_v12 = vadd.f32 %v1916_v48, %v1157_v0  ;;  %v1158_v13 = vmul.f32 0.17677669, %v1105_v11  ;;  %v2030_v14 = vpop.f32.mrb[15].mxu1 }
 0x411   : > { %v1172_v15 = vadd.f32 %v1916_v48, %v1158_v13  ;;  %v1190_v16 = vsel %vm1180_vm2, -1e+30, %v1171_v12 }
 0x412   : > { %v1207_v20 = vsel %vm1194_vm3, %v1190_v16, -inf }
 0x413   : > { %1208 = vmax.xlane.f32.xlu0 %v1207_v20  ;;  %v1191_v22 = vsel %vm1181_vm4, -1e+30, %v1172_v15 }
 0x414   : > { %v1146_v23 = vpop.f32.mrb[16].mxu1  ;;  %v1210_v24 = vsel %vm1194_vm3, %v1191_v22, -inf }
 0x415   : > { %v1159_v25 = vmul.f32 0.17677669, %v1146_v23  ;;  %1211 = vmax.xlane.f32.xlu1 %v1210_v24  ;;  %v2037_v26 = vpop.f32.mrb[17].mxu1 }
 0x416   : > { %v1149_v27 = vpop.f32.mrb[18].mxu1 }
 0x417   : > { %v1173_v28 = vadd.f32 %v1916_v48, %v1159_v25  ;;  %v1160_v29 = vmul.f32 0.17677669, %v1149_v27  ;;  %v2038_v30 = vpop.f32.mrb[19].mxu1 }
 0x419   : > { %v1174_v31 = vadd.f32 %v1916_v48, %v1160_v29  ;;  %v1192_v32 = vsel %vm1180_vm2, -1e+30, %v1173_v28 }
 0x41a   : > { %v1213_v33 = vsel %vm1194_vm3, %v1192_v32, -inf }
 0x41b   : > { %1214 = vmax.xlane.f32.xlu0 %v1213_v33  ;;  %v1193_v34 = vsel %vm1181_vm4, -1e+30, %v1174_v31 }
 0x41c   : > { %v1216_v35 = vsel %vm1194_vm3, %v1193_v34, -inf }
 0x41d   : > { %1217 = vmax.xlane.f32.xlu1 %v1216_v35 }
 0x490   : > { %v1197_v36 = vpop.xlane.xlu0 %1196 }
 0x491   : > { %v1219_v38 = vsub.f32 %v1186_v57, %v1197_v36 }
 0x492   : > { %v1200_v39 = vpop.xlane.xlu1 %1199 }
 0x493   : > { %v1227_v40 = vmul.f32 1.442695, %v1219_v38  ;;  %v1220_v41 = vsub.f32 %v1187_v58, %v1200_v39 }
 0x495   : > { %2341 = vpow2.f32 %v1227_v40  ;;  %v1229_v42 = vmul.f32 1.442695, %v1220_v41 }
 0x497   : > { %2343 = vpow2.f32 %v1229_v42 }
 0x498   : > { %v1203_v43 = vpop.xlane.xlu0 %1202 }
 0x499   : > { %v1221_v44 = vsub.f32 %v1188_v5, %v1203_v43 }
 0x49a   : > { %v1206_v19 = vpop.xlane.xlu1 %1205 }
 0x49b   : > { %v1231_v45 = vmul.f32 1.442695, %v1221_v44  ;;  %v1222_v48 = vsub.f32 %v1189_v7, %v1206_v19 }
 0x49d   : > { %2345 = vpow2.f32 %v1231_v45  ;;  %v1233_v49 = vmul.f32 1.442695, %v1222_v48 }
 0x49f   : > { %v2342_v47 = vpop.eup %2341  ;;  %2347 = vpow2.f32 %v1233_v49 }
 0x4a0   : > { %v1209_v50 = vpop.xlane.xlu0 %1208  ;;  %v1243_v21 = vsel %vm1194_vm3, %v2342_v47, 0.0 }
 0x4a1   : > { %v2344_v51 = vpop.eup %2343  ;;  %v1223_v52 = vsub.f32 %v1190_v16, %v1209_v50  ;;  %1244 = vadd.xlane.f32.xlu0 %v1243_v21 }
 0x4a2   : > { %v1212_v53 = vpop.xlane.xlu1 %1211  ;;  %v1246_v54 = vsel %vm1194_vm3, %v2344_v51, 0.0 }
 0x4a3   : > { %v1235_v55 = vmul.f32 1.442695, %v1223_v52  ;;  %v1224_v56 = vsub.f32 %v1191_v22, %v1212_v53  ;;  %1247 = vadd.xlane.f32.xlu1 %v1246_v54 }
 0x4a5   : > { %2349 = vpow2.f32 %v1235_v55  ;;  %v1237_v57 = vmul.f32 1.442695, %v1224_v56 }
 0x4a7   : > { %v3247_v18 = vpop.eup %2345  ;;  %2351 = vpow2.f32 %v1237_v57 }
 0x4a8   : > { %v1215_v58 = vpop.xlane.xlu0 %1214  ;;  %v1249_v59 = vsel %vm1194_vm3, %v3247_v18, 0.0 }
 0x4a9   : > { %v2348_v60 = vpop.eup %2347  ;;  %v1225_v61 = vsub.f32 %v1192_v32, %v1215_v58  ;;  %1250 = vadd.xlane.f32.xlu0 %v1249_v59  ;;  %v2333_v58 = vld [vmem:[#allocation8 + $0x8] sm:$0xff]  }
 0x4aa   : > { %v1252_v62 = vsel %vm1194_vm3, %v2348_v60, 0.0  ;;  %v1218_v7 = vpop.xlane.xlu1 %1217 }
 0x4ab   : > { %v1239_v63 = vmul.f32 1.442695, %v1225_v61  ;;  %1253 = vadd.xlane.f32.xlu1 %v1252_v62  ;;  %v1226_v8 = vsub.f32 %v1193_v34, %v1218_v7  ;;  %v2335_v7 = vld [vmem:[#allocation8 + $0x18] sm:$0xff]  }
 0x4ad   : > { %2353 = vpow2.f32 %v1239_v63  ;;  %v1241_v9 = vmul.f32 1.442695, %v1226_v8  ;;  %v2334_v63 = vld [vmem:[#allocation8 + $0x10] sm:$0xff]   ;;  %v2336_v8 = vld [vmem:[#allocation8 + $0x20] sm:$0xff]  }
 0x4af   : > { %v2350_v1 = vpop.eup %2349  ;;  %2355 = vpow2.f32 %v1241_v9  ;;  %v2337_v9 = vld [vmem:[#allocation8 + $0x28] sm:$0xff]  }
 0x4b0   : > { %v1255_v2 = vsel %vm1194_vm3, %v2350_v1, 0.0 }
 0x4b1   : > { %v2352_v3 = vpop.eup %2351  ;;  %1256 = vadd.xlane.f32.xlu0 %v1255_v2 }
 0x4b2   : > { %v1258_v4 = vsel %vm1194_vm3, %v2352_v3, 0.0 }
 0x4b3   : > { %1259 = vadd.xlane.f32.xlu1 %v1258_v4 }
 0x4b7   : > { %v3254_v5 = vpop.eup %2353 }
 0x4b8   : > { %v1261_v6 = vsel %vm1194_vm3, %v3254_v5, 0.0 }
 0x4b9   : > { %1262 = vadd.xlane.f32.xlu0 %v1261_v6  ;;  %v2356_v0 = vpop.eup %2355 }
 0x4ba   : > { %v1264_v10 = vsel %vm1194_vm3, %v2356_v0, 0.0 }
 0x4c4   : > { %2273 = vrot.lane.b32.xlu1 %v3217_v46, %s2737_s14 }
 0x4cf   : > { %2268 = vrot.lane.b32.xlu0 %v3217_v46, %s2735_s21 }
 0x4e8   : > { %1265 = vadd.xlane.f32.xlu1 %v1264_v10  ;;  %v2339_v10 = vld [vmem:[#allocation8 + $0x38] sm:$0xff]  }
 0x4f9   : > { %2278 = vrot.lane.b32.xlu1 %v3217_v46, %s2736_s7 }
 0x52e   : > { %v1245_v11 = vpop.xlane.xlu0 %1244 }
 0x52f   : > { %2357 = vrcp.f32 %v1245_v11 }
 0x530   : > { %v1248_v12 = vpop.xlane.xlu1 %1247 }
 0x531   : > { %2359 = vrcp.f32 %v1248_v12 }
 0x536   : > { %v1251_v14 = vpop.xlane.xlu0 %1250 }
 0x538   : > { %v1254_v16 = vpop.xlane.xlu1 %1253 }
 0x539   : > { %v2358_v13 = vpop.eup %2357  ;;  %2361 = vrcp.f32 %v1254_v16 }
 0x53a   : > { %v1275_v20 = vmul.f32 %v2358_v13, %v2342_v47 }
 0x53b   : > { %v2360_v15 = vpop.eup %2359 }
 0x53c   : > { %v1276_v22 = vmul.f32 %v2360_v15, %v2344_v51 }
 0x53e   : > { %v1257_v23 = vpop.xlane.xlu0 %1256  ;;  %v1283_v24 = vpack.c.bf16 %v1276_v22, %v1275_v20 }
 0x53f   : > { %2363 = vrcp.f32 %v1257_v23 }
 0x540   : > { %2365 = vrcp.f32 %v1251_v14  ;;  %2042 = vmatmul.mubr.msk.bf16.vlgmr.msra.gmra.mrb[4].mxu0 %vm1194_vm3, %v1283_v24  ;;  %v1260_v25 = vpop.xlane.xlu1 %1259 }
 0x541   : > { %2367 = vrcp.f32 %v1260_v25  ;;  %2053 = vmatprep.mubr.msk.bf16.mxu0 %vm2739_vm0, %v2738_v37 }
 0x543   : > { %v2362_v30 = vpop.eup %2361 }
 0x544   : > { %v2274_v46 = vpop.permute.xlu1 %2273  ;;  %v1278_v38 = vmul.f32 %v2362_v30, %v2348_v60 }
 0x545   : > { %v2276_v26 = vunpack.i.h.bf16 %v2274_v46  ;;  %v2275_v27 = vunpack.i.l.bf16 %v2274_v46 }
 0x546   : > { %v1263_v28 = vpop.xlane.xlu0 %1262 }
 0x547   : > { %v973_v29 = vpack.c.bf16 %v2276_v26, %v2275_v27  ;;  %2369 = vrcp.f32 %v1263_v28 }
 0x549   : > { %v2364_v31 = vpop.eup %2363  ;;  %2052 = vmatpush3.bf16.msra.mxu0 %v973_v29 }
 0x54a   : > { %v2366_v32 = vpop.eup %2365  ;;  %v2269_v33 = vpop.permute.xlu0 %2268  ;;  %2063 = vmatprep.subr.bf16.mxu0 %v2738_v37  ;;  %v1279_v39 = vmul.f32 %v2364_v31, %v2350_v1 }
 0x54b   : > { %v2368_v34 = vpop.eup %2367  ;;  %v2271_v35 = vunpack.i.h.bf16 %v2269_v33  ;;  %v2270_v36 = vunpack.i.l.bf16 %v2269_v33  ;;  %v1277_v42 = vmul.f32 %v2366_v32, %v3247_v18  ;;  %v2332_v18 = vld [vmem:[#allocation8] sm:$0xff]  }
 0x54c   : > { %v1280_v40 = vmul.f32 %v2368_v34, %v2352_v3  ;;  %v1921_v34 = vld [vmem:[#allocation10] ss:$0 sm:$0xff] }
 0x54d   : > { %v972_v41 = vpack.c.bf16 %v2271_v35, %v2270_v36  ;;  %v1284_v44 = vpack.c.bf16 %v1278_v38, %v1277_v42  ;;  %v1608_v35 = vunpack.c.l.bf16 %v3147_v17 }
 0x54e   : > { %v1285_v43 = vpack.c.bf16 %v1280_v40, %v1279_v39  ;;  %v1609_v40 = vunpack.c.h.bf16 %v3147_v17 }
 0x54f   : > { %2046 = vmatpush3.bf16.msra.mxu1 %v972_v41 }
 0x550   : > { %2054 = vmatmul.mubr.msk.bf16.vlgmr.msra.gmra.mrb[8].mxu0 %vm1194_vm3, %v1285_v43  ;;  %2057 = vmatprep.subr.bf16.mxu1 %v2738_v37 }
 0x551   : > { %2079 = vmatprep.mubr.msk.bf16.mxu0 %vm2739_vm0, %v2738_v37  ;;  %v2370_v50 = vpop.eup %2369  ;;  %2064 = vmatpush3.bf16.msra.mxu0 %v2332_v18 }
 0x552   : > { %2048 = vmatmul.mubr.msk.bf16.vlgmr.msra.gmra.mrb[20].mxu1 %vm1194_vm3, %v1284_v44  ;;  %v1281_v51 = vmul.f32 %v2370_v50, %v3254_v5  ;;  %2065 = vmatprep.subr.bf16.mxu0 %v2738_v37 }
 0x553   : > { %2059 = vmatprep.mubr.msk.bf16.mxu1 %vm2739_vm0, %v2738_v37 }
 0x555   : > { %2066 = vmatpush3.bf16.msra.mxu0 %v2333_v58 }
 0x556   : > { %2067 = vmatprep.subr.bf16.mxu0 %v2738_v37 }
 0x559   : > { %2068 = vmatpush3.bf16.msra.mxu0 %v2334_v63 }
 0x55a   : > { %2069 = vmatprep.subr.bf16.mxu0 %v2738_v37 }
 0x55d   : > { %2070 = vmatpush3.bf16.msra.mxu0 %v2335_v7 }
 0x55e   : > { %2071 = vmatprep.subr.bf16.mxu0 %v2738_v37 }
 0x561   : > { %2072 = vmatpush3.bf16.msra.mxu0 %v2336_v8 }
 0x562   : > { %2073 = vmatprep.subr.bf16.mxu0 %v2738_v37 }
 0x565   : > { %2074 = vmatpush3.bf16.msra.mxu0 %v2337_v9 }
 0x566   : > { %2075 = vmatprep.subr.bf16.mxu0 %v2738_v37 }
 0x575   : > { %v1266_v19 = vpop.xlane.xlu1 %1265 }
 0x576   : > { %2371 = vrcp.f32 %v1266_v19 }
 0x579   : > { %v2279_v45 = vpop.permute.xlu1 %2278 }
 0x57a   : > { %v2281_v48 = vunpack.i.h.bf16 %v2279_v45  ;;  %v2280_v49 = vunpack.i.l.bf16 %v2279_v45  ;;  %v1613_v45 = vld [vmem:[%s457_s13 + $0x8] sm:$0xff] }
 0x57c   : > { %v974_v47 = vpack.c.bf16 %v2281_v48, %v2280_v49 }
 0x57e   : > { %2058 = vmatpush3.bf16.msra.mxu1 %v974_v47 }
 0x580   : > { %v2372_v21 = vpop.eup %2371 }
 0x581   : > { %v1282_v52 = vmul.f32 %v2372_v21, %v2356_v0  ;;  %v2338_v0 = vld [vmem:[#allocation8 + $0x30] sm:$0xff]  }
 0x582   : > { %2076 = vmatpush3.bf16.msra.mxu0 %v2338_v0 }
 0x583   : > { %v1286_v53 = vpack.c.bf16 %v1282_v52, %v1281_v51  ;;  %2077 = vmatprep.subr.bf16.mxu0 %v2738_v37 }
 0x585   : > { %2060 = vmatmul.mubr.msk.bf16.vlgmr.msra.gmra.mrb[24].mxu1 %vm1194_vm3, %v1286_v53  ;;  %v1612_v53 = vld [vmem:[%s457_s13] sm:$0xff] }
 0x586   : > { %2078 = vmatpush3.bf16.msra.mxu0 %v2339_v10 }
 0x613   : > { %v1324_v54 = vpop.f32.mrb[4].mxu0 }
 0x614   : > { %v2043_v55 = vpop.f32.mrb[5].mxu0 }
 0x615   : > { %v1327_v56 = vpop.f32.mrb[6].mxu0 }
 0x616   : > { %v2044_v57 = vpop.f32.mrb[7].mxu0 }
 0x623   : > { %v1412_v59 = vpop.f32.mrb[8].mxu0 }
 0x624   : > { %v2055_v60 = vpop.f32.mrb[9].mxu0 }
 0x625   : > { %v1368_v61 = vpop.f32.mrb[20].mxu1  ;;  %v1415_v62 = vpop.f32.mrb[10].mxu0  ;;  %v1930_v60 = vld [vmem:[#allocation11] ss:$0 sm:$0xff] }
 0x626   : > { %v2287_v1 = vpack.i.bf16 %v1415_v62, %v1412_v59  ;;  %v2049_v2 = vpop.f32.mrb[21].mxu1  ;;  %v2056_v3 = vpop.f32.mrb[11].mxu0 }
 0x627   : > { %v1371_v4 = vpop.f32.mrb[22].mxu1 }
 0x628   : > { %v2282_v5 = vpack.i.bf16 %v1371_v4, %v1368_v61  ;;  %2288 = vrot.lane.b32.xlu0 %v2287_v1, %s2737_s14  ;;  %v2050_v6 = vpop.f32.mrb[23].mxu1  ;;  %v1931_v1 = vld [vmem:[#allocation13] ss:$0 sm:$0xff] }
 0x62a   : > { %2283 = vrot.lane.b32.xlu1 %v2282_v5, %s2736_s7 }
 0x658   : > { %v1456_v11 = vpop.f32.mrb[24].mxu1 }
 0x659   : > { %v2061_v12 = vpop.f32.mrb[25].mxu1 }
 0x65a   : > { %v1459_v13 = vpop.f32.mrb[26].mxu1 }
 0x65b   : > { %v2292_v14 = vpack.i.bf16 %v1459_v13, %v1456_v11  ;;  %v2062_v15 = vpop.f32.mrb[27].mxu1 }
 0x65d   : > { %2293 = vrot.lane.b32.xlu1 %v2292_v14, %s2735_s21 }
 0x69a   : > { %v2289_v23 = vpop.permute.xlu0 %2288 }
 0x69b   : > { %v2291_v46 = vunpack.i.h.bf16 %v2289_v23  ;;  %v2290_v37 = vunpack.i.l.bf16 %v2289_v23 }
 0x69c   : > { %v2284_v16 = vpop.permute.xlu1 %2283 }
 0x69d   : > { %v2286_v20 = vunpack.i.h.bf16 %v2284_v16  ;;  %v2285_v22 = vunpack.i.l.bf16 %v2284_v16 }
 0x69f   : > { %v1488_v24 = vsel %vm976_vm1, %v1327_v56, %v2286_v20  ;;  %v1487_v25 = vsel %vm976_vm1, %v1324_v54, %v2285_v22 }
 0x6a0   : > { %v1490_v29 = vsel %vm1489_vm5, %v1487_v25, %v2290_v37  ;;  %v1491_v30 = vsel %vm1489_vm5, %v1488_v24, %v2291_v46 }
 0x6cf   : > { %v2294_v26 = vpop.permute.xlu1 %2293 }
 0x6d0   : > { %v2296_v27 = vunpack.i.h.bf16 %v2294_v26  ;;  %v2295_v28 = vunpack.i.l.bf16 %v2294_v26 }
 0x6d2   : > { %v1494_v31 = vsel %vm1492_vm6, %v1491_v30, %v2296_v27  ;;  %v1493_v32 = vsel %vm1492_vm6, %v1490_v29, %v2295_v28 }
 0x6d3   : > { %v1495_v33 = vpack.c.bf16 %v1494_v31, %v1493_v32 }
 0x6d5   : > { %2080 = vmatmul.mubr.bf16.vlgmr.msra.gmra.mrb[12].mxu0 %v1495_v33 }
 0x7a8   : > { %v1601_v36 = vpop.f32.mrb[12].mxu0 }
 0x7a9   : > { %v1602_v38 = vadd.f32 %v1921_v34, %v1601_v36  ;;  %v2081_v39 = vpop.f32.mrb[13].mxu0 }
 0x7aa   : > { %v1604_v41 = vpop.f32.mrb[14].mxu0 }
 0x7ab   : > { %v1605_v42 = vadd.f32 %v1921_v34, %v1604_v41  ;;  %v2082_v43 = vpop.f32.mrb[15].mxu0  ;;  %v1614_v44 = vadd.f32 %v1608_v35, %v1602_v38 }
 0x7ad   : > { %1616 = vadd.xlane.f32.xlu0 %v1614_v44  ;;  %v1615_v19 = vadd.f32 %v1609_v40, %v1605_v42 }
 0x7af   : > { %1618 = vadd.xlane.f32.xlu1 %v1615_v19 }
 0x7c0   : > { %1662 = vperm.xlu1 %2298, %v1613_v45  }
 0x83a   : > { %v1617_v48 = vpop.xlane.xlu0 %1616 }
 0x83b   : > { %v1621_v49 = vmul.f32 0.0078125, %v1617_v48 }
 0x83c   : > { %v1619_v47 = vpop.xlane.xlu1 %1618 }
 0x83d   : > { %v1623_v50 = vsub.f32 %v1614_v44, %v1621_v49  ;;  %v1622_v21 = vmul.f32 0.0078125, %v1619_v47 }
 0x83f   : > { %v1624_v51 = vsub.f32 %v1615_v19, %v1622_v21  ;;  %v1625_v52 = vmul.f32 %v1623_v50, %v1623_v50 }
 0x840   : > { %v1663_v6 = vpop.permute.xlu1 %1662 }
 0x841   : > { %1627 = vadd.xlane.f32.xlu0 %v1625_v52  ;;  %v1626_v17 = vmul.f32 %v1624_v51, %v1624_v51 }
 0x845   : > { %1629 = vadd.xlane.f32.xlu0 %v1626_v17 }
 0x85b   : > { %1657 = vperm.xlu0 %2297, %v1612_v53  }
 0x8ce   : > { %v1628_v54 = vpop.xlane.xlu0 %1627 }
 0x8cf   : > { %v1631_v55 = vmul.f32 0.0078125, %v1628_v54 }
 0x8d1   : > { %v1633_v56 = vadd.f32 1e-05, %v1631_v55 }
 0x8d2   : > { %v1630_v57 = vpop.xlane.xlu0 %1629 }
 0x8d3   : > { %2373 = vrsqrt.f32 %v1633_v56  ;;  %v1632_v18 = vmul.f32 0.0078125, %v1630_v57 }
 0x8d5   : > { %v1634_v58 = vadd.f32 1e-05, %v1632_v18 }
 0x8d7   : > { %2375 = vrsqrt.f32 %v1634_v58 }
 0x8da   : > { %v1658_v5 = vpop.permute.xlu0 %1657 }
 0x8dd   : > { %v2374_v59 = vpop.eup %2373 }
 0x8de   : > { %v1637_v61 = vmul.f32 %v2374_v59, %v1623_v50 }
 0x8e0   : > { %v1645_v62 = vmul.f32 %v1930_v60, %v1637_v61 }
 0x8e1   : > { %v2376_v63 = vpop.eup %2375 }
 0x8e2   : > { %v1638_v2 = vmul.f32 %v2376_v63, %v1624_v51  ;;  %v1653_v3 = vadd.f32 %v1931_v1, %v1645_v62 }
 0x8e4   : > { %v1646_v4 = vmul.f32 %v1930_v60, %v1638_v2  ;;  %v1665_v8 = vmul.f32 %v1658_v5, %v1653_v3 }
 0x8e6   : > { %v1654_v7 = vadd.f32 %v1931_v1, %v1646_v4 }
 0x8e8   : > { %v1666_v9 = vmul.f32 %v1663_v6, %v1654_v7 }
 0x8ea   : > { %v1947_v0 = vpack.c.bf16 %v1666_v9, %v1665_v8 }
 0x8ec   : > { %1948 = vst [vmem:[%s500_s1] sm:$0xff] %v1947_v0  }
 0x8ed   : > { %2648 = shalt.err (!%p2645_p13)
}
 0x8ee   : > { %s2649_s5 = scalar_lea.hbm %s3302_s9, 128  ;;  %s2653_s20 = scalar_lea.hbm %s3414_s18, 256 }
 0x8ef   : > { %p2650_p6 = scmp.ne.s32.totalorder %s3302_s9, %s2649_s5  ;;  %p2654_p0 = scmp.lt.u32.totalorder %s3302_s9, %s3414_s18 }
 0x8f0   : > { %p2655_p2 = scmp.lt.u32.totalorder %s2653_s20, %s2649_s5  ;;  %p2657_p5 = scmp.lt.u32.totalorder %s2649_s5, %s3302_s9 }
 0x8f1   : > { %p2651_p1 = pnand %p2650_p6, %p3415_p7 }
 0x8f2   : > { %p2656_p8 = por %p2655_p2, %p2654_p0 }
 0x8f3   : > { %p2652_p12 = pneg %p2651_p1 }
 0x8f4   : > { %p2658_p10 = por %p2657_p5, %p2656_p8 }
 0x8f6   : > { %p2659_p3 = pnand %p2658_p10, %p2652_p12 }
 0x8f8   : > { %2662 = shalt.err (!%p2659_p3)
}
 0x8f9   : > { %s2741_s25 = smov 4  }
 0x8fa   : > { %2113 = dma.vmem_to_hbm [thread:$0]  (%p3415_p7), %s3297_s19, 128, %s3302_s9, %s1678_s24, %s2737_s14, %s2737_s14, %s2741_s25  }
 0x8fb PF: > { %s3416_s13 = sld [smem:[#allocation27_spill]]  ;;  %s1706_s1 = sand.u32 1, %s2705_s30  }
 0x8fc   : > { %p3418_p4 = scmp.ge.s32.totalorder %s2717_s12, 2  ;;  %s1707_s26 = scalar_lea.sflag [#allocation4], %s1706_s1 }
 0x901   : > { %p3417_p9 = scmp.ne.s32.totalorder %s3416_s13, 0 }
 0x903   : > { %p2145_p11 = pnand %p3418_p4, %p3417_p9 }
 0x905   : > { %2700 = dma.done.wait (!%p2145_p11), %s1707_s26, 128  }
 0x906   : > { %2702 = vsyncadd (!%p2145_p11), %s1707_s26, 4294967168  ;;  %s3419_s12 = sld [smem:[#allocation25_spill]]  ;;  %s3420_s29 = sld [smem:[#allocation24_spill]] }
 0x907   : > { %s3421_s11 = sld [smem:[#allocation26_spill]]  ;;  %s3422_s30 = smov %s2709_s10 }
 0x90c   : > { %p28_p13 = scmp.ge.s32.totalorder %s3419_s12, 4   ;;  %s3423_s10 = smov %s3420_s29 }
 0x90e   :  { %30 = sbr.rel (!%p28_p13) target bundleno = 16 (0x10), region = 149 }
 0x915   :  { %1712 = vsyncpa [#allocation3], 1 }
 0x916   :  { %1714 = vsyncpa [#allocation3 + $0x1], 1 }
 0x917   :  { %1715 = vsyncpa [#allocation6], 1 }
 0x918   :  { %1716 = vsyncpa [#allocation9], 1 }
 0x919   :  { %1717 = vsyncpa [#allocation12], 1 }
 0x91a   :  { %1718 = vsyncpa [#allocation15], 1 }
 0x91b   :  { %1720 = vsyncpa [#allocation15 + $0x1], 1 }
 0x91c   :  { %1721 = vsyncpa [#allocation4], 1 }
 0x91d   :  { %1723 = vsyncpa [#allocation4 + $0x1], 1 }

// kernel: transformer_decoder_forward.9
= control target key start
LH: loop header
LB: loop body
LE: loop exit
PB: predicated region body
PF: predicated region fallthrough
CT: control target
= control target key end

     0   :  { %s3772_s0 = inlined_call_operand.hbm [shape: bf16[2,16,128], index: 0, kind: input, shape index: {}]   ;;  %s3773_s1 = inlined_call_operand.hbm [shape: bf16[2,16,128], index: 1, kind: input, shape index: {}]   ;;  %s3774_s2 = inlined_call_operand.hbm [shape: bf16[128,128], index: 2, kind: input, shape index: {}]   ;;  %s3775_s3 = inlined_call_operand.hbm [shape: f32[1,128], index: 3, kind: input, shape index: {}]   ;;  %s3776_s4 = inlined_call_operand.hbm [shape: bf16[128,256], index: 4, kind: input, shape index: {}]   ;;  %s3777_s5 = inlined_call_operand.hbm [shape: f32[1,256], index: 5, kind: input, shape index: {}]   ;;  %s3778_s6 = inlined_call_operand.hbm [shape: bf16[128,128], index: 6, kind: input, shape index: {}]   ;;  %s3779_s7 = inlined_call_operand.hbm [shape: f32[1,128], index: 7, kind: input, shape index: {}]   ;;  %s3780_s8 = inlined_call_operand.hbm [shape: f32[1,128], index: 8, kind: input, shape index: {}]   ;;  %s3781_s9 = inlined_call_operand.hbm [shape: f32[1,128], index: 9, kind: input, shape index: {}]   ;;  %s3782_s10 = inlined_call_operand.hbm [shape: f32[2,1,16], index: 10, kind: input, shape index: {}]   ;;  %s3783_s11 = inlined_call_operand.hbm [shape: f32[2,16,1], index: 11, kind: input, shape index: {}]   ;;  %s3784_s12 = inlined_call_operand.hbm [shape: bf16[2,16,128], index: 12, kind: output, shape index: {}]  }
   0x1   :  { %3815 = sst [smem:[#allocation39_spill]] %s3772_s0 }
   0x2   :  { %3816 = sst [smem:[#allocation40_spill]] %s3773_s1 }
   0x3   :  { %3817 = sst [smem:[#allocation41_spill]] %s3774_s2 }
   0x4   :  { %3818 = sst [smem:[#allocation42_spill]] %s3775_s3 }
   0x5   :  { %3819 = sst [smem:[#allocation43_spill]] %s3777_s5 }
   0x6   :  { %3820 = sst [smem:[#allocation44_spill]] %s3779_s7 }
   0x7   :  { %3821 = sst [smem:[#allocation45_spill]] %s3781_s9 }
   0x8   :  { %3822 = sst [smem:[#allocation46_spill]] %s3783_s11 }
   0x9   :  { %3823 = sst [smem:[#allocation47_spill]] %s3784_s12 }
   0xa   :  { %17 = vsyncpa [#allocation3], 0 }
   0xb   :  { %19 = vsyncpa [#allocation3 + $0x1], 0 }
   0xc   :  { %20 = vsyncpa [#allocation6], 0 }
   0xd   :  { %22 = vsyncpa [#allocation6 + $0x1], 0 }
   0xe   :  { %23 = vsyncpa [#allocation9], 0 }
   0xf   :  { %24 = vsyncpa [#allocation12], 0 }
  0x10   :  { %25 = vsyncpa [#allocation15], 0 }
  0x11   :  { %26 = vsyncpa [#allocation18], 0 }
  0x12   :  { %27 = vsyncpa [#allocation4], 0 }
  0x13   :  { %29 = vsyncpa [#allocation4 + $0x1], 0  ;;  %s3120_s21 = smov 0   ;;  %s3122_s22 = smov 0  }
  0x14   :  { %s3124_s23 = smov 0   ;;  %s3126_s24 = smov 0  }
  0x15 LB: > { %3824 = sst [smem:[#allocation32_spill]] %s3017_s21  ;;  %s3031_s25 = smov [#allocation7]   ;;  %s3029_s24 = sphi %s3126_s24, %s3880_s24   ;;  %s3025_s23 = sphi %s3124_s23, %s3882_s23   ;;  %s3021_s22 = sphi %s3122_s22, %s3884_s22   ;;  %s3017_s21 = sphi %s3120_s21, %s3883_s21  }
  0x16   : > { %3825 = sst [smem:[#allocation33_spill]] %s3025_s23  ;;  %s350_s26 = sshll.u32 %s3031_s25, 4  ;;  %s3146_s26 = int_to_ptr.vmem [resolvable:$true] %s350_s26 }
  0x17   : > { %s3141_s27 = sadd.s32 4294967295, %s3029_s24   ;;  %p2037_p0 = scmp.ge.s32.totalorder %s3029_s24, 1 }
  0x18   : > { %p3789_p1 = scmp.eq.s32.totalorder %s3141_s27, 0  ;;  %p338_p2 = scmp.lt.s32.totalorder %s3029_s24, 3 }
  0x19   : > { %s3032_s29 = smov [#allocation8]   ;;  %s3033_s14 = smov [#allocation11]  }
  0x1a   : > { %p3148_p3 = pnand %p2037_p0, %p338_p2  ;;  %s364_s30 = sshll.u32 %s3032_s29, 4  ;;  %s3161_s30 = int_to_ptr.vmem [resolvable:$true] %s364_s30 }
  0x1b   : > { %s388_s15 = sshll.u32 %s3033_s14, 4  ;;  %s3829_s2 = sld [smem:[#allocation41_spill]]  ;;  %s3163_s15 = int_to_ptr.vmem [resolvable:$true] %s388_s15 }
  0x1c   : > { %s3826_s28 = scalar_select %p3148_p3, 1, 0 }
  0x1d   : > { %p2311_p5 = pneg %p3148_p3 }
  0x1e   : > { %3827 = sst [smem:[#allocation34_spill]] %s3826_s28 }
  0x1f   : > { %p3157_p6 = pnand %p2311_p5, %p3789_p1 }
  0x21   : > { %s3828_s13 = scalar_select %p3157_p6, 1, 0 }
  0x22   : > { %s2587_s18 = scalar_lea.hbm %s3829_s2, 1024  ;;  %p3173_p8 = pneg %p3157_p6 }
  0x23   : > { %p2588_p7 = scmp.ne.s32.totalorder %s3829_s2, %s2587_s18  ;;  %p2594_p11 = scmp.lt.u32.totalorder %s2587_s18, %s3829_s2 }
  0x24   : > { %s3830_s25 = scalar_select %p3173_p8, 1, 0 }
  0x25   : > { %p2590_p9 = pnand %p3173_p8, %p2588_p7 }
  0x27   : > { %p2591_p10 = pneg %p2590_p9 }
  0x29   : > { %p2596_p12 = pnand %p2594_p11, %p2591_p10 }
  0x2b   : > { %2599 = shalt.err (!%p2596_p12)
}
  0x2c   : > { %s2600_s16 = scalar_lea.vmem %s3146_s26, 1024  ;;  %p2608_p5 = scmp.lt.s32.totalorder %s3146_s26, %s3146_s26 }
  0x2d   : > { %p2601_p13 = scmp.ne.s32.totalorder %s3146_s26, %s2600_s16  ;;  %p2609_p4 = scmp.lt.s32.totalorder %s2600_s16, %s2600_s16 }
  0x2f   : > { %p2603_p0 = pnand %p2601_p13, %p3173_p8  ;;  %p2610_p7 = por %p2609_p4, %p2608_p5 }
  0x31   : > { %p2604_p2 = pneg %p2603_p0 }
  0x33   : > { %p2611_p9 = pnand %p2610_p7, %p2604_p2 }
  0x35   : > { %2614 = shalt.err (!%p2611_p9)
}
  0x36   : > { %s3791_s17 = smov 64   ;;  %s3793_s18 = smov 4  }
  0x37   : > { %2314 = dma.hbm_to_vmem [thread:$0]  (!%p3157_p6), %s3829_s2, 1024, %s3146_s26, [#allocation6], %s3791_s17, %s3791_s17, %s3793_s18  }
  0x38   : > { %s3831_s3 = sld [smem:[#allocation42_spill]] }
  0x3e   : > { %s2615_s16 = scalar_lea.hbm %s3831_s3, 16 }
  0x3f   : > { %p2616_p4 = scmp.ne.s32.totalorder %s3831_s3, %s2615_s16  ;;  %p2622_p12 = scmp.lt.u32.totalorder %s2615_s16, %s3831_s3 }
  0x41   : > { %p2618_p10 = pnand %p2616_p4, %p3173_p8 }
  0x43   : > { %p2619_p11 = pneg %p2618_p10 }
  0x45   : > { %p2624_p13 = pnand %p2622_p12, %p2619_p11 }
  0x47   : > { %2627 = shalt.err (!%p2624_p13)
}
  0x48   : > { %s2628_s26 = scalar_lea.vmem %s3161_s30, 16  ;;  %s2635_s12 = scalar_lea.vmem %s3161_s30, 32 }
  0x49   : > { %p2629_p0 = scmp.ne.s32.totalorder %s3161_s30, %s2628_s26  ;;  %p2636_p7 = scmp.lt.s32.totalorder %s3161_s30, %s3161_s30 }
  0x4a   : > { %p2637_p9 = scmp.lt.s32.totalorder %s2635_s12, %s2628_s26 }
  0x4b   : > { %p2631_p2 = pnand %p2629_p0, %p3173_p8 }
  0x4c   : > { %p2638_p4 = por %p2637_p9, %p2636_p7 }
  0x4d   : > { %p2632_p5 = pneg %p2631_p2 }
  0x4f   : > { %p2639_p10 = pnand %p2638_p4, %p2632_p5 }
  0x51   : > { %2642 = shalt.err (!%p2639_p10)
}
  0x52   : > { %2317 = dma.hbm_to_vmem [thread:$0]  (!%p3157_p6), %s3831_s3, 16, %s3161_s30, [#allocation9]  }
  0x53   : > { %s3832_s5 = sld [smem:[#allocation43_spill]] }
  0x59   : > { %s2643_s20 = scalar_lea.hbm %s3832_s5, 32 }
  0x5a   : > { %p2644_p11 = scmp.ne.s32.totalorder %s3832_s5, %s2643_s20  ;;  %p2650_p0 = scmp.lt.u32.totalorder %s2643_s20, %s3832_s5 }
  0x5c   : > { %p2646_p12 = pnand %p2644_p11, %p3173_p8 }
  0x5e   : > { %p2647_p13 = pneg %p2646_p12 }
  0x60   : > { %p2652_p2 = pnand %p2650_p0, %p2647_p13 }
  0x62   : > { %2655 = shalt.err (!%p2652_p2)
}
  0x63   : > { %s2656_s30 = scalar_lea.vmem %s3163_s15, 32  ;;  %p2664_p4 = scmp.lt.s32.totalorder %s3163_s15, %s3163_s15 }
  0x64   : > { %p2657_p5 = scmp.ne.s32.totalorder %s3163_s15, %s2656_s30  ;;  %p2665_p10 = scmp.lt.s32.totalorder %s2656_s30, %s2656_s30 }
  0x66   : > { %p2659_p7 = pnand %p2657_p5, %p3173_p8  ;;  %p2666_p11 = por %p2665_p10, %p2664_p4 }
  0x68   : > { %p2660_p9 = pneg %p2659_p7 }
  0x6a   : > { %p2667_p12 = pnand %p2666_p11, %p2660_p9 }
  0x6c   : > { %2670 = shalt.err (!%p2667_p12)
}
  0x6d   : > { %2323 = dma.hbm_to_vmem [thread:$0]  (!%p3157_p6), %s3832_s5, 32, %s3163_s15, [#allocation12]  }
  0x6e   : > { %s3036_s11 = smov [#allocation14]   ;;  %s3833_s7 = sld [smem:[#allocation44_spill]] }
  0x6f   : > { %s412_s28 = sshll.u32 %s3036_s11, 4  ;;  %s413_s28 = int_to_ptr.vmem [resolvable:$true] %s412_s28 }
  0x74   : > { %s2671_s29 = scalar_lea.hbm %s3833_s7, 16 }
  0x75   : > { %p2672_p13 = scmp.ne.s32.totalorder %s3833_s7, %s2671_s29  ;;  %p2678_p5 = scmp.lt.u32.totalorder %s2671_s29, %s3833_s7 }
  0x77   : > { %p2674_p0 = pnand %p2672_p13, %p3173_p8 }
  0x79   : > { %p2675_p2 = pneg %p2674_p0 }
  0x7b   : > { %p2680_p7 = pnand %p2678_p5, %p2675_p2 }
  0x7d   : > { %2683 = shalt.err (!%p2680_p7)
}
  0x7e   : > { %s2684_s15 = scalar_lea.vmem %s413_s28, 16  ;;  %s2691_s12 = scalar_lea.vmem %s413_s28, 32 }
  0x7f   : > { %p2685_p9 = scmp.ne.s32.totalorder %s413_s28, %s2684_s15  ;;  %p2692_p11 = scmp.lt.s32.totalorder %s413_s28, %s413_s28 }
  0x80   : > { %p2693_p12 = scmp.lt.s32.totalorder %s2691_s12, %s2684_s15 }
  0x81   : > { %p2687_p4 = pnand %p2685_p9, %p3173_p8 }
  0x82   : > { %p2694_p1 = por %p2693_p12, %p2692_p11 }
  0x83   : > { %p2688_p10 = pneg %p2687_p4 }
  0x85   : > { %p2695_p3 = pnand %p2694_p1, %p2688_p10 }
  0x87   : > { %2698 = shalt.err (!%p2695_p3)
}
  0x88   : > { %2329 = dma.hbm_to_vmem [thread:$0]  (!%p3157_p6), %s3833_s7, 16, %s413_s28, [#allocation15]  }
  0x89   : > { %s2036_s19 = sadd.s32 4294967294, %s3029_s24   ;;  %s3264_s20 = sadd.s32 1, %s3029_s24  }
  0x8a   : > { %3834 = sst [smem:[#allocation35_spill]] %s3264_s20  ;;  %s39_s29 = ssub.s32 %s3029_s24, %s3264_s20 }
  0x8b   : > { %s42_s14 = sadd.s32 1, %s3025_s23  ;;  %p40_p1 = scmp.eq.s32.totalorder %s39_s29, 0 }
  0x8c   : > { %p49_p3 = scmp.ne.s32.totalorder %s3025_s23, %s3021_s22  ;;  %p50_p13 = scmp.eq.s32.totalorder %s3029_s24, 0 }
  0x8d   : > { %p55_p0 = scmp.ne.s32.totalorder %s3021_s22, %s3017_s21  ;;  %p3837_p5 = scmp.eq.s32.totalorder %s3141_s27, 0 }
  0x8e   : > { %s3275_s16 = scalar_select %p40_p1, %s3025_s23, %s42_s14  }
  0x8f   : > { %p3277_p2 = por %p50_p13, %p49_p3  ;;  %p3283_p7 = por %p3837_p5, %p55_p0 }
  0x90   : > { %3835 = sst [smem:[#allocation36_spill]] %s3275_s16  ;;  %p325_p9 = scmp.eq.s32.totalorder %s3141_s27, 1 }
  0x91   : > { %s3838_s28 = scalar_select %p3283_p7, 1, 0 }
  0x92   : > { %p331_p4 = scmp.eq.s32.totalorder %s2036_s19, 1  ;;  %p2361_p10 = scmp.lt.s32.totalorder %s3029_s24, 2 }
  0x93   : > { %p3290_p11 = por %p325_p9, %p49_p3  ;;  %s3299_s9 = sand.u32 1, %s3025_s23  }
  0x94   : > { %p3294_p12 = por %p331_p4, %p55_p0  ;;  %s3795_s11 = sshll.u32 %s3299_s9, 3 }
  0x95   : > { %s3839_s15 = scalar_select %p3290_p11, 1, 0 }
  0x96   : > { %s3841_s12 = scalar_select %p3294_p12, 1, 0 }
  0x97   : > { %3840 = sst [smem:[#allocation37_spill]] %s3839_s15  ;;  %s3796_s29 = sshll.u32 %s3029_s24, 7 }
  0x98   : > { %3842 = sst [smem:[#allocation38_spill]] %s3841_s12  ;;  %s3843_s0 = sld [smem:[#allocation39_spill]] }
  0x99   : > { %s449_s18 = scalar_lea.vmem [#allocation2], %s3795_s11  ;;  %p3314_p1 = pnand %p2361_p10, %p3277_p2 }
  0x9a   : > { %s456_s30 = sshll.u32 %s449_s18, 4  ;;  %s3845_s3 = sand.u32 1, %s3029_s24   ;;  %s3318_s30 = int_to_ptr.vmem [resolvable:$true] %s456_s30 }
  0x9b   : > { %s3844_s2 = scalar_select %p3314_p1, 1, 0 }
  0x9c   : > { %s3322_s5 = scalar_lea.sflag [#allocation3], %s3845_s3  ;;  %p3328_p13 = pneg %p3314_p1 }
  0x9e   : > { %s3308_s19 = scalar_lea.hbm %s3843_s0, %s3796_s29  ;;  %s2704_s11 = scalar_lea.hbm %s3843_s0, 256 }
  0x9f   : > { %s2699_s17 = scalar_lea.hbm %s3308_s19, 128  ;;  %p2705_p5 = scmp.lt.u32.totalorder %s3308_s19, %s3843_s0 }
  0xa0   : > { %p2700_p3 = scmp.ne.s32.totalorder %s3308_s19, %s2699_s17  ;;  %p2706_p9 = scmp.lt.u32.totalorder %s2704_s11, %s2699_s17 }
  0xa1   : > { %s3846_s14 = scalar_select %p3328_p13, 1, 0 }
  0xa2   : > { %p2702_p0 = pnand %p3328_p13, %p2700_p3  ;;  %p2707_p4 = por %p2706_p9, %p2705_p5 }
  0xa3   : > { %p2708_p10 = scmp.lt.u32.totalorder %s2699_s17, %s3308_s19 }
  0xa4   : > { %p2703_p2 = pneg %p2702_p0 }
  0xa5   : > { %p2709_p12 = por %p2708_p10, %p2707_p4 }
  0xa7   : > { %p2710_p11 = pnand %p2709_p12, %p2703_p2 }
  0xa9   : > { %2713 = shalt.err (!%p2710_p11)
}
  0xaa   : > { %s2714_s3 = scalar_lea.vmem %s3318_s30, 128  ;;  %s3037_s18 = smov [#allocation2]  }
  0xab   : > { %p2715_p3 = scmp.ne.s32.totalorder %s3318_s30, %s2714_s3  ;;  %s2719_s26 = sshll.u32 %s3037_s18, 4  ;;  %s2720_s26 = int_to_ptr.vmem [resolvable:$false] %s2719_s26 }
  0xac   : > { %s2721_s7 = scalar_lea.vmem %s2720_s26, 256  ;;  %p2722_p6 = scmp.lt.s32.totalorder %s3318_s30, %s2720_s26 }
  0xad   : > { %p2717_p0 = pnand %p2715_p3, %p3328_p13  ;;  %p2723_p8 = scmp.lt.s32.totalorder %s2721_s7, %s2714_s3 }
  0xaf   : > { %p2718_p7 = pneg %p2717_p0  ;;  %p2724_p5 = por %p2723_p8, %p2722_p6 }
  0xb1   : > { %p2725_p9 = pnand %p2724_p5, %p2718_p7 }
  0xb3   : > { %2728 = shalt.err (!%p2725_p9)
}
  0xb4   : > { %s3847_s11 = smov 4   ;;  %s3848_s29 = smov 64  }
  0xb5   : > { %2339 = dma.hbm_to_vmem [thread:$0]  (!%p3314_p1), %s3308_s19, 128, %s3318_s30, %s3322_s5, %s3848_s29, %s3848_s29, %s3847_s11  }
  0xb6   : > { %s3849_s17 = sshll.u32 %s3029_s24, 7  ;;  %s3850_s1 = sld [smem:[#allocation40_spill]] }
  0xb7   : > { %s3851_s7 = sshll.u32 %s3299_s9, 3  ;;  %s3852_s23 = sand.u32 1, %s3029_s24  }
  0xb8   : > { %s470_s0 = scalar_lea.vmem [#allocation5], %s3851_s7  ;;  %s3368_s20 = scalar_lea.sflag [#allocation6], %s3852_s23 }
  0xb9   : > { %s477_s16 = sshll.u32 %s470_s0, 4  ;;  %s3364_s16 = int_to_ptr.vmem [resolvable:$true] %s477_s16 }
  0xbc   : > { %s3360_s3 = scalar_lea.hbm %s3850_s1, %s3849_s17  ;;  %s2734_s17 = scalar_lea.hbm %s3850_s1, 256 }
  0xbd   : > { %s2729_s12 = scalar_lea.hbm %s3360_s3, 128  ;;  %p2735_p11 = scmp.lt.u32.totalorder %s3360_s3, %s3850_s1 }
  0xbe   : > { %p2730_p6 = scmp.ne.s32.totalorder %s3360_s3, %s2729_s12  ;;  %p2736_p12 = scmp.lt.u32.totalorder %s2734_s17, %s2729_s12 }
  0xbf   : > { %p2738_p4 = scmp.lt.u32.totalorder %s2729_s12, %s3360_s3 }
  0xc0   : > { %p2732_p8 = pnand %p2730_p6, %p3328_p13  ;;  %p2737_p2 = por %p2736_p12, %p2735_p11 }
  0xc2   : > { %p2733_p7 = pneg %p2732_p8  ;;  %p2739_p10 = por %p2738_p4, %p2737_p2 }
  0xc4   : > { %p2740_p3 = pnand %p2739_p10, %p2733_p7 }
  0xc6   : > { %2743 = shalt.err (!%p2740_p3)
}
  0xc7   : > { %s2744_s0 = scalar_lea.vmem %s3364_s16, 128  ;;  %s3038_s23 = smov [#allocation5]  }
  0xc8   : > { %p2745_p0 = scmp.ne.s32.totalorder %s3364_s16, %s2744_s0  ;;  %s2749_s7 = sshll.u32 %s3038_s23, 4  ;;  %s2750_s7 = int_to_ptr.vmem [resolvable:$false] %s2749_s7 }
  0xc9   : > { %s2751_s30 = scalar_lea.vmem %s2750_s7, 256  ;;  %p2752_p6 = scmp.lt.s32.totalorder %s3364_s16, %s2750_s7 }
  0xca   : > { %p2747_p5 = pnand %p2745_p0, %p3328_p13  ;;  %p2753_p8 = scmp.lt.s32.totalorder %s2751_s30, %s2744_s0 }
  0xcc   : > { %p2748_p9 = pneg %p2747_p5  ;;  %p2754_p11 = por %p2753_p8, %p2752_p6 }
  0xce   : > { %p2755_p12 = pnand %p2754_p11, %p2748_p9 }
  0xd0   : > { %2758 = shalt.err (!%p2755_p12)
}
  0xd1   : > { %2342 = dma.hbm_to_vmem [thread:$0]  (!%p3314_p1), %s3360_s3, 128, %s3364_s16, %s3368_s20, %s3848_s29, %s3848_s29, %s3847_s11  }
  0xd2   : > { %s3039_s12 = smov [#allocation10]   ;;  %s2759_s26 = scalar_lea.hbm %s3776_s4, 2048 }
  0xd3   : > { %s374_s19 = sshll.u32 %s3039_s12, 4  ;;  %p2760_p7 = scmp.ne.s32.totalorder %s3776_s4, %s2759_s26  ;;  %s375_s19 = int_to_ptr.vmem [resolvable:$true] %s374_s19 }
  0xd4   : > { %p3853_p2 = scmp.ne.s32.totalorder %s3830_s25, 0  ;;  %p2766_p3 = scmp.lt.u32.totalorder %s2759_s26, %s3776_s4 }
  0xd6   : > { %p2762_p4 = pnand %p2760_p7, %p3853_p2 }
  0xd8   : > { %p2763_p10 = pneg %p2762_p4 }
  0xda   : > { %p2768_p0 = pnand %p2766_p3, %p2763_p10 }
  0xdc   : > { %2771 = shalt.err (!%p2768_p0)
}
  0xdd   : > { %s2772_s16 = scalar_lea.vmem %s375_s19, 2048  ;;  %p2780_p8 = scmp.lt.s32.totalorder %s375_s19, %s375_s19 }
  0xde   : > { %p2773_p5 = scmp.ne.s32.totalorder %s375_s19, %s2772_s16  ;;  %p2781_p11 = scmp.lt.s32.totalorder %s2772_s16, %s2772_s16 }
  0xe0   : > { %p2775_p9 = pnand %p2773_p5, %p3853_p2  ;;  %p2782_p12 = por %p2781_p11, %p2780_p8 }
  0xe2   : > { %p2776_p6 = pneg %p2775_p9 }
  0xe4   : > { %p2783_p1 = pnand %p2782_p12, %p2776_p6 }
  0xe6   : > { %2786 = shalt.err (!%p2783_p1)
}
  0xe7   : > { %s3814_s3 = smov 128   ;;  %s3041_s12 = smov 8  }
  0xe8   : > { %p3854_p7 = scmp.ne.s32.totalorder %s3828_s13, 0  ;;  %s3042_s26 = smov [#allocation13]  }
  0xe9   : > { %s398_s0 = sshll.u32 %s3042_s26, 4  ;;  %s3043_s23 = smov [#allocation16]   ;;  %s399_s0 = int_to_ptr.vmem [resolvable:$true] %s398_s0 }
  0xea   : > { %2320 = dma.hbm_to_vmem [thread:$0]  (!%p3854_p7), %s3776_s4, 2048, %s375_s19, [#allocation9], %s3814_s3, %s3814_s3, %s3041_s12  }
  0xeb   : > { %s423_s7 = sshll.u32 %s3043_s23, 4  ;;  %s2787_s1 = scalar_lea.hbm %s3778_s6, 1024  ;;  %s3416_s7 = int_to_ptr.vmem [resolvable:$true] %s423_s7 }
  0xec   : > { %p2788_p1 = scmp.ne.s32.totalorder %s3778_s6, %s2787_s1  ;;  %p2794_p3 = scmp.lt.u32.totalorder %s2787_s1, %s3778_s6 }
  0xee   : > { %p2790_p4 = pnand %p2788_p1, %p3853_p2 }
  0xf0   : > { %p2791_p10 = pneg %p2790_p4 }
  0xf2   : > { %p2796_p0 = pnand %p2794_p3, %p2791_p10 }
  0xf4   : > { %2799 = shalt.err (!%p2796_p0)
}
  0xf5   : > { %s2800_s18 = scalar_lea.vmem %s399_s0, 1024  ;;  %p2808_p8 = scmp.lt.s32.totalorder %s399_s0, %s399_s0 }
  0xf6   : > { %p2801_p5 = scmp.ne.s32.totalorder %s399_s0, %s2800_s18  ;;  %p2809_p11 = scmp.lt.s32.totalorder %s2800_s18, %s2800_s18 }
  0xf8   : > { %p2803_p9 = pnand %p2801_p5, %p3853_p2  ;;  %p2810_p12 = por %p2809_p11, %p2808_p8 }
  0xfa   : > { %p2804_p6 = pneg %p2803_p9 }
  0xfc   : > { %p2811_p13 = pnand %p2810_p12, %p2804_p6 }
  0xfe   : > { %2814 = shalt.err (!%p2811_p13)
}
  0xff   : > { %2326 = dma.hbm_to_vmem [thread:$0]  (!%p3854_p7), %s3778_s6, 1024, %s399_s0, [#allocation12], %s3848_s29, %s3848_s29, %s3847_s11  }
 0x100   : > { %s2815_s23 = scalar_lea.hbm %s3780_s8, 16 }
 0x101   : > { %p2816_p1 = scmp.ne.s32.totalorder %s3780_s8, %s2815_s23  ;;  %p2822_p10 = scmp.lt.u32.totalorder %s2815_s23, %s3780_s8 }
 0x103   : > { %p2818_p13 = pnand %p2816_p1, %p3853_p2 }
 0x105   : > { %p2819_p4 = pneg %p2818_p13 }
 0x107   : > { %p2824_p3 = pnand %p2822_p10, %p2819_p4 }
 0x109   : > { %2827 = shalt.err (!%p2824_p3)
}
 0x10a   : > { %s2828_s11 = scalar_lea.vmem %s3416_s7, 16  ;;  %s2835_s29 = scalar_lea.vmem %s3416_s7, 32 }
 0x10b   : > { %p2829_p0 = scmp.ne.s32.totalorder %s3416_s7, %s2828_s11  ;;  %p2836_p6 = scmp.lt.s32.totalorder %s3416_s7, %s3416_s7 }
 0x10c   : > { %p2837_p8 = scmp.lt.s32.totalorder %s2835_s29, %s2828_s11 }
 0x10d   : > { %p2831_p5 = pnand %p2829_p0, %p3853_p2 }
 0x10e   : > { %p2838_p11 = por %p2837_p8, %p2836_p6 }
 0x10f   : > { %p2832_p9 = pneg %p2831_p5 }
 0x111   : > { %p2839_p12 = pnand %p2838_p11, %p2832_p9 }
 0x113   : > { %2842 = shalt.err (!%p2839_p12)
}
 0x114   : > { %2332 = dma.hbm_to_vmem [thread:$0]  (!%p3854_p7), %s3780_s8, 16, %s3416_s7, [#allocation15]  }
 0x115   : > { %s3044_s21 = smov [#allocation17]   ;;  %s2053_s15 = sshll.u32 %s3029_s24, 4 }
 0x116   : > { %s434_s1 = sshll.u32 %s3044_s21, 4  ;;  %s3467_s30 = scalar_lea.hbm %s3782_s10, %s2053_s15  ;;  %s435_s1 = int_to_ptr.vmem [resolvable:$true] %s434_s1 }
 0x117   : > { %s3855_s19 = sld [smem:[#allocation45_spill]] }
 0x11d   : > { %s2843_s11 = scalar_lea.hbm %s3855_s19, 16 }
 0x11e   : > { %p2844_p1 = scmp.ne.s32.totalorder %s3855_s19, %s2843_s11  ;;  %p2850_p10 = scmp.lt.u32.totalorder %s2843_s11, %s3855_s19 }
 0x120   : > { %p2846_p13 = pnand %p2844_p1, %p3853_p2 }
 0x122   : > { %p2847_p4 = pneg %p2846_p13 }
 0x124   : > { %p2852_p3 = pnand %p2850_p10, %p2847_p4 }
 0x126   : > { %2855 = shalt.err (!%p2852_p3)
}
 0x127   : > { %s2856_s18 = scalar_lea.vmem %s435_s1, 16  ;;  %s2863_s21 = scalar_lea.vmem %s435_s1, 32 }
 0x128   : > { %p2857_p0 = scmp.ne.s32.totalorder %s435_s1, %s2856_s18  ;;  %p2864_p6 = scmp.lt.s32.totalorder %s435_s1, %s435_s1 }
 0x129   : > { %p2865_p8 = scmp.lt.s32.totalorder %s2863_s21, %s2856_s18 }
 0x12a   : > { %p2859_p5 = pnand %p2857_p0, %p3853_p2 }
 0x12b   : > { %p2866_p11 = por %p2865_p8, %p2864_p6 }
 0x12c   : > { %p2860_p9 = pneg %p2859_p5 }
 0x12e   : > { %p2867_p12 = pnand %p2866_p11, %p2860_p9 }
 0x130   : > { %2870 = shalt.err (!%p2867_p12)
}
 0x131   : > { %2335 = dma.hbm_to_vmem [thread:$0]  (!%p3854_p7), %s3855_s19, 16, %s435_s1, [#allocation18]  }
 0x132   : > { %s490_s25 = scalar_lea.vmem [#allocation19], %s3299_s9  ;;  %s2054_s23 = sshll.u32 %s3299_s9, 4 }
 0x133   : > { %s497_s26 = sshll.u32 %s490_s25, 4  ;;  %s2871_s16 = scalar_lea.hbm %s3467_s30, 16  ;;  %s498_s26 = int_to_ptr.vmem [resolvable:$true] %s497_s26 }
 0x134   : > { %p2872_p2 = scmp.ne.s32.totalorder %s3467_s30, %s2871_s16  ;;  %p3856_p1 = scmp.ne.s32.totalorder %s3846_s14, 0 }
 0x135   : > { %s2876_s11 = scalar_lea.hbm %s3782_s10, 32  ;;  %p2877_p10 = scmp.lt.u32.totalorder %s3467_s30, %s3782_s10 }
 0x136   : > { %p2874_p13 = pnand %p2872_p2, %p3856_p1  ;;  %p2878_p3 = scmp.lt.u32.totalorder %s2876_s11, %s2871_s16 }
 0x137   : > { %p2880_p7 = scmp.lt.u32.totalorder %s2871_s16, %s3467_s30 }
 0x138   : > { %p2875_p4 = pneg %p2874_p13  ;;  %p2879_p0 = por %p2878_p3, %p2877_p10 }
 0x13a   : > { %p2881_p5 = por %p2880_p7, %p2879_p0 }
 0x13c   : > { %p2882_p9 = pnand %p2881_p5, %p2875_p4 }
 0x13e   : > { %2885 = shalt.err (!%p2882_p9)
}
 0x13f   : > { %s2886_s1 = scalar_lea.vmem %s498_s26, 16  ;;  %s3045_s0 = smov [#allocation19]  }
 0x140   : > { %p2887_p6 = scmp.ne.s32.totalorder %s498_s26, %s2886_s1  ;;  %s2891_s18 = sshll.u32 %s3045_s0, 4  ;;  %s2892_s18 = int_to_ptr.vmem [resolvable:$false] %s2891_s18 }
 0x141   : > { %s2893_s21 = scalar_lea.vmem %s2892_s18, 32  ;;  %p2894_p12 = scmp.lt.s32.totalorder %s498_s26, %s2892_s18 }
 0x142   : > { %p2889_p8 = pnand %p2887_p6, %p3856_p1  ;;  %p2895_p2 = scmp.lt.s32.totalorder %s2893_s21, %s2886_s1 }
 0x144   : > { %p2890_p11 = pneg %p2889_p8  ;;  %p2896_p13 = por %p2895_p2, %p2894_p12 }
 0x146   : > { %p2897_p3 = pnand %p2896_p13, %p2890_p11 }
 0x148   : > { %2900 = shalt.err (!%p2897_p3)
}
 0x149   : > { %p3857_p10 = scmp.ne.s32.totalorder %s3844_s2, 0  ;;  %s2126_s3 = sshll.u32 %s3029_s24, 8 }
 0x14a   : > { %s508_s15 = scalar_lea.vmem [#allocation20], %s2054_s23  ;;  %s3858_s17 = sld [smem:[#allocation46_spill]] }
 0x14b   : > { %2345 = dma.hbm_to_vmem [thread:$0]  (!%p3857_p10), %s3467_s30, 16, %s498_s26, %s3322_s5  }
 0x14c   : > { %s515_s25 = sshll.u32 %s508_s15, 4  ;;  %s3515_s25 = int_to_ptr.vmem [resolvable:$true] %s515_s25 }
 0x150   : > { %s3513_s11 = scalar_lea.hbm %s3858_s17, %s2126_s3  ;;  %s2906_s30 = scalar_lea.hbm %s3858_s17, 512 }
 0x151   : > { %s2901_s29 = scalar_lea.hbm %s3513_s11, 256  ;;  %p2907_p5 = scmp.lt.u32.totalorder %s3513_s11, %s3858_s17 }
 0x152   : > { %p2902_p4 = scmp.ne.s32.totalorder %s3513_s11, %s2901_s29  ;;  %p2908_p9 = scmp.lt.u32.totalorder %s2906_s30, %s2901_s29 }
 0x153   : > { %p2910_p8 = scmp.lt.u32.totalorder %s2901_s29, %s3513_s11 }
 0x154   : > { %p2904_p0 = pnand %p2902_p4, %p3856_p1  ;;  %p2909_p6 = por %p2908_p9, %p2907_p5 }
 0x156   : > { %p2905_p7 = pneg %p2904_p0  ;;  %p2911_p11 = por %p2910_p8, %p2909_p6 }
 0x158   : > { %p2912_p12 = pnand %p2911_p11, %p2905_p7 }
 0x15a   : > { %2915 = shalt.err (!%p2912_p12)
}
 0x15b   : > { %s2916_s7 = scalar_lea.vmem %s3515_s25, 256  ;;  %s3046_s1 = smov [#allocation20]  }
 0x15c   : > { %p2917_p2 = scmp.ne.s32.totalorder %s3515_s25, %s2916_s7  ;;  %s2921_s0 = sshll.u32 %s3046_s1, 4  ;;  %s2922_s0 = int_to_ptr.vmem [resolvable:$false] %s2921_s0 }
 0x15d   : > { %s2923_s18 = scalar_lea.vmem %s2922_s0, 512  ;;  %p2924_p4 = scmp.lt.s32.totalorder %s3515_s25, %s2922_s0 }
 0x15e   : > { %p2919_p13 = pnand %p2917_p2, %p3856_p1  ;;  %p2925_p0 = scmp.lt.s32.totalorder %s2923_s18, %s2916_s7 }
 0x160   : > { %p2920_p3 = pneg %p2919_p13  ;;  %p2926_p5 = por %p2925_p0, %p2924_p4 }
 0x162   : > { %p2927_p9 = pnand %p2926_p5, %p2920_p3 }
 0x164   : > { %2930 = shalt.err (!%p2927_p9)
}
 0x165   : > { %s3859_s21 = smov 128   ;;  %s3860_s14 = sld [smem:[#allocation34_spill]] }
 0x166   : > { %2348 = dma.hbm_to_vmem [thread:$0]  (!%p3857_p10), %s3513_s11, 256, %s3515_s25, %s3368_s20, %s3859_s21, %s3859_s21, %s3041_s12  }
 0x16b   : > { %p3861_p1 = scmp.ne.s32.totalorder %s3860_s14, 0 }
 0x16c   : > { %s529_s3 = sand.u32 (!%p3861_p1), 1, %s3141_s27   ;;  %s3546_s15 = sand.u32 (!%p3861_p1), 1, %s3021_s22  }
 0x16d   : > { %527 = sbr.rel (%p3861_p1) target bundleno = 2405 (0x965), region = 68  ;;  %s3549_s16 = sshll.u32 (!%p3861_p1), %s3546_s15, 3 }
 0x16e   : > { %s530_s2 = scalar_lea.sflag (!%p3861_p1), [#allocation3], %s529_s3  ;;  %s533_s13 = scalar_lea.vmem (!%p3861_p1), [#allocation2], %s3549_s16 }
 0x16f   : > { %p3862_p7 = scmp.ne.s32.totalorder (!%p3861_p1), %s3838_s28, 0 }
 0x174   : > { %2976 = dma.done.wait (%p3862_p7), %s530_s2, 128  }
 0x175   : > { %2978 = vsyncadd (%p3862_p7), %s530_s2, 4294967168  ;;  %s539_s20 = scalar_lea.sflag [#allocation6], %s529_s3  ;;  %s542_s12 = scalar_lea.vmem [#allocation5], %s3549_s16 }
 0x176   : > { %2980 = dma.done.wait (%p3862_p7), %s539_s20, 128  }
 0x177   : > { %2982 = vsyncadd (%p3862_p7), %s539_s20, 4294967168  ;;  %p3863_p10 = scmp.eq.s32.totalorder %s3141_s27, 0 }
 0x179   : > { %2984 = dma.done.wait (%p3863_p10), [#allocation6], 1024   ;;  %p3864_p6 = pmov %p3863_p10 }
 0x17b   : > { %2986 = vsyncadd (%p3864_p6), [#allocation6], 4294966272  ;;  %p3865_p8 = pmov %p3864_p6 }
 0x17c   : > { %p3866_p11 = pmov %p3864_p6 }
 0x17d   : > { %2988 = dma.done.wait (%p3865_p8), [#allocation9], 2064  }
 0x17e   : > { %2990 = vsyncadd (%p3866_p11), [#allocation9], 4294965232  ;;  %p3867_p12 = pmov %p3864_p6 }
 0x17f   : > { %p3868_p2 = pmov %p3864_p6 }
 0x180   : > { %2992 = dma.done.wait (%p3867_p12), [#allocation12], 1056  }
 0x181   : > { %2994 = vsyncadd (%p3868_p2), [#allocation12], 4294966240  ;;  %p3869_p13 = pmov %p3868_p2 }
 0x182   : > { %p3870_p3 = pmov %p3868_p2 }
 0x183   : > { %2996 = dma.done.wait (%p3869_p13), [#allocation15], 32  }
 0x184   : > { %2998 = vsyncadd (%p3870_p3), [#allocation15], 4294967264  ;;  %p3871_p4 = pmov %p3868_p2 }
 0x185   : > { %p3872_p0 = pmov %p3868_p2 }
 0x186   : > { %3000 = dma.done.wait (%p3871_p4), [#allocation18], 16  }
 0x187   : > { %3002 = vsyncadd (%p3872_p0), [#allocation18], 4294967280  ;;  %s582_s25 = scalar_lea.vmem [#allocation19], %s3546_s15 }
 0x188   : > { %3004 = dma.done.wait (%p3862_p7), %s530_s2, 16  }
 0x189   : > { %3006 = vsyncadd (%p3862_p7), %s530_s2, 4294967280  ;;  %s2068_s11 = sshll.u32 %s3546_s15, 4 }
 0x18a   : > { %s3587_s29 = scalar_lea.vmem [#allocation20], %s2068_s11 }
 0x18b   : > { %3008 = dma.done.wait (%p3862_p7), %s539_s20, 256  }
 0x18c   : > { %3010 = vsyncadd (%p3862_p7), %s539_s20, 4294967040  ;;  %v3047_v0 = vmov 0.0   ;;  %vm3048_vm0 = vmmov 0   ;;  %v3049_v1 = vmov 0   ;;  %v2508_v2 = vld [vmem:[#allocation7] sm:$0xff]   ;;  %v2512_v5 = vld [vmem:[#allocation7 + $0x8] sm:$0xff]   ;;  %v787_v28 = vlaneseq }
 0x18d   : > { %2173 = vmatprep.subr.bf16.mxu0 %v3047_v0  ;;  %2189 = vmatprep.mubr.msk.bf16.mxu0 %vm3048_vm0, %v3047_v0  ;;  %v2509_v3 = vld [vmem:[#allocation10 + $0x4] ss:$8 sps:$4 sm:$0xff]   ;;  %v2511_v4 = vld [vmem:[#allocation10] ss:$8 sps:$4 sm:$0xff]   ;;  %v2513_v6 = vld [vmem:[#allocation10 + $0x14] ss:$8 sps:$4 sm:$0xff]  }
 0x18e   : > { %915 = vmatprep.mubr.bf16.mxu1 %v3049_v1  ;;  %2174 = vmatpush3.bf16.msra.mxu0 %v2508_v2  ;;  %v2515_v7 = vld [vmem:[#allocation10 + $0x10] ss:$8 sps:$4 sm:$0xff]   ;;  %v2517_v9 = vld [vmem:[#allocation10 + $0x24] ss:$8 sps:$4 sm:$0xff]   ;;  %v2519_v10 = vld [vmem:[#allocation10 + $0x20] ss:$8 sps:$4 sm:$0xff]  }
 0x18f   : > { %883 = vmatprep.subr.bf16.mxu1 %v2509_v3  ;;  %2175 = vmatprep.subr.bf16.mxu0 %v3047_v0  ;;  %v2516_v8 = vld [vmem:[#allocation7 + $0x10] sm:$0xff]   ;;  %v2520_v12 = vld [vmem:[#allocation7 + $0x18] sm:$0xff]   ;;  %v2524_v15 = vld [vmem:[#allocation7 + $0x20] sm:$0xff]   ;;  %v788_v29 = vshrl.u32 %v787_v28, 7  ;;  %s3050_s28 = smov 96   ;;  %s3051_s5 = smov 32  }
 0x190   : > { %884 = vmatpush1.bf16.msra.mxu1 %v2511_v4  ;;  %v2521_v11 = vld [vmem:[#allocation10 + $0x34] ss:$8 sps:$4 sm:$0xff]   ;;  %v2523_v13 = vld [vmem:[#allocation10 + $0x30] ss:$8 sps:$4 sm:$0xff]   ;;  %v2525_v14 = vld [vmem:[#allocation10 + $0x44] ss:$8 sps:$4 sm:$0xff]  }
 0x191   : > { %885 = vmatprep.subr.bf16.mxu1 %v2513_v6  ;;  %v2527_v16 = vld [vmem:[#allocation10 + $0x40] ss:$8 sps:$4 sm:$0xff]   ;;  %v2529_v17 = vld [vmem:[#allocation10 + $0x54] ss:$8 sps:$4 sm:$0xff]   ;;  %v2531_v19 = vld [vmem:[#allocation10 + $0x50] ss:$8 sps:$4 sm:$0xff]  }
 0x192   : > { %2176 = vmatpush3.bf16.msra.mxu0 %v2512_v5  ;;  %v2528_v18 = vld [vmem:[#allocation7 + $0x28] sm:$0xff]   ;;  %v2532_v20 = vld [vmem:[#allocation7 + $0x30] sm:$0xff]   ;;  %v2536_v24 = vld [vmem:[#allocation7 + $0x38] sm:$0xff]   ;;  %v789_v30 = vsub.s32 0, %v788_v29  ;;  %v793_v33 = vsub.s32 1, %v788_v29  ;;  %s3052_s9 = smov 64  }
 0x193   : > { %2177 = vmatprep.subr.bf16.mxu0 %v3047_v0  ;;  %v2533_v21 = vld [vmem:[#allocation10 + $0x64] ss:$8 sps:$4 sm:$0xff]   ;;  %v2535_v22 = vld [vmem:[#allocation10 + $0x60] ss:$8 sps:$4 sm:$0xff]   ;;  %v2537_v23 = vld [vmem:[#allocation10 + $0x74] ss:$8 sps:$4 sm:$0xff]  }
 0x194   : > { %886 = vmatpush1.bf16.msra.mxu1 %v2515_v7  ;;  %v3605_v25 = vld [vmem:[%s533_s13] sm:$0xff]   ;;  %v2539_v26 = vld [vmem:[#allocation10 + $0x70] ss:$8 sps:$4 sm:$0xff]   ;;  %vm1131_vm1 = vcmask 261120   ;;  %vm1330_vm2 = vcmask 130048   ;;  %vm1625_vm3 = vcmask 523264  }
 0x195   : > { %887 = vmatprep.subr.bf16.mxu1 %v2517_v9  ;;  %v2541_v27 = vld [vmem:[%s542_s12] sm:$0xff]   ;;  %v785_v31 = vld [vmem:[#allocation11] sm:$0x3]  ;;  %v2070_v32 = vld [vmem:[#allocation8] ss:$0 sm:$0xff]  ;;  %vm1628_vm4 = vcmask 785408  }
 0x196   : > { %2178 = vmatpush3.bf16.msra.mxu0 %v2516_v8  ;;  %v790_v35 = vrot.slane %v785_v31, %v789_v30  ;;  %v794_v40 = vrot.slane %v785_v31, %v793_v33  ;;  %s3873_s30 = sld [smem:[#allocation37_spill]]  ;;  %s645_s26 = scalar_lea.vmem [#allocation21], %s3549_s16 }
 0x197   : > { %2179 = vmatprep.subr.bf16.mxu0 %v3047_v0  ;;  %s1827_s23 = sshll.u32 %s645_s26, 4  ;;  %s2129_s7 = sshll.u32 %s3141_s27, 7  ;;  %s3721_s23 = int_to_ptr.vmem [resolvable:$true] %s1827_s23 }
 0x198   : > { %888 = vmatpush1.bf16.msra.mxu1 %v2519_v10  ;;  %s3874_s18 = sld [smem:[#allocation47_spill]]  ;;  %s1814_s14 = scalar_lea.sflag [#allocation4], %s3546_s15 }
 0x199   : > { %889 = vmatprep.subr.bf16.mxu1 %v2521_v11  ;;  %s2931_s3 = scalar_lea.vmem %s3721_s23, 128  ;;  %s3053_s27 = smov [#allocation21]  }
 0x19a   : > { %2180 = vmatpush3.bf16.msra.mxu0 %v2520_v12  ;;  %p2932_p5 = scmp.ne.s32.totalorder %s3721_s23, %s2931_s3  ;;  %s2935_s16 = sshll.u32 %s3053_s27, 4  ;;  %s2936_s16 = int_to_ptr.vmem [resolvable:$false] %s2935_s16 }
 0x19b   : > { %2181 = vmatprep.subr.bf16.mxu0 %v3047_v0  ;;  %s2937_s2 = scalar_lea.vmem %s2936_s16, 256  ;;  %p2938_p10 = scmp.lt.s32.totalorder %s3721_s23, %s2936_s16 }
 0x19c   : > { %890 = vmatpush1.bf16.msra.mxu1 %v2523_v13  ;;  %p3875_p9 = scmp.ne.s32.totalorder %s3873_s30, 0  ;;  %p2939_p6 = scmp.lt.s32.totalorder %s2937_s2, %s2931_s3 }
 0x19d   : > { %891 = vmatprep.subr.bf16.mxu1 %v2525_v14 }
 0x19e   : > { %2182 = vmatpush3.bf16.msra.mxu0 %v2524_v15  ;;  %s3726_s21 = scalar_lea.hbm %s3874_s18, %s2129_s7  ;;  %p2933_p1 = pnand %p2932_p5, %p3875_p9 }
 0x19f   : > { %2183 = vmatprep.subr.bf16.mxu0 %v3047_v0  ;;  %p2940_p8 = por %p2939_p6, %p2938_p10 }
 0x1a0   : > { %892 = vmatpush1.bf16.msra.mxu1 %v2527_v16  ;;  %p2934_p7 = pneg %p2933_p1 }
 0x1a1   : > { %893 = vmatprep.subr.bf16.mxu1 %v2529_v17 }
 0x1a2   : > { %2184 = vmatpush3.bf16.msra.mxu0 %v2528_v18  ;;  %p2941_p11 = pnand %p2940_p8, %p2934_p7 }
 0x1a3   : > { %2185 = vmatprep.subr.bf16.mxu0 %v3047_v0 }
 0x1a4   : > { %894 = vmatpush1.bf16.msra.mxu1 %v2531_v19 }
 0x1a5   : > { %895 = vmatprep.subr.bf16.mxu1 %v2533_v21 }
 0x1a6   : > { %2186 = vmatpush3.bf16.msra.mxu0 %v2532_v20 }
 0x1a7   : > { %2187 = vmatprep.subr.bf16.mxu0 %v3047_v0 }
 0x1a8   : > { %896 = vmatpush1.bf16.msra.mxu1 %v2535_v22 }
 0x1a9   : > { %897 = vmatprep.subr.bf16.mxu1 %v2537_v23 }
 0x1aa   : > { %2188 = vmatpush3.bf16.msra.mxu0 %v2536_v24 }
 0x1ab   : > { %2225 = vmatprep.subr.bf16.mxu0 %v3047_v0 }
 0x1ac   : > { %898 = vmatpush1.bf16.msra.mxu1 %v2539_v26 }
 0x1ad   : > { %2190 = vmatmul.mubr.bf16.vlgmr.msra.gmra.mrb[0].mxu0 %v3605_v25  ;;  %2193 = vmatprep.subr.bf16.mxu1 %v3047_v0 }
 0x1ae   : > { %2227 = vmatprep.mubr.msk.bf16.mxu0 %vm3048_vm0, %v3047_v0 }
 0x1af   : > { %916 = vmatmul.mubr.bf16.vlgmr.msra.gmra.mrb[0].mxu1 %v2541_v27 }
 0x1b0   : > { %2197 = vmatprep.mubr.msk.bf16.mxu1 %vm3048_vm0, %v3047_v0 }
 0x280   : > { %v762_v34 = vpop.f32.mrb[0].mxu0 }
 0x281   : > { %v3617_v36 = vadd.f32 %v2070_v32, %v762_v34  ;;  %v2191_v37 = vpop.f32.mrb[1].mxu0 }
 0x282   : > { %v917_v38 = vpop.f32.mrb[0].mxu1  ;;  %v765_v39 = vpop.f32.mrb[2].mxu0 }
 0x283   : > { %v3619_v41 = vadd.f32 %v2070_v32, %v765_v39  ;;  %v919_v42 = vpop.f32.mrb[1].mxu1  ;;  %v2192_v43 = vpop.f32.mrb[3].mxu0  ;;  %v918_v44 = vadd.f32 %v917_v38, %v790_v35 }
 0x284   : > { %v921_v45 = vpop.f32.mrb[2].mxu1  ;;  %v920_v50 = vadd.f32 %v919_v42, %v794_v40 }
 0x285   : > { %v946_v46 = vpack.c.bf16 %v3619_v41, %v3617_v36  ;;  %v922_v47 = vadd.f32 %v921_v45, %v790_v35  ;;  %v923_v48 = vpop.f32.mrb[3].mxu1  ;;  %v2432_v49 = vpack.i.bf16 %v3619_v41, %v3617_v36  ;;  %v2101_v45 = vld [vmem:[%s582_s25] ss:$0 sm:$0xff] }
 0x286   : > { %v924_v51 = vadd.f32 %v923_v48, %v794_v40 }
 0x287   : > { %2433 = vrot.lane.b32.xlu1 %v2432_v49, %s3050_s28  ;;  %v2422_v52 = vpack.i.bf16 %v922_v47, %v918_v44 }
 0x288   : > { %v1126_v53 = vpack.c.bf16 %v924_v51, %v920_v50  ;;  %v3626_v54 = vpack.i.bf16 %v924_v51, %v920_v50 }
 0x289   : > { %2423 = vrot.lane.b32.xlu0 %v2422_v52, %s3050_s28 }
 0x28a   : > { %2226 = vmatpush3.bf16.msra.mxu0 %v1126_v53 }
 0x28b   : > { %2438 = vrot.lane.b32.xlu1 %v2422_v52, %s3051_s5  ;;  %2237 = vmatprep.subr.bf16.mxu0 %v3047_v0 }
 0x28d   : > { %2428 = vrot.lane.b32.xlu0 %v2422_v52, %s3052_s9 }
 0x28f   : > { %2467 = vrot.lane.b32.xlu1 %v2432_v49, %s3052_s9 }
 0x293   : > { %2472 = vrot.lane.b32.xlu1 %v2432_v49, %s3051_s5 }
 0x2f9   : > { %v2434_v61 = vpop.permute.xlu1 %2433 }
 0x2fa   : > { %v2436_v24 = vunpack.i.h.bf16 %v2434_v61  ;;  %v2435_v26 = vunpack.i.l.bf16 %v2434_v61 }
 0x2fb   : > { %v2424_v55 = vpop.permute.xlu0 %2423 }
 0x2fc   : > { %v2425_v56 = vunpack.i.l.bf16 %v2424_v55  ;;  %v2426_v57 = vunpack.i.h.bf16 %v2424_v55  ;;  %v947_v30 = vpack.c.bf16 %v2436_v24, %v2435_v26 }
 0x2fd   : > { %v2439_v2 = vpop.permute.xlu1 %2438 }
 0x2fe   : > { %v2442_v58 = vpack.i.bf16 %v2425_v56, %v918_v44  ;;  %v2444_v62 = vpack.i.bf16 %v2426_v57, %v922_v47  ;;  %v2440_v3 = vunpack.i.l.bf16 %v2439_v2  ;;  %v2441_v4 = vunpack.i.h.bf16 %v2439_v2 }
 0x2ff   : > { %v2429_v59 = vpop.permute.xlu0 %2428 }
 0x300   : > { %2443 = vxpose.xlu0.b32.start [1/2] (short) (narrow) %v2442_v58, 32  ;;  %v2430_v60 = vunpack.i.l.bf16 %v2429_v59  ;;  %v2431_v63 = vunpack.i.h.bf16 %v2429_v59 }
 0x301   : > { %v2468_v5 = vpop.permute.xlu1 %2467 }
 0x302   : > { %1028 = vxpose.xlu1.b32.start [1/2] (short) (narrow) %v2430_v60, 32  ;;  %v2470_v34 = vunpack.i.h.bf16 %v2468_v5  ;;  %v2469_v35 = vunpack.i.l.bf16 %v2468_v5 }
 0x304   : > { %2445 = vxpose.xlu0.b32.end [2/2] (short) (narrow) %v2444_v62, 32  ;;  %v948_v38 = vpack.c.bf16 %v2470_v34, %v2469_v35 }
 0x305   : > { %v2473_v10 = vpop.permute.xlu1 %2472 }
 0x306   : > { %1029 = vxpose.xlu1.b32.end [2/2] (short) (narrow) %v2431_v63, 32  ;;  %v2475_v41 = vunpack.i.h.bf16 %v2473_v10  ;;  %v2474_v42 = vunpack.i.l.bf16 %v2473_v10 }
 0x308   : > { %v949_v43 = vpack.c.bf16 %v2475_v41, %v2474_v42 }
 0x30d   : > { %1066 = vxpose.xlu0.b32.start [1/2] (short) (narrow) %v2440_v3, 32 }
 0x311   : > { %1067 = vxpose.xlu0.b32.end [2/2] (short) (narrow) %v2441_v4, 32 }
 0x324   : > { %2507 = vset.pattern.permute.xlu1 %v3049_v1 }
 0x33a   : > { %2506 = vset.pattern.permute.xlu0 %v3049_v1 }
 0x380   : > { %v2446_v6 = vpop.trf.xlu0 }
 0x381   : > { %v2447_v8 = vunpack.i.l.bf16 %v2446_v6  ;;  %v2450_v1 = vunpack.i.h.bf16 %v2446_v6 }
 0x382   : > { %v1044_v13 = vpop.trf.xlu1 }
 0x384   : > { %v2451_v7 = vpop.trf.xlu0 }
 0x385   : > { %v2452_v9 = vunpack.i.l.bf16 %v2451_v7  ;;  %v2455_v17 = vunpack.i.h.bf16 %v2451_v7 }
 0x386   : > { %v1045_v19 = vpop.trf.xlu1 }
 0x387   : > { %v1098_v11 = vpack.c.bf16 %v2452_v9, %v2447_v8  ;;  %v1100_v22 = vpack.c.bf16 %v2455_v17, %v2450_v1  ;;  %v1102_v31 = vpack.c.bf16 %v1045_v19, %v1044_v13 }
 0x388   : > { %v2456_v12 = vpop.trf.xlu0 }
 0x389   : > { %2194 = vmatpush3.bf16.msra.mxu1 %v1098_v11  ;;  %v2457_v15 = vunpack.i.l.bf16 %v2456_v12  ;;  %v2460_v23 = vunpack.i.h.bf16 %v2456_v12 }
 0x38a   : > { %2195 = vmatprep.subr.bf16.mxu1 %v3047_v0  ;;  %v1046_v27 = vpop.trf.xlu1 }
 0x38c   : > { %v2461_v14 = vpop.trf.xlu0 }
 0x38d   : > { %v2462_v16 = vunpack.i.l.bf16 %v2461_v14  ;;  %v2465_v21 = vunpack.i.h.bf16 %v2461_v14 }
 0x38e   : > { %v1047_v32 = vpop.trf.xlu1 }
 0x38f   : > { %v1099_v18 = vpack.c.bf16 %v2462_v16, %v2457_v15  ;;  %v1101_v29 = vpack.c.bf16 %v2465_v21, %v2460_v23  ;;  %v1103_v36 = vpack.c.bf16 %v1047_v32, %v1046_v27 }
 0x390   : > { %v1082_v20 = vpop.trf.xlu0 }
 0x391   : > { %2196 = vmatpush3.bf16.msra.mxu1 %v1099_v18 }
 0x392   : > { %2201 = vmatprep.subr.bf16.mxu1 %v3047_v0 }
 0x394   : > { %2198 = vmatmul.mubr.msk.bf16.vlgmr.msra.gmra.mrb[4].mxu1 %vm1131_vm1, %v946_v46  ;;  %v1083_v28 = vpop.trf.xlu0 }
 0x395   : > { %2202 = vmatpush3.bf16.msra.mxu1 %v1100_v22  ;;  %2205 = vmatprep.mubr.msk.bf16.mxu1 %vm3048_vm0, %v3047_v0  ;;  %v1104_v37 = vpack.c.bf16 %v1083_v28, %v1082_v20 }
 0x396   : > { %2203 = vmatprep.subr.bf16.mxu1 %v3047_v0 }
 0x398   : > { %v1084_v33 = vpop.trf.xlu0 }
 0x399   : > { %2204 = vmatpush3.bf16.msra.mxu1 %v1101_v29 }
 0x39a   : > { %2209 = vmatprep.subr.bf16.mxu1 %v3047_v0 }
 0x39c   : > { %2206 = vmatmul.mubr.msk.bf16.vlgmr.msra.gmra.mrb[8].mxu1 %vm1131_vm1, %v947_v30  ;;  %v1085_v39 = vpop.trf.xlu0 }
 0x39d   : > { %2210 = vmatpush3.bf16.msra.mxu1 %v1102_v31  ;;  %2213 = vmatprep.mubr.msk.bf16.mxu1 %vm3048_vm0, %v3047_v0  ;;  %v1105_v40 = vpack.c.bf16 %v1085_v39, %v1084_v33 }
 0x39e   : > { %2211 = vmatprep.subr.bf16.mxu1 %v3047_v0 }
 0x3a1   : > { %2212 = vmatpush3.bf16.msra.mxu1 %v1103_v36 }
 0x3a2   : > { %2217 = vmatprep.subr.bf16.mxu1 %v3047_v0 }
 0x3a4   : > { %2214 = vmatmul.mubr.msk.bf16.vlgmr.msra.gmra.mrb[12].mxu1 %vm1131_vm1, %v948_v38 }
 0x3a5   : > { %2218 = vmatpush3.bf16.msra.mxu1 %v1104_v37  ;;  %2221 = vmatprep.mubr.msk.bf16.mxu1 %vm3048_vm0, %v3047_v0 }
 0x3a6   : > { %2219 = vmatprep.subr.bf16.mxu1 %v3047_v0 }
 0x3a9   : > { %2220 = vmatpush3.bf16.msra.mxu1 %v1105_v40 }
 0x3aa   : > { %2231 = vmatprep.subr.bf16.mxu1 %v3047_v0 }
 0x3ac   : > { %2222 = vmatmul.mubr.msk.bf16.vlgmr.msra.gmra.mrb[16].mxu1 %vm1131_vm1, %v949_v43 }
 0x3ad   : > { %2233 = vmatprep.mubr.msk.bf16.mxu1 %vm3048_vm0, %v3047_v0 }
 0x467   : > { %v1169_v44 = vpop.f32.mrb[4].mxu1 }
 0x468   : > { %v1308_v46 = vmul.f32 0.17677669, %v1169_v44  ;;  %v2199_v47 = vpop.f32.mrb[5].mxu1 }
 0x469   : > { %v1172_v48 = vpop.f32.mrb[6].mxu1 }
 0x46a   : > { %v1309_v49 = vmul.f32 0.17677669, %v1172_v48  ;;  %v2200_v50 = vpop.f32.mrb[7].mxu1  ;;  %v1322_v51 = vadd.f32 %v2101_v45, %v1308_v46 }
 0x46c   : > { %v1331_v52 = vsel %vm1330_vm2, %v1322_v51, -inf  ;;  %v1323_v53 = vadd.f32 %v2101_v45, %v1309_v49 }
 0x46d   : > { %1332 = vmax.xlane.f32.xlu0 %v1331_v52 }
 0x46e   : > { %v1334_v55 = vsel %vm1330_vm2, %v1323_v53, -inf }
 0x46f   : > { %1335 = vmax.xlane.f32.xlu1 %v1334_v55  ;;  %v1213_v56 = vpop.f32.mrb[8].mxu1 }
 0x470   : > { %v1310_v57 = vmul.f32 0.17677669, %v1213_v56  ;;  %v2207_v58 = vpop.f32.mrb[9].mxu1 }
 0x471   : > { %v1216_v59 = vpop.f32.mrb[10].mxu1 }
 0x472   : > { %v1311_v60 = vmul.f32 0.17677669, %v1216_v59  ;;  %v2208_v61 = vpop.f32.mrb[11].mxu1  ;;  %v1324_v62 = vadd.f32 %v2101_v45, %v1310_v57 }
 0x474   : > { %v1337_v63 = vsel %vm1330_vm2, %v1324_v62, -inf  ;;  %v1325_v2 = vadd.f32 %v2101_v45, %v1311_v60 }
 0x475   : > { %1338 = vmax.xlane.f32.xlu0 %v1337_v63 }
 0x476   : > { %v1340_v3 = vsel %vm1330_vm2, %v1325_v2, -inf }
 0x477   : > { %1341 = vmax.xlane.f32.xlu1 %v1340_v3  ;;  %v1257_v4 = vpop.f32.mrb[12].mxu1 }
 0x478   : > { %v1312_v5 = vmul.f32 0.17677669, %v1257_v4  ;;  %v2215_v6 = vpop.f32.mrb[13].mxu1 }
 0x479   : > { %v1260_v7 = vpop.f32.mrb[14].mxu1 }
 0x47a   : > { %v1313_v8 = vmul.f32 0.17677669, %v1260_v7  ;;  %v2216_v9 = vpop.f32.mrb[15].mxu1  ;;  %v1326_v10 = vadd.f32 %v2101_v45, %v1312_v5 }
 0x47c   : > { %v1343_v11 = vsel %vm1330_vm2, %v1326_v10, -inf  ;;  %v1327_v12 = vadd.f32 %v2101_v45, %v1313_v8 }
 0x47d   : > { %1344 = vmax.xlane.f32.xlu0 %v1343_v11 }
 0x47e   : > { %v1346_v13 = vsel %vm1330_vm2, %v1327_v12, -inf }
 0x47f   : > { %1347 = vmax.xlane.f32.xlu1 %v1346_v13  ;;  %v1301_v14 = vpop.f32.mrb[16].mxu1 }
 0x480   : > { %v1314_v15 = vmul.f32 0.17677669, %v1301_v14  ;;  %v2223_v16 = vpop.f32.mrb[17].mxu1 }
 0x481   : > { %v1304_v17 = vpop.f32.mrb[18].mxu1 }
 0x482   : > { %v1315_v18 = vmul.f32 0.17677669, %v1304_v17  ;;  %v2224_v19 = vpop.f32.mrb[19].mxu1  ;;  %v1328_v20 = vadd.f32 %v2101_v45, %v1314_v15 }
 0x484   : > { %v1349_v1 = vsel %vm1330_vm2, %v1328_v20, -inf  ;;  %v1329_v21 = vadd.f32 %v2101_v45, %v1315_v18 }
 0x485   : > { %1350 = vmax.xlane.f32.xlu0 %v1349_v1 }
 0x486   : > { %v1352_v22 = vsel %vm1330_vm2, %v1329_v21, -inf }
 0x487   : > { %1353 = vmax.xlane.f32.xlu1 %v1352_v22 }
 0x4fa   : > { %v1333_v23 = vpop.xlane.xlu0 %1332 }
 0x4fb   : > { %v1355_v24 = vsub.f32 %v1322_v51, %v1333_v23 }
 0x4fc   : > { %v1336_v26 = vpop.xlane.xlu1 %1335 }
 0x4fd   : > { %v1363_v27 = vmul.f32 1.442695, %v1355_v24  ;;  %v1356_v28 = vsub.f32 %v1323_v53, %v1336_v26 }
 0x4ff   : > { %2551 = vpow2.f32 %v1363_v27  ;;  %v1365_v29 = vmul.f32 1.442695, %v1356_v28 }
 0x501   : > { %2553 = vpow2.f32 %v1365_v29 }
 0x502   : > { %v1339_v30 = vpop.xlane.xlu0 %1338 }
 0x503   : > { %v1357_v31 = vsub.f32 %v1324_v62, %v1339_v30 }
 0x504   : > { %v1342_v32 = vpop.xlane.xlu1 %1341 }
 0x505   : > { %v1367_v33 = vmul.f32 1.442695, %v1357_v31  ;;  %v1358_v34 = vsub.f32 %v1325_v2, %v1342_v32 }
 0x507   : > { %2555 = vpow2.f32 %v1367_v33  ;;  %v1369_v35 = vmul.f32 1.442695, %v1358_v34 }
 0x509   : > { %v2552_v36 = vpop.eup %2551  ;;  %2557 = vpow2.f32 %v1369_v35 }
 0x50a   : > { %v1345_v37 = vpop.xlane.xlu0 %1344  ;;  %v1379_v38 = vsel %vm1330_vm2, %v2552_v36, 0.0 }
 0x50b   : > { %v2554_v39 = vpop.eup %2553  ;;  %v1359_v40 = vsub.f32 %v1326_v10, %v1345_v37  ;;  %1380 = vadd.xlane.f32.xlu0 %v1379_v38 }
 0x50c   : > { %v1348_v41 = vpop.xlane.xlu1 %1347  ;;  %v1382_v42 = vsel %vm1330_vm2, %v2554_v39, 0.0 }
 0x50d   : > { %v1371_v43 = vmul.f32 1.442695, %v1359_v40  ;;  %v1360_v44 = vsub.f32 %v1327_v12, %v1348_v41  ;;  %1383 = vadd.xlane.f32.xlu1 %v1382_v42 }
 0x50f   : > { %2559 = vpow2.f32 %v1371_v43  ;;  %v1373_v45 = vmul.f32 1.442695, %v1360_v44 }
 0x511   : > { %v3671_v46 = vpop.eup %2555  ;;  %2561 = vpow2.f32 %v1373_v45 }
 0x512   : > { %v1351_v47 = vpop.xlane.xlu0 %1350  ;;  %v1385_v48 = vsel %vm1330_vm2, %v3671_v46, 0.0 }
 0x513   : > { %v2558_v49 = vpop.eup %2557  ;;  %v1361_v50 = vsub.f32 %v1328_v20, %v1351_v47  ;;  %1386 = vadd.xlane.f32.xlu0 %v1385_v48  ;;  %v2543_v47 = vld [vmem:[#allocation13 + $0x8] sm:$0xff]  }
 0x514   : > { %v1388_v51 = vsel %vm1330_vm2, %v2558_v49, 0.0  ;;  %v1354_v60 = vpop.xlane.xlu1 %1353 }
 0x515   : > { %v1375_v52 = vmul.f32 1.442695, %v1361_v50  ;;  %1389 = vadd.xlane.f32.xlu1 %v1388_v51  ;;  %v1362_v61 = vsub.f32 %v1329_v21, %v1354_v60  ;;  %v2545_v60 = vld [vmem:[#allocation13 + $0x18] sm:$0xff]  }
 0x517   : > { %2563 = vpow2.f32 %v1375_v52  ;;  %v1377_v62 = vmul.f32 1.442695, %v1362_v61  ;;  %v2544_v52 = vld [vmem:[#allocation13 + $0x10] sm:$0xff]   ;;  %v2546_v61 = vld [vmem:[#allocation13 + $0x20] sm:$0xff]  }
 0x519   : > { %v2560_v53 = vpop.eup %2559  ;;  %2565 = vpow2.f32 %v1377_v62  ;;  %v2547_v62 = vld [vmem:[#allocation13 + $0x28] sm:$0xff]  }
 0x51a   : > { %v1391_v55 = vsel %vm1330_vm2, %v2560_v53, 0.0 }
 0x51b   : > { %v2562_v56 = vpop.eup %2561  ;;  %1392 = vadd.xlane.f32.xlu0 %v1391_v55 }
 0x51c   : > { %v1394_v57 = vsel %vm1330_vm2, %v2562_v56, 0.0 }
 0x51d   : > { %1395 = vadd.xlane.f32.xlu1 %v1394_v57 }
 0x521   : > { %v3678_v58 = vpop.eup %2563 }
 0x522   : > { %v1397_v59 = vsel %vm1330_vm2, %v3678_v58, 0.0 }
 0x523   : > { %1398 = vadd.xlane.f32.xlu0 %v1397_v59  ;;  %v2566_v63 = vpop.eup %2565 }
 0x524   : > { %v1400_v2 = vsel %vm1330_vm2, %v2566_v63, 0.0 }
 0x52e   : > { %2482 = vrot.lane.b32.xlu1 %v3626_v54, %s3052_s9 }
 0x539   : > { %2477 = vrot.lane.b32.xlu0 %v3626_v54, %s3050_s28 }
 0x552   : > { %1401 = vadd.xlane.f32.xlu1 %v1400_v2  ;;  %v2549_v2 = vld [vmem:[#allocation13 + $0x38] sm:$0xff]  }
 0x563   : > { %2487 = vrot.lane.b32.xlu1 %v3626_v54, %s3051_s5 }
 0x598   : > { %v1381_v3 = vpop.xlane.xlu0 %1380 }
 0x599   : > { %2567 = vrcp.f32 %v1381_v3 }
 0x59a   : > { %v1384_v4 = vpop.xlane.xlu1 %1383 }
 0x59b   : > { %2569 = vrcp.f32 %v1384_v4 }
 0x5a0   : > { %v1387_v6 = vpop.xlane.xlu0 %1386 }
 0x5a2   : > { %v1390_v8 = vpop.xlane.xlu1 %1389 }
 0x5a3   : > { %v2568_v5 = vpop.eup %2567  ;;  %2571 = vrcp.f32 %v1390_v8 }
 0x5a4   : > { %v1411_v9 = vmul.f32 %v2568_v5, %v2552_v36 }
 0x5a5   : > { %v2570_v7 = vpop.eup %2569 }
 0x5a6   : > { %v1412_v10 = vmul.f32 %v2570_v7, %v2554_v39 }
 0x5a8   : > { %v1393_v11 = vpop.xlane.xlu0 %1392  ;;  %v1419_v12 = vpack.c.bf16 %v1412_v10, %v1411_v9 }
 0x5a9   : > { %2573 = vrcp.f32 %v1393_v11 }
 0x5aa   : > { %2575 = vrcp.f32 %v1387_v6  ;;  %2228 = vmatmul.mubr.msk.bf16.vlgmr.msra.gmra.mrb[4].mxu0 %vm1330_vm2, %v1419_v12  ;;  %v1396_v13 = vpop.xlane.xlu1 %1395 }
 0x5ab   : > { %2577 = vrcp.f32 %v1396_v13  ;;  %2239 = vmatprep.mubr.msk.bf16.mxu0 %vm3048_vm0, %v3047_v0 }
 0x5ad   : > { %v2572_v18 = vpop.eup %2571 }
 0x5ae   : > { %v2483_v54 = vpop.permute.xlu1 %2482  ;;  %v1414_v24 = vmul.f32 %v2572_v18, %v2558_v49 }
 0x5af   : > { %v2485_v14 = vunpack.i.h.bf16 %v2483_v54  ;;  %v2484_v15 = vunpack.i.l.bf16 %v2483_v54 }
 0x5b0   : > { %v1399_v16 = vpop.xlane.xlu0 %1398 }
 0x5b1   : > { %v1128_v17 = vpack.c.bf16 %v2485_v14, %v2484_v15  ;;  %2579 = vrcp.f32 %v1399_v16 }
 0x5b3   : > { %v2574_v19 = vpop.eup %2573  ;;  %2238 = vmatpush3.bf16.msra.mxu0 %v1128_v17 }
 0x5b4   : > { %v2576_v20 = vpop.eup %2575  ;;  %v2478_v1 = vpop.permute.xlu0 %2477  ;;  %2249 = vmatprep.subr.bf16.mxu0 %v3047_v0  ;;  %v1415_v26 = vmul.f32 %v2574_v19, %v2560_v53 }
 0x5b5   : > { %v2578_v21 = vpop.eup %2577  ;;  %v2480_v22 = vunpack.i.h.bf16 %v2478_v1  ;;  %v2479_v23 = vunpack.i.l.bf16 %v2478_v1  ;;  %v1413_v29 = vmul.f32 %v2576_v20, %v3671_v46  ;;  %v2542_v46 = vld [vmem:[#allocation13] sm:$0xff]  }
 0x5b6   : > { %v1416_v27 = vmul.f32 %v2578_v21, %v2562_v56  ;;  %v2106_v21 = vld [vmem:[#allocation14] ss:$0 sm:$0xff] }
 0x5b7   : > { %v1127_v28 = vpack.c.bf16 %v2480_v22, %v2479_v23  ;;  %v1420_v31 = vpack.c.bf16 %v1414_v24, %v1413_v29  ;;  %v1744_v22 = vunpack.c.l.bf16 %v3605_v25 }
 0x5b8   : > { %v1421_v30 = vpack.c.bf16 %v1416_v27, %v1415_v26  ;;  %v1745_v27 = vunpack.c.h.bf16 %v3605_v25  ;;  %v1748_v25 = vld [vmem:[%s3587_s29] sm:$0xff] }
 0x5b9   : > { %2232 = vmatpush3.bf16.msra.mxu1 %v1127_v28 }
 0x5ba   : > { %2240 = vmatmul.mubr.msk.bf16.vlgmr.msra.gmra.mrb[8].mxu0 %vm1330_vm2, %v1421_v30  ;;  %2243 = vmatprep.subr.bf16.mxu1 %v3047_v0 }
 0x5bb   : > { %2265 = vmatprep.mubr.msk.bf16.mxu0 %vm3048_vm0, %v3047_v0  ;;  %v2580_v37 = vpop.eup %2579  ;;  %2250 = vmatpush3.bf16.msra.mxu0 %v2542_v46 }
 0x5bc   : > { %2234 = vmatmul.mubr.msk.bf16.vlgmr.msra.gmra.mrb[20].mxu1 %vm1330_vm2, %v1420_v31  ;;  %v1417_v39 = vmul.f32 %v2580_v37, %v3678_v58  ;;  %2251 = vmatprep.subr.bf16.mxu0 %v3047_v0 }
 0x5bd   : > { %2245 = vmatprep.mubr.msk.bf16.mxu1 %vm3048_vm0, %v3047_v0 }
 0x5bf   : > { %2252 = vmatpush3.bf16.msra.mxu0 %v2543_v47 }
 0x5c0   : > { %2253 = vmatprep.subr.bf16.mxu0 %v3047_v0 }
 0x5c3   : > { %2254 = vmatpush3.bf16.msra.mxu0 %v2544_v52 }
 0x5c4   : > { %2255 = vmatprep.subr.bf16.mxu0 %v3047_v0 }
 0x5c7   : > { %2256 = vmatpush3.bf16.msra.mxu0 %v2545_v60 }
 0x5c8   : > { %2257 = vmatprep.subr.bf16.mxu0 %v3047_v0 }
 0x5cb   : > { %2258 = vmatpush3.bf16.msra.mxu0 %v2546_v61 }
 0x5cc   : > { %2259 = vmatprep.subr.bf16.mxu0 %v3047_v0 }
 0x5cf   : > { %2260 = vmatpush3.bf16.msra.mxu0 %v2547_v62 }
 0x5d0   : > { %2261 = vmatprep.subr.bf16.mxu0 %v3047_v0 }
 0x5df   : > { %v1402_v32 = vpop.xlane.xlu1 %1401 }
 0x5e0   : > { %2581 = vrcp.f32 %v1402_v32 }
 0x5e3   : > { %v2488_v33 = vpop.permute.xlu1 %2487 }
 0x5e4   : > { %v2490_v34 = vunpack.i.h.bf16 %v2488_v33  ;;  %v2489_v35 = vunpack.i.l.bf16 %v2488_v33  ;;  %v1749_v33 = vld [vmem:[%s3587_s29 + $0x8] sm:$0xff] }
 0x5e6   : > { %v1129_v36 = vpack.c.bf16 %v2490_v34, %v2489_v35 }
 0x5e8   : > { %2244 = vmatpush3.bf16.msra.mxu1 %v1129_v36 }
 0x5ea   : > { %v2582_v38 = vpop.eup %2581 }
 0x5eb   : > { %v1418_v40 = vmul.f32 %v2582_v38, %v2566_v63  ;;  %v2548_v63 = vld [vmem:[#allocation13 + $0x30] sm:$0xff]  }
 0x5ec   : > { %2262 = vmatpush3.bf16.msra.mxu0 %v2548_v63 }
 0x5ed   : > { %v1422_v41 = vpack.c.bf16 %v1418_v40, %v1417_v39  ;;  %2263 = vmatprep.subr.bf16.mxu0 %v3047_v0 }
 0x5ef   : > { %2246 = vmatmul.mubr.msk.bf16.vlgmr.msra.gmra.mrb[24].mxu1 %vm1330_vm2, %v1422_v41 }
 0x5f0   : > { %2264 = vmatpush3.bf16.msra.mxu0 %v2549_v2 }
 0x67d   : > { %v1460_v42 = vpop.f32.mrb[4].mxu0 }
 0x67e   : > { %v2229_v43 = vpop.f32.mrb[5].mxu0 }
 0x67f   : > { %v1463_v44 = vpop.f32.mrb[6].mxu0 }
 0x680   : > { %v2230_v45 = vpop.f32.mrb[7].mxu0 }
 0x68d   : > { %v1548_v48 = vpop.f32.mrb[8].mxu0 }
 0x68e   : > { %v2241_v49 = vpop.f32.mrb[9].mxu0 }
 0x68f   : > { %v1504_v50 = vpop.f32.mrb[20].mxu1  ;;  %v1551_v51 = vpop.f32.mrb[10].mxu0  ;;  %v2115_v49 = vld [vmem:[#allocation16] ss:$0 sm:$0xff] }
 0x690   : > { %v2496_v53 = vpack.i.bf16 %v1551_v51, %v1548_v48  ;;  %v2235_v55 = vpop.f32.mrb[21].mxu1  ;;  %v2242_v56 = vpop.f32.mrb[11].mxu0 }
 0x691   : > { %v1507_v57 = vpop.f32.mrb[22].mxu1 }
 0x692   : > { %v2491_v58 = vpack.i.bf16 %v1507_v57, %v1504_v50  ;;  %v2236_v59 = vpop.f32.mrb[23].mxu1  ;;  %2497 = vrot.lane.b32.xlu0 %v2496_v53, %s3052_s9  ;;  %v2116_v53 = vld [vmem:[#allocation17] ss:$0 sm:$0xff] }
 0x694   : > { %2492 = vrot.lane.b32.xlu1 %v2491_v58, %s3051_s5 }
 0x6c2   : > { %v1592_v3 = vpop.f32.mrb[24].mxu1 }
 0x6c3   : > { %v2247_v4 = vpop.f32.mrb[25].mxu1 }
 0x6c4   : > { %v1595_v5 = vpop.f32.mrb[26].mxu1 }
 0x6c5   : > { %v2501_v6 = vpack.i.bf16 %v1595_v5, %v1592_v3  ;;  %v2248_v7 = vpop.f32.mrb[27].mxu1 }
 0x6c7   : > { %2502 = vrot.lane.b32.xlu1 %v2501_v6, %s3050_s28 }
 0x704   : > { %v2498_v11 = vpop.permute.xlu0 %2497 }
 0x705   : > { %v2500_v54 = vunpack.i.h.bf16 %v2498_v11  ;;  %v2499_v0 = vunpack.i.l.bf16 %v2498_v11 }
 0x706   : > { %v2493_v8 = vpop.permute.xlu1 %2492 }
 0x707   : > { %v2495_v9 = vunpack.i.h.bf16 %v2493_v8  ;;  %v2494_v10 = vunpack.i.l.bf16 %v2493_v8 }
 0x709   : > { %v1623_v12 = vsel %vm1131_vm1, %v1460_v42, %v2494_v10  ;;  %v1624_v13 = vsel %vm1131_vm1, %v1463_v44, %v2495_v9 }
 0x70a   : > { %v1626_v17 = vsel %vm1625_vm3, %v1623_v12, %v2499_v0  ;;  %v1627_v18 = vsel %vm1625_vm3, %v1624_v13, %v2500_v54 }
 0x739   : > { %v2503_v14 = vpop.permute.xlu1 %2502 }
 0x73a   : > { %v2505_v15 = vunpack.i.h.bf16 %v2503_v14  ;;  %v2504_v16 = vunpack.i.l.bf16 %v2503_v14 }
 0x73c   : > { %v1629_v19 = vsel %vm1628_vm4, %v1626_v17, %v2504_v16  ;;  %v1630_v20 = vsel %vm1628_vm4, %v1627_v18, %v2505_v15 }
 0x73d   : > { %v1631_v1 = vpack.c.bf16 %v1630_v20, %v1629_v19 }
 0x73f   : > { %2266 = vmatmul.mubr.bf16.vlgmr.msra.gmra.mrb[12].mxu0 %v1631_v1 }
 0x812   : > { %v1737_v23 = vpop.f32.mrb[12].mxu0 }
 0x813   : > { %v1738_v24 = vadd.f32 %v2106_v21, %v1737_v23  ;;  %v2267_v26 = vpop.f32.mrb[13].mxu0 }
 0x814   : > { %v1740_v28 = vpop.f32.mrb[14].mxu0 }
 0x815   : > { %v1741_v29 = vadd.f32 %v2106_v21, %v1740_v28  ;;  %v2268_v30 = vpop.f32.mrb[15].mxu0  ;;  %v1750_v31 = vadd.f32 %v1744_v22, %v1738_v24 }
 0x817   : > { %1752 = vadd.xlane.f32.xlu0 %v1750_v31  ;;  %v1751_v32 = vadd.f32 %v1745_v27, %v1741_v29 }
 0x819   : > { %1754 = vadd.xlane.f32.xlu1 %v1751_v32 }
 0x82a   : > { %1798 = vperm.xlu1 %2507, %v1749_v33  }
 0x8a4   : > { %v1753_v34 = vpop.xlane.xlu0 %1752 }
 0x8a5   : > { %v1757_v35 = vmul.f32 0.0078125, %v1753_v34 }
 0x8a6   : > { %v1755_v36 = vpop.xlane.xlu1 %1754 }
 0x8a7   : > { %v1759_v37 = vsub.f32 %v1750_v31, %v1757_v35  ;;  %v1758_v38 = vmul.f32 0.0078125, %v1755_v36 }
 0x8a9   : > { %v1760_v39 = vsub.f32 %v1751_v32, %v1758_v38  ;;  %v1761_v40 = vmul.f32 %v1759_v37, %v1759_v37 }
 0x8aa   : > { %v1799_v59 = vpop.permute.xlu1 %1798 }
 0x8ab   : > { %1763 = vadd.xlane.f32.xlu0 %v1761_v40  ;;  %v1762_v41 = vmul.f32 %v1760_v39, %v1760_v39 }
 0x8af   : > { %1765 = vadd.xlane.f32.xlu0 %v1762_v41 }
 0x8c5   : > { %1793 = vperm.xlu0 %2506, %v1748_v25  }
 0x938   : > { %v1764_v42 = vpop.xlane.xlu0 %1763 }
 0x939   : > { %v1767_v43 = vmul.f32 0.0078125, %v1764_v42 }
 0x93b   : > { %v1769_v44 = vadd.f32 1e-05, %v1767_v43 }
 0x93c   : > { %v1766_v45 = vpop.xlane.xlu0 %1765 }
 0x93d   : > { %2583 = vrsqrt.f32 %v1769_v44  ;;  %v1768_v46 = vmul.f32 0.0078125, %v1766_v45 }
 0x93f   : > { %v1770_v47 = vadd.f32 1e-05, %v1768_v46 }
 0x941   : > { %2585 = vrsqrt.f32 %v1770_v47 }
 0x944   : > { %v1794_v58 = vpop.permute.xlu0 %1793 }
 0x947   : > { %v2584_v48 = vpop.eup %2583 }
 0x948   : > { %v1773_v50 = vmul.f32 %v2584_v48, %v1759_v37 }
 0x94a   : > { %v1781_v51 = vmul.f32 %v2115_v49, %v1773_v50 }
 0x94b   : > { %v2586_v52 = vpop.eup %2585 }
 0x94c   : > { %v1774_v55 = vmul.f32 %v2586_v52, %v1760_v39  ;;  %v1789_v56 = vadd.f32 %v2116_v53, %v1781_v51 }
 0x94e   : > { %v1782_v57 = vmul.f32 %v2115_v49, %v1774_v55  ;;  %v1801_v61 = vmul.f32 %v1794_v58, %v1789_v56 }
 0x950   : > { %v1790_v60 = vadd.f32 %v2116_v53, %v1782_v57 }
 0x952   : > { %v1802_v62 = vmul.f32 %v1799_v59, %v1790_v60 }
 0x954   : > { %v2133_v63 = vpack.c.bf16 %v1802_v62, %v1801_v61 }
 0x956   : > { %2134 = vst [vmem:[%s645_s26] sm:$0xff] %v2133_v63  }
 0x957   : > { %2944 = shalt.err (!%p2941_p11)
}
 0x958   : > { %s2945_s13 = scalar_lea.hbm %s3726_s21, 128  ;;  %s2949_s25 = scalar_lea.hbm %s3874_s18, 256 }
 0x959   : > { %p2946_p12 = scmp.ne.s32.totalorder %s3726_s21, %s2945_s13  ;;  %p2950_p3 = scmp.lt.u32.totalorder %s3726_s21, %s3874_s18 }
 0x95a   : > { %p2951_p4 = scmp.lt.u32.totalorder %s2949_s25, %s2945_s13  ;;  %p2953_p5 = scmp.lt.u32.totalorder %s2945_s13, %s3726_s21 }
 0x95b   : > { %p2947_p2 = pnand %p2946_p12, %p3875_p9 }
 0x95c   : > { %p2952_p0 = por %p2951_p4, %p2950_p3 }
 0x95d   : > { %p2948_p13 = pneg %p2947_p2 }
 0x95e   : > { %p2954_p1 = por %p2953_p5, %p2952_p0 }
 0x960   : > { %p2955_p7 = pnand %p2954_p1, %p2948_p13 }
 0x962   : > { %2958 = shalt.err (!%p2955_p7)
}
 0x963   : > { %s3054_s28 = smov 4  }
 0x964   : > { %2309 = dma.vmem_to_hbm [thread:$0]  (%p3875_p9), %s3721_s23, 128, %s3726_s21, %s1814_s14, %s3052_s9, %s3052_s9, %s3054_s28  }
 0x965 PF: > { %s3876_s5 = sld [smem:[#allocation32_spill]]  ;;  %s3877_s26 = sld [smem:[#allocation38_spill]] }
 0x966   : > { %p3879_p6 = scmp.ge.s32.totalorder %s3029_s24, 2 }
 0x96b   : > { %s1842_s7 = sand.u32 1, %s3876_s5   ;;  %p3878_p10 = scmp.ne.s32.totalorder %s3877_s26, 0 }
 0x96c   : > { %s1843_s1 = scalar_lea.sflag [#allocation4], %s1842_s7 }
 0x96d   : > { %p2350_p8 = pnand %p3879_p6, %p3878_p10 }
 0x96f   : > { %3012 = dma.done.wait (!%p2350_p8), %s1843_s1, 128  }
 0x970   : > { %3014 = vsyncadd (!%p2350_p8), %s1843_s1, 4294967168  ;;  %s3880_s24 = sld [smem:[#allocation35_spill]]  ;;  %s3881_s30 = sld [smem:[#allocation33_spill]] }
 0x971   : > { %s3882_s23 = sld [smem:[#allocation36_spill]]  ;;  %s3883_s21 = smov %s3021_s22 }
 0x976   : > { %p32_p11 = scmp.ge.s32.totalorder %s3880_s24, 4   ;;  %s3884_s22 = smov %s3881_s30 }
 0x978   :  { %34 = sbr.rel (!%p32_p11) target bundleno = 21 (0x15), region = 180 }
 0x97f   :  { %1848 = vsyncpa [#allocation3], 1 }
 0x980   :  { %1850 = vsyncpa [#allocation3 + $0x1], 1 }
 0x981   :  { %1851 = vsyncpa [#allocation6], 1 }
 0x982   :  { %1853 = vsyncpa [#allocation6 + $0x1], 1 }
 0x983   :  { %1854 = vsyncpa [#allocation9], 1 }
 0x984   :  { %1855 = vsyncpa [#allocation12], 1 }
 0x985   :  { %1856 = vsyncpa [#allocation15], 1 }
 0x986   :  { %1857 = vsyncpa [#allocation18], 1 }
 0x987   :  { %1858 = vsyncpa [#allocation4], 1 }
 0x988   :  { %1860 = vsyncpa [#allocation4 + $0x1], 1 }

// kernel: transformer_decoder_forward.15
= control target key start
LH: loop header
LB: loop body
LE: loop exit
PB: predicated region body
PF: predicated region fallthrough
CT: control target
= control target key end

     0   :  { %s1088_s0 = inlined_call_operand.hbm [shape: f32[32,256], index: 0, kind: input, shape index: {}]   ;;  %s1089_s1 = inlined_call_operand.hbm [shape: f32[32,1], index: 1, kind: input, shape index: {}]   ;;  %s1090_s2 = inlined_call_operand.hbm [shape: f32[32,1], index: 2, kind: input, shape index: {}]   ;;  %s1091_s3 = inlined_call_operand.hbm [shape: f32[32,256], index: 3, kind: output, shape index: {}]  }
   0x1   :  { %1098 = sst [smem:[#allocation14_spill]] %s1089_s1 }
   0x2   :  { %8 = vsyncpa [#allocation3], 0 }
   0x3   :  { %10 = vsyncpa [#allocation3 + $0x1], 0 }
   0x4   :  { %11 = vsyncpa [#allocation6], 0 }
   0x5   :  { %13 = vsyncpa [#allocation6 + $0x1], 0 }
   0x6   :  { %14 = vsyncpa [#allocation4], 0 }
   0x7   :  { %16 = vsyncpa [#allocation4 + $0x1], 0  ;;  %s807_s12 = smov 0   ;;  %s809_s13 = smov 0  }
   0x8   :  { %s811_s14 = smov 0   ;;  %s813_s15 = smov 0  }
   0x9   :  { %s815_s16 = smov 0   ;;  %s817_s17 = smov 0  }
   0xa LB: > { %1099 = sst [smem:[#allocation12_spill]] %s770_s16  ;;  %s838_s18 = sadd.s32 4294967295, %s774_s17   ;;  %s774_s17 = sphi %s817_s17, %s22_s17   ;;  %s770_s16 = sphi %s815_s16, %s1117_s16   ;;  %s766_s15 = sphi %s813_s15, %s1116_s15   ;;  %s762_s14 = sphi %s811_s14, %s1120_s14   ;;  %s758_s13 = sphi %s809_s13, %s1119_s13   ;;  %s754_s12 = sphi %s807_s12, %s1118_s12  }
   0xb   : > { %s483_s19 = sadd.s32 4294967294, %s774_s17   ;;  %s34_s20 = sadd.s32 1, %s770_s16 }
   0xc   : > { %s43_s21 = sadd.s32 1, %s762_s14  ;;  %p36_p0 = scmp.ge.s32.totalorder %s34_s20, 2 }
   0xd   : > { %p50_p1 = scmp.ne.s32.totalorder %s762_s14, %s758_s13  ;;  %p51_p2 = scmp.eq.s32.totalorder %s774_s17, 0 }
   0xe   : > { %p56_p3 = scmp.ne.s32.totalorder %s758_s13, %s754_s12  ;;  %s1122_s20 = smov (%p36_p0, %s34_s20), 0 }
   0xf   : > { %1100 = sst [smem:[#allocation13_spill]] %s1122_s20  ;;  %p850_p4 = por %p51_p2, %p50_p1 }
  0x10   : > { %p57_p5 = scmp.eq.s32.totalorder %s838_s18, 0  ;;  %s38_s23 = ssub.s32 %s770_s16, %s1122_s20 }
  0x11   : > { %p134_p6 = scmp.eq.s32.totalorder %s838_s18, 1  ;;  %p41_p7 = scmp.eq.s32.totalorder %s38_s23, 0 }
  0x12   : > { %p858_p8 = por %p57_p5, %p56_p3  ;;  %p140_p10 = scmp.eq.s32.totalorder %s483_s19, 1 }
  0x13   : > { %p862_p9 = por %p134_p6, %p50_p1  ;;  %p535_p13 = scmp.lt.s32.totalorder %s774_s17, 2 }
  0x14   : > { %s1102_s24 = scalar_select %p858_p8, 1, 0 }
  0x15   : > { %s1103_s25 = scalar_select %p862_p9, 1, 0 }
  0x16   : > { %s867_s26 = scalar_select %p41_p7, %s762_s14, %s43_s21  }
  0x17   : > { %p869_p11 = por %p140_p10, %p56_p3  ;;  %s876_s28 = sand.u32 1, %s762_s14  }
  0x18   : > { %s184_s29 = sand.u32 1, %s774_s17   ;;  %s490_s30 = sshll.u32 %s876_s28, 4 }
  0x19   : > { %s1104_s27 = scalar_select %p869_p11, 1, 0 }
  0x1a   : > { %p882_p0 = pnand %p535_p13, %p850_p4  ;;  %s509_s5 = sshll.u32 %s770_s16, 8 }
  0x1b   : > { %s1106_s1 = sld [smem:[#allocation14_spill]]  ;;  %s188_s9 = scalar_lea.vmem [#allocation5], %s490_s30 }
  0x1c   : > { %s195_s10 = sshll.u32 %s188_s9, 4  ;;  %s898_s11 = scalar_lea.sflag [#allocation6], %s184_s29  ;;  %s896_s10 = int_to_ptr.vmem [resolvable:$true] %s195_s10 }
  0x1d   : > { %p904_p2 = pneg %p882_p0 }
  0x21   : > { %s892_s8 = scalar_lea.hbm %s1106_s1, %s509_s5  ;;  %s603_s6 = scalar_lea.hbm %s1106_s1, 512 }
  0x22   : > { %s598_s19 = scalar_lea.hbm %s892_s8, 256  ;;  %p604_p5 = scmp.lt.u32.totalorder %s892_s8, %s1106_s1 }
  0x23   : > { %p599_p1 = scmp.ne.s32.totalorder %s892_s8, %s598_s19  ;;  %p605_p6 = scmp.lt.u32.totalorder %s603_s6, %s598_s19 }
  0x24   : > { %p607_p10 = scmp.lt.u32.totalorder %s598_s19, %s892_s8 }
  0x25   : > { %p601_p3 = pnand %p904_p2, %p599_p1  ;;  %p606_p7 = por %p605_p6, %p604_p5 }
  0x27   : > { %p602_p4 = pneg %p601_p3  ;;  %p608_p13 = por %p607_p10, %p606_p7 }
  0x29   : > { %p609_p12 = pnand %p608_p13, %p602_p4 }
  0x2b   : > { %612 = shalt.err (!%p609_p12)
}
  0x2c   : > { %s613_s29 = scalar_lea.vmem %s896_s10, 256  ;;  %s776_s22 = smov [#allocation5]  }
  0x2d   : > { %p614_p1 = scmp.ne.s32.totalorder %s896_s10, %s613_s29  ;;  %s618_s23 = sshll.u32 %s776_s22, 4  ;;  %s619_s23 = int_to_ptr.vmem [resolvable:$false] %s618_s23 }
  0x2e   : > { %s620_s7 = scalar_lea.vmem %s619_s23, 512  ;;  %p621_p9 = scmp.lt.s32.totalorder %s896_s10, %s619_s23 }
  0x2f   : > { %p616_p3 = pnand %p614_p1, %p904_p2  ;;  %p622_p8 = scmp.lt.s32.totalorder %s620_s7, %s613_s29 }
  0x31   : > { %p617_p11 = pneg %p616_p3  ;;  %p623_p5 = por %p622_p8, %p621_p9 }
  0x33   : > { %p624_p6 = pnand %p623_p5, %p617_p11 }
  0x35   : > { %627 = shalt.err (!%p624_p6)
}
  0x36   : > { %s1095_s19 = smov 128   ;;  %s1096_s6 = smov 8  }
  0x37   : > { %527 = dma.hbm_to_vmem [thread:$0]  (!%p882_p0), %s892_s8, 256, %s896_s10, %s898_s11, %s1095_s19, %s1095_s19, %s1096_s6  }
  0x38   : > { %s936_s22 = scalar_lea.hbm %s1090_s2, %s509_s5  ;;  %s209_s23 = scalar_lea.vmem [#allocation7], %s490_s30 }
  0x39   : > { %s216_s7 = sshll.u32 %s209_s23, 4  ;;  %p496_p8 = scmp.ge.s32.totalorder %s774_s17, 1  ;;  %s941_s7 = int_to_ptr.vmem [resolvable:$true] %s216_s7 }
  0x3a   : > { %p224_p9 = scmp.lt.s32.totalorder %s774_s17, 3  ;;  %s486_s20 = sshll.u32 %s876_s28, 5 }
  0x3b   : > { %s508_s8 = sshll.u32 %s770_s16, 9  ;;  %s164_s30 = scalar_lea.vmem [#allocation2], %s486_s20 }
  0x3c   : > { %p944_p11 = pnand %p496_p8, %p224_p9  ;;  %s953_s9 = scalar_lea.hbm %s1088_s0, %s508_s8 }
  0x3d   : > { %s174_s5 = sshll.u32 %s164_s30, 4  ;;  %s161_s29 = scalar_lea.sflag [#allocation3], %s876_s28  ;;  %s955_s5 = int_to_ptr.vmem [resolvable:$true] %s174_s5 }
  0x3e   : > { %s1108_s1 = scalar_select %p944_p11, 1, 0 }
  0x3f   : > { %s628_s23 = scalar_lea.hbm %s953_s9, 512  ;;  %s633_s19 = scalar_lea.hbm %s1088_s0, 1024 }
  0x40   : > { %p629_p12 = scmp.ne.s32.totalorder %s953_s9, %s628_s23  ;;  %p634_p10 = scmp.lt.u32.totalorder %s953_s9, %s1088_s0 }
  0x41   : > { %p635_p13 = scmp.lt.u32.totalorder %s633_s19, %s628_s23  ;;  %p637_p3 = scmp.lt.u32.totalorder %s628_s23, %s953_s9 }
  0x42   : > { %p631_p4 = pnand %p629_p12, %p904_p2 }
  0x43   : > { %p636_p1 = por %p635_p13, %p634_p10 }
  0x44   : > { %p632_p7 = pneg %p631_p4 }
  0x45   : > { %p638_p5 = por %p637_p3, %p636_p1 }
  0x47   : > { %p639_p6 = pnand %p638_p5, %p632_p7 }
  0x49   : > { %642 = shalt.err (!%p639_p6)
}
  0x4a   : > { %s643_s20 = scalar_lea.vmem %s955_s5, 512  ;;  %s779_s16 = smov [#allocation2]  }
  0x4b   : > { %p644_p8 = scmp.ne.s32.totalorder %s955_s5, %s643_s20  ;;  %s648_s6 = sshll.u32 %s779_s16, 4  ;;  %s649_s6 = int_to_ptr.vmem [resolvable:$false] %s648_s6 }
  0x4c   : > { %s650_s30 = scalar_lea.vmem %s649_s6, 1024  ;;  %p651_p4 = scmp.lt.s32.totalorder %s955_s5, %s649_s6 }
  0x4d   : > { %p646_p9 = pnand %p644_p8, %p904_p2  ;;  %p652_p11 = scmp.lt.s32.totalorder %s650_s30, %s643_s20 }
  0x4f   : > { %p647_p12 = pneg %p646_p9  ;;  %p653_p10 = por %p652_p11, %p651_p4 }
  0x51   : > { %p654_p13 = pnand %p653_p10, %p647_p12 }
  0x53   : > { %657 = shalt.err (!%p654_p13)
}
  0x54   : > { %s780_s23 = smov 256   ;;  %s781_s19 = smov 16  }
  0x55   : > { %524 = dma.hbm_to_vmem [thread:$0]  (!%p882_p0), %s953_s9, 512, %s955_s5, %s161_s29, %s780_s23, %s780_s23, %s781_s19  }
  0x56   : > { %s658_s8 = scalar_lea.hbm %s936_s22, 256  ;;  %s663_s16 = scalar_lea.hbm %s1090_s2, 512 }
  0x57   : > { %p659_p7 = scmp.ne.s32.totalorder %s936_s22, %s658_s8  ;;  %p664_p3 = scmp.lt.u32.totalorder %s936_s22, %s1090_s2 }
  0x58   : > { %p665_p5 = scmp.lt.u32.totalorder %s663_s16, %s658_s8  ;;  %p667_p8 = scmp.lt.u32.totalorder %s658_s8, %s936_s22 }
  0x59   : > { %p661_p11 = pnand %p659_p7, %p904_p2 }
  0x5a   : > { %p666_p6 = por %p665_p5, %p664_p3 }
  0x5b   : > { %p662_p1 = pneg %p661_p11 }
  0x5c   : > { %p668_p9 = por %p667_p8, %p666_p6 }
  0x5e   : > { %p669_p12 = pnand %p668_p9, %p662_p1 }
  0x60   : > { %672 = shalt.err (!%p669_p12)
}
  0x61   : > { %s673_s28 = scalar_lea.vmem %s941_s7, 256  ;;  %s782_s9 = smov [#allocation7]  }
  0x62   : > { %p674_p4 = scmp.ne.s32.totalorder %s941_s7, %s673_s28  ;;  %s678_s5 = sshll.u32 %s782_s9, 4  ;;  %s679_s5 = int_to_ptr.vmem [resolvable:$false] %s678_s5 }
  0x63   : > { %s680_s29 = scalar_lea.vmem %s679_s5, 512  ;;  %p681_p7 = scmp.lt.s32.totalorder %s941_s7, %s679_s5 }
  0x64   : > { %p676_p10 = pnand %p674_p4, %p904_p2  ;;  %p682_p11 = scmp.lt.s32.totalorder %s680_s29, %s673_s28 }
  0x66   : > { %p677_p13 = pneg %p676_p10  ;;  %p683_p3 = por %p682_p11, %p681_p7 }
  0x68   : > { %p684_p5 = pnand %p683_p3, %p677_p13 }
  0x6a   : > { %687 = shalt.err (!%p684_p5)
}
  0x6b   : > { %s1109_s23 = smov 8   ;;  %s1110_s19 = smov 128  }
  0x6c   : > { %530 = dma.hbm_to_vmem [thread:$0]  (!%p882_p0), %s936_s22, 256, %s941_s7, %s898_s11, %s1110_s19, %s1110_s19, %s1109_s23  }
  0x6d   : > { %p1111_p2 = scmp.ne.s32.totalorder %s1108_s1, 0 }
  0x6e   : > { %s1009_s21 = sand.u32 (!%p1111_p2), 1, %s758_s13   ;;  %p1112_p1 = scmp.ne.s32.totalorder (!%p1111_p2), %s1102_s24, 0 }
  0x6f   : > { %228 = sbr.rel (%p1111_p2) target bundleno = 286 (0x11e), region = 32  ;;  %s497_s8 = sshll.u32 (!%p1111_p2), %s1009_s21, 5 }
  0x70   : > { %s231_s10 = scalar_lea.sflag (!%p1111_p2), [#allocation3], %s1009_s21  ;;  %s1015_s4 = scalar_lea.vmem (!%p1111_p2), [#allocation2], %s497_s8 }
  0x76   : > { %741 = dma.done.wait (%p1112_p1), %s231_s10, 512  }
  0x77   : > { %743 = vsyncadd (%p1112_p1), %s231_s10, 4294966784  ;;  %s239_s1 = sand.u32 1, %s838_s18   ;;  %s498_s11 = sshll.u32 %s1009_s21, 4 }
  0x78   : > { %s240_s22 = scalar_lea.sflag [#allocation6], %s239_s1  ;;  %s243_s7 = scalar_lea.vmem [#allocation5], %s498_s11 }
  0x79   : > { %745 = dma.done.wait (%p1112_p1), %s240_s22, 512  }
  0x7a   : > { %747 = vsyncadd (%p1112_p1), %s240_s22, 4294966784  ;;  %v783_v0 = vmov 0   ;;  %v295_v1 = vld [vmem:[%s243_s7] sm:$0xff]  ;;  %s252_s20 = scalar_lea.vmem [#allocation7], %s498_s11  ;;  %v296_v4 = vld [vmem:[%s243_s7 + $0x8] sm:$0xff]  ;;  %s284_s18 = scalar_lea.vmem [#allocation8], %s497_s8 }
  0x7b   : > { %592 = vset.pattern.permute.xlu0 %v783_v0  ;;  %593 = vset.pattern.permute.xlu1 %v783_v0  ;;  %v311_v2 = vld [vmem:[%s252_s20] sm:$0xff]  ;;  %v312_v3 = vld [vmem:[%s252_s20 + $0x8] sm:$0xff]  ;;  %s352_s24 = sshll.u32 %s284_s18, 4  ;;  %s512_s16 = sshll.u32 %s766_s15, 9  ;;  %s1034_s24 = int_to_ptr.vmem [resolvable:$true] %s352_s24 }
  0x7c   : > { %299 = vperm.xlu0 %592, %v295_v1   ;;  %594 = vlog2.f32 %v311_v2  ;;  %v291_v10 = vld [vmem:[%s1015_s4] sm:$0xff]  ;;  %v292_v11 = vld [vmem:[%s1015_s4 + $0x8] sm:$0xff]  ;;  %v293_v15 = vld [vmem:[%s1015_s4 + $0x10] sm:$0xff]  ;;  %s1039_s28 = scalar_lea.hbm %s1091_s3, %s512_s16  ;;  %s336_s15 = scalar_lea.sflag [#allocation4], %s1009_s21 }
  0x7d   : > { %596 = vlog2.f32 %v312_v3  ;;  %v294_v16 = vld [vmem:[%s1015_s4 + $0x18] sm:$0xff]  ;;  %s688_s9 = scalar_lea.vmem %s1034_s24, 512  ;;  %p1113_p6 = scmp.ne.s32.totalorder %s1103_s25, 0 }
  0x7e   : > { %p689_p0 = scmp.ne.s32.totalorder %s1034_s24, %s688_s9  ;;  %s784_s5 = smov [#allocation8]  }
  0x7f   : > { %s692_s29 = sshll.u32 %s784_s5, 4  ;;  %s693_s29 = int_to_ptr.vmem [resolvable:$false] %s692_s29 }
  0x80   : > { %304 = vperm.xlu0 %592, %v296_v4   ;;  %p690_p8 = pnand %p689_p0, %p1113_p6  ;;  %s694_s23 = scalar_lea.vmem %s693_s29, 1024 }
  0x81   : > { %p695_p12 = scmp.lt.s32.totalorder %s1034_s24, %s693_s29  ;;  %p696_p4 = scmp.lt.s32.totalorder %s694_s23, %s688_s9 }
  0x82   : > { %p691_p9 = pneg %p690_p8 }
  0x83   : > { %p697_p10 = por %p696_p4, %p695_p12 }
  0x85   : > { %p698_p13 = pnand %p697_p10, %p691_p9 }
  0x86   : > { %v595_v5 = vpop.eup %594 }
  0x87   : > { %v597_v6 = vpop.eup %596  ;;  %v314_v7 = vmul.f32 0.6931472, %v595_v5 }
  0x88   : > { %v316_v8 = vmul.f32 0.6931472, %v597_v6 }
  0x89   : > { %319 = vperm.xlu1 %593, %v314_v7  }
  0x8d   : > { %324 = vperm.xlu1 %593, %v316_v8  }
  0xfb   : > { %v300_v9 = vpop.permute.xlu0 %299 }
  0xfc   : > { %v307_v12 = vsub.f32 %v291_v10, %v300_v9  ;;  %v308_v13 = vsub.f32 %v292_v11, %v300_v9 }
  0xff   : > { %v305_v14 = vpop.permute.xlu0 %304 }
 0x100   : > { %v309_v20 = vsub.f32 %v293_v15, %v305_v14  ;;  %v310_v21 = vsub.f32 %v294_v16, %v305_v14 }
 0x108   : > { %v320_v17 = vpop.permute.xlu1 %319 }
 0x109   : > { %v327_v18 = vsub.f32 %v307_v12, %v320_v17  ;;  %v328_v19 = vsub.f32 %v308_v13, %v320_v17 }
 0x10b   : > { %331 = vst [vmem:[%s284_s18] sm:$0xff] %v327_v18  ;;  %332 = vst [vmem:[%s284_s18 + $0x8] sm:$0xff] %v328_v19 }
 0x10c   : > { %v325_v22 = vpop.permute.xlu1 %324 }
 0x10d   : > { %v329_v23 = vsub.f32 %v309_v20, %v325_v22  ;;  %v330_v24 = vsub.f32 %v310_v21, %v325_v22 }
 0x10f   : > { %333 = vst [vmem:[%s284_s18 + $0x10] sm:$0xff] %v329_v23  ;;  %334 = vst [vmem:[%s284_s18 + $0x18] sm:$0xff] %v330_v24 }
 0x110   : > { %701 = shalt.err (!%p698_p13)
}
 0x111   : > { %s702_s19 = scalar_lea.hbm %s1039_s28, 512  ;;  %s706_s4 = scalar_lea.hbm %s1091_s3, 1024 }
 0x112   : > { %p703_p7 = scmp.ne.s32.totalorder %s1039_s28, %s702_s19  ;;  %p707_p5 = scmp.lt.u32.totalorder %s1039_s28, %s1091_s3 }
 0x113   : > { %p708_p2 = scmp.lt.u32.totalorder %s706_s4, %s702_s19  ;;  %p710_p0 = scmp.lt.u32.totalorder %s702_s19, %s1039_s28 }
 0x114   : > { %p704_p11 = pnand %p703_p7, %p1113_p6 }
 0x115   : > { %p709_p1 = por %p708_p2, %p707_p5 }
 0x116   : > { %p705_p3 = pneg %p704_p11 }
 0x117   : > { %p711_p8 = por %p710_p0, %p709_p1 }
 0x119   : > { %p712_p9 = pnand %p711_p8, %p705_p3 }
 0x11b   : > { %715 = shalt.err (!%p712_p9)
}
 0x11c   : > { %s785_s22 = smov 256   ;;  %s786_s7 = smov 16  }
 0x11d   : > { %519 = dma.vmem_to_hbm [thread:$0]  (%p1113_p6), %s1034_s24, 512, %s1039_s28, %s336_s15, %s785_s22, %s785_s22, %s786_s7  }
 0x11e PF: > { %s367_s20 = sand.u32 1, %s754_s12   ;;  %p1114_p12 = scmp.ne.s32.totalorder %s1104_s27, 0 }
 0x11f   : > { %p1115_p4 = scmp.ge.s32.totalorder %s774_s17, 2  ;;  %s368_s18 = scalar_lea.sflag [#allocation4], %s367_s20 }
 0x121   : > { %p532_p10 = pnand %p1115_p4, %p1114_p12 }
 0x123   : > { %749 = dma.done.wait (!%p532_p10), %s368_s18, 512  }
 0x124   : > { %751 = vsyncadd (!%p532_p10), %s368_s18, 4294966784  ;;  %s22_s17 = sadd.s32 1, %s774_s17   ;;  %s1116_s15 = sld [smem:[#allocation12_spill]] }
 0x125   : > { %p19_p13 = scmp.ge.s32.totalorder %s22_s17, 4   ;;  %s1117_s16 = sld [smem:[#allocation13_spill]] }
 0x126   : > { %s1118_s12 = smov %s758_s13  ;;  %s1119_s13 = smov %s762_s14 }
 0x127   : > { %s1120_s14 = smov %s867_s26  ;;  %21 = sbr.rel (!%p19_p13) target bundleno = 10 (0xa), region = 101 }
 0x12e   :  { %373 = vsyncpa [#allocation3], 1 }
 0x12f   :  { %375 = vsyncpa [#allocation3 + $0x1], 1 }
 0x130   :  { %376 = vsyncpa [#allocation6], 1 }
 0x131   :  { %378 = vsyncpa [#allocation6 + $0x1], 1 }
 0x132   :  { %379 = vsyncpa [#allocation4], 1 }
 0x133   :  { %381 = vsyncpa [#allocation4 + $0x1], 1 }

</bundles_post_ra>
